<compile_context>
chip_gen: v5e
topology: v5e:2x2
jax: 0.10.0
libtpu: 0.0.40
codegen_flags: <defaults>
</compile_context>

<pallas_src>
import math

import jax
import jax.numpy as jnp
from jax.experimental import pallas as pl
from jax.experimental.pallas import tpu as pltpu

MEAN_PAD = 128                 # lane-dense padding for the 1-wide mean head
COMPUTE_DTYPE = jnp.bfloat16   # weight / activation storage dtype


def _round_up(x, m):
    return ((x + m - 1) // m) * m


# ----------------------------------------------------------------------------
# Fused forward kernel: encoder -> fused (mean1 | dec1) -> mean head / decoder.
# All activations stay in VMEM/vregs; weights are manually DMA'd once (step 0).
# ----------------------------------------------------------------------------
def _make_kernel(n_enc, n_dec, n_chunks, bias_off, bias_width, compute_dtype):
    # weight order: enc[0..n_enc-1], fused(mean1|dec1), mean2, dec[1..n_dec-1]
    n_w = n_enc + 2 + (n_dec - 1)

    def kernel(*refs):
        x_ref = refs[0]
        w_hbm = refs[1:1 + n_w]                       # raw HBM refs (pl.ANY)
        b_ref = refs[1 + n_w]                         # packed biases (VMEM)
        out_ref = refs[2 + n_w]
        mean_ref = refs[3 + n_w]
        w_vmem = refs[4 + n_w:4 + 2 * n_w]            # resident weight scratch
        sem = refs[4 + 2 * n_w]

        step = pl.program_id(0)
        k0 = w_hbm[0].shape[0]
        ck = k0 // n_chunks

        # Layer-0 weight is K-chunked so its DMA overlaps its own matmul.
        chunk_copies = [
            pltpu.make_async_copy(
                w_hbm[0].at[pl.ds(c * ck, ck), :],
                w_vmem[0].at[pl.ds(c * ck, ck), :],
                sem.at[c])
            for c in range(n_chunks)
        ]
        # Remaining weights: whole-tensor copies, issued in use order AFTER
        # the critical layer-0 chunks so they don't steal HBM bandwidth.
        rest_copies = [
            pltpu.make_async_copy(w_hbm[i], w_vmem[i], sem.at[n_chunks + i - 1])
            for i in range(1, n_w)
        ]

        @pl.when(step == 0)           # weights stay resident across grid steps
        def _issue_all():
            for c in chunk_copies:
                c.start()
            for c in rest_copies:
                c.start()

        def bias(idx):
            off, width = bias_off[idx], bias_width[idx]
            return b_ref[:, off:off + width]

        def dense(h, idx, relu):
            @pl.when(step == 0)
            def _():
                rest_copies[idx - 1].wait()
            y = jnp.dot(h, w_vmem[idx][...], preferred_element_type=jnp.float32)
            y = y + bias(idx)
            if relu:
                y = jnp.maximum(y, 0.0)
            return y

        # ---- Encoder layer 0: chunked accumulate so compute starts as soon
        # as the first weight chunk lands.
        x = x_ref[...].astype(compute_dtype)          # f32 -> bf16 in-kernel
        n0 = w_vmem[0].shape[1]
        acc = jnp.zeros((x.shape[0], n0), jnp.float32)
        for c in range(n_chunks):
            @pl.when(step == 0)
            def _(copy=chunk_copies[c]):
                copy.wait()
            acc = acc + jnp.dot(x[:, c * ck:(c + 1) * ck],
                                w_vmem[0][c * ck:(c + 1) * ck, :],
                                preferred_element_type=jnp.float32)
        h = jnp.maximum(acc + bias(0), 0.0).astype(compute_dtype)

        # ---- Remaining encoder layers (Linear + ReLU).
        for li in range(1, n_enc):
            h = dense(h, li, relu=True).astype(compute_dtype)

        # ---- Fused (mean-decoder layer 0 | decoder layer 0): one matmul,
        # both branches get ReLU.  Mean hidden occupies lanes [0, MEAN_PAD)
        # (zero-padded), decoder hidden occupies lanes [MEAN_PAD, ...).
        yf = dense(h, n_enc, relu=True)
        m = yf[:, :MEAN_PAD].astype(compute_dtype)
        d = yf[:, MEAN_PAD:].astype(compute_dtype)

        # ---- Mean head output (lane-padded to MEAN_PAD, column 0 is real).
        mean_ref[...] = dense(m, n_enc + 1, relu=False).astype(mean_ref.dtype)

        # ---- Remaining decoder layers (ReLU on all but the last).
        for li in range(1, n_dec):
            relu = li < n_dec - 1
            d = dense(d, n_enc + 2 + (li - 1), relu=relu)
            if relu:
                d = d.astype(compute_dtype)
        out_ref[...] = d.astype(out_ref.dtype)

    return kernel


def _fused_forward(weights, b_packed, x_flat, *, n_enc, n_dec, bias_off,
                   bias_width):
    n_w = len(weights)
    B, K0 = x_flat.shape
    out_dim = weights[-1].shape[1]
    bias_total = b_packed.shape[1]

    # Batch tiling: pad to a multiple of 16 (bf16 sublane packing); TB up to
    # 256 to fill the v6e/v7x 256-row MXU (v5e just runs two 128-row passes).
    TB = min(256, _round_up(B, 16))
    B_pad = _round_up(B, TB)
    x_p = x_flat if B_pad == B else jnp.pad(x_flat, ((0, B_pad - B), (0, 0)))
    num_tiles = B_pad // TB

    # Layer-0 K-chunking (chunks stay (16,128)-tile aligned).
    if K0 % (4 * 256) == 0:
        n_chunks = 4
    elif K0 % (2 * 256) == 0:
        n_chunks = 2
    else:
        n_chunks = 1

    # VMEM budget guard: weights are co-resident (not tiled), so fail loudly
    # before we blow past v7x's 64 MiB physical VMEM.
    weight_bytes = sum(int(math.prod(w.shape)) * w.dtype.itemsize for w in weights)
    io_bytes = 2 * 4 * (TB * K0 + TB * out_dim + TB * MEAN_PAD + bias_total)
    vmem_needed = weight_bytes + io_bytes + (1 << 20)
    if vmem_needed > 48 * (1 << 20):
        # TODO(synk): chunk the big weights over K/N instead of holding whole.
        raise ValueError(
            f"weight-resident VMEM plan needs {vmem_needed} bytes; exceeds "
            "the v7x 64 MiB guard")
    vmem_limit = int(2 * vmem_needed) if vmem_needed > (16 << 20) else None

    kernel = _make_kernel(n_enc, n_dec, n_chunks, bias_off, bias_width,
                          COMPUTE_DTYPE)

    in_specs = (
        [pl.BlockSpec((TB, K0), lambda i: (i, 0))]                  # x tile
        + [pl.BlockSpec(memory_space=pl.ANY) for _ in weights]      # raw HBM
        + [pl.BlockSpec((1, bias_total), lambda i: (0, 0))]         # packed bias
    )
    out_specs = (
        pl.BlockSpec((TB, out_dim), lambda i: (i, 0)),
        pl.BlockSpec((TB, MEAN_PAD), lambda i: (i, 0)),
    )
    out_shape = (
        jax.ShapeDtypeStruct((B_pad, out_dim), jnp.float32),
        jax.ShapeDtypeStruct((B_pad, MEAN_PAD), jnp.float32),
    )
    scratch_shapes = (
        [pltpu.VMEM(w.shape, w.dtype) for w in weights]
        + [pltpu.SemaphoreType.DMA((n_chunks + n_w - 1,))]
    )

    out_full, mean_full = pl.pallas_call(
        kernel,
        out_shape=out_shape,
        grid_spec=pltpu.PrefetchScalarGridSpec(
            num_scalar_prefetch=0,
            grid=(num_tiles,),
            in_specs=in_specs,
            out_specs=out_specs,
            scratch_shapes=scratch_shapes,
        ),
        compiler_params=pltpu.CompilerParams(
            # Weights are DMA'd only on grid step 0 and stay resident in
            # scratch, so the batch-tile axis must run serially on one core.
            # TODO(synk): for several-hundred-row batches on v7x, split the
            # batch across both TensorCores with per-core weight loads.
            dimension_semantics=("arbitrary",),
            vmem_limit_bytes=vmem_limit,
        ),
    )(x_p, *weights, b_packed)

    return out_full[:B], mean_full[:B, 0:1]        # (B, out_dim), (B, 1)


# ----------------------------------------------------------------------------
# Parameter construction (deterministic, nn.Linear-style init, f32 master).
# ----------------------------------------------------------------------------
def _init_linear(key, in_dim, out_dim):
    kw, kb = jax.random.split(key)
    bound = 1.0 / math.sqrt(in_dim)
    w = jax.random.uniform(kw, (in_dim, out_dim), jnp.float32, -bound, bound)
    b = jax.random.uniform(kb, (1, out_dim), jnp.float32, -bound, bound)
    return w, b


def build_params(key, input_dim, encoder_hidden_dims, decoder_hidden_dims=None,
                 added_features_dim=0, append_mode=1):
    # Mirrors Autoencoder_decoupled.__init__ dimension bookkeeping
    # (batch_normalization=False, dropout_rate=None).
    if append_mode in (1, 3):
        encoder_dims = [input_dim + added_features_dim, *encoder_hidden_dims]
    else:
        encoder_dims = [input_dim, *encoder_hidden_dims]
    if decoder_hidden_dims is None:
        decoder_hidden_dims = ([] if len(encoder_hidden_dims) == 1
                               else encoder_hidden_dims[::-1][1:])
    if append_mode in (2, 3):
        decoder_dims = [encoder_dims[-1] + added_features_dim,
                        *decoder_hidden_dims, input_dim]
    else:
        decoder_dims = [encoder_dims[-1], *decoder_hidden_dims, input_dim]

    n_keys = (len(encoder_dims) - 1) + (len(decoder_dims) - 1) + 2
    keys = list(jax.random.split(key, n_keys))

    encoder = [_init_linear(keys.pop(0), encoder_dims[i], encoder_dims[i + 1])
               for i in range(len(encoder_dims) - 1)]
    decoder = [_init_linear(keys.pop(0), decoder_dims[i], decoder_dims[i + 1])
               for i in range(len(decoder_dims) - 1)]
    mean_hidden = int(math.floor(decoder_dims[0] / 2))
    mean_decoder = [_init_linear(keys.pop(0), decoder_dims[0], mean_hidden),
                    _init_linear(keys.pop(0), mean_hidden, 1)]
    return {"encoder": encoder, "decoder": decoder, "mean_decoder": mean_decoder}


def pack_for_kernel(params, w_dtype=COMPUTE_DTYPE):
    """One-time (eager) packing: fuse mean1|dec1, pad the mean head to 128
    lanes, cast weights to bf16, and pack all biases into one f32 row with
    128-aligned segment offsets."""
    enc = params["encoder"]
    dec = params["decoder"]
    (mw1, mb1), (mw2, mb2) = params["mean_decoder"]

    # Fusion needs ReLU on decoder layer 0 (true whenever the decoder has >=2
    # layers, as in the default-hidden-dims configuration).
    # TODO(synk): support the single-layer-decoder case without fusion.
    assert len(dec) >= 2, "fused mean1|dec1 path requires >=2 decoder layers"
    mean_hidden = mw1.shape[1]
    assert mean_hidden <= MEAN_PAD

    h_dim = enc[-1][0].shape[1]
    dec_w1, dec_b1 = dec[0]
    fused_n = MEAN_PAD + dec_w1.shape[1]
    fused_w = jnp.zeros((h_dim, fused_n), jnp.float32)
    fused_w = fused_w.at[:, :mean_hidden].set(mw1)
    fused_w = fused_w.at[:, MEAN_PAD:].set(dec_w1)
    fused_b = jnp.zeros((1, fused_n), jnp.float32)
    fused_b = fused_b.at[:, :mean_hidden].set(mb1)
    fused_b = fused_b.at[:, MEAN_PAD:].set(dec_b1)

    # Mean output head lane-padded: columns 1..MEAN_PAD-1 (and rows past the
    # true hidden width) are exact zeros, so column 0 is the true mean.
    mw2p = jnp.zeros((MEAN_PAD, MEAN_PAD), jnp.float32).at[:mean_hidden, 0:1].set(mw2)
    mb2p = jnp.zeros((1, MEAN_PAD), jnp.float32).at[:, 0:1].set(mb2)

    weights = [w for w, _ in enc] + [fused_w, mw2p] + [w for w, _ in dec[1:]]
    biases = [b for _, b in enc] + [fused_b, mb2p] + [b for _, b in dec[1:]]
    weights = [w.astype(w_dtype) for w in weights]

    bias_off, bias_width, segs = [], [], []
    off = 0
    for b in biases:
        width = b.shape[1]
        bias_off.append(off)
        bias_width.append(width)
        pad_w = _round_up(width, 128)
        segs.append(jnp.pad(b, ((0, 0), (0, pad_w - width))))
        off += pad_w
    b_packed = jnp.concatenate(segs, axis=1)

    meta = dict(n_enc=len(enc), n_dec=len(dec),
                bias_off=tuple(bias_off), bias_width=tuple(bias_width))
    return tuple(weights), b_packed, meta


# ----------------------------------------------------------------------------
# Forward pass (non-list input path of Autoencoder_decoupled.forward)
# ----------------------------------------------------------------------------
def make_forward(meta):
    n_enc, n_dec = meta["n_enc"], meta["n_dec"]
    bias_off, bias_width = meta["bias_off"], meta["bias_width"]

    @jax.jit
    def forward(weights, b_packed, x):
        input_shape = x.shape
        x_flat = x.reshape(input_shape[0], -1)
        out_flat, mean_col = _fused_forward(
            list(weights), b_packed, x_flat,
            n_enc=n_enc, n_dec=n_dec,
            bias_off=bias_off, bias_width=bias_width)
        out = out_flat.reshape(input_shape)
        out_mean = mean_col[..., None]          # (B,1) -> (B,1,1) == unsqueeze(-1)
        return out, out_mean

    return forward


# Pure-JAX reference (same dtype strategy) for a correctness cross-check.
def reference_forward(params, x, compute_dtype=COMPUTE_DTYPE):
    def dense(h, w, b, relu):
        y = jnp.dot(h.astype(compute_dtype), w.astype(compute_dtype),
                    preferred_element_type=jnp.float32) + b
        return jnp.maximum(y, 0.0) if relu else y

    B = x.shape[0]
    h = x.reshape(B, -1)
    for w, b in params["encoder"]:
        h = dense(h, w, b, True)
    (mw1, mb1), (mw2, mb2) = params["mean_decoder"]
    m = dense(h, mw1, mb1, True)
    mean = dense(m, mw2, mb2, False)
    d = h
    dec = params["decoder"]
    for i, (w, b) in enumerate(dec):
        d = dense(d, w, b, i < len(dec) - 1)
    return d.reshape(x.shape), mean[..., None]


# ----------------------------------------------------------------------------
if __name__ == "__main__":
    key = jax.random.PRNGKey(0)
    k_x, k_p = jax.random.split(key)

    # Small shapes consistent with the module: x is (B, C, H, W), flattened
    # input_dim = C*H*W = 1024, encoder [1024->256->64], decoder [64->256->1024],
    # mean decoder [64->32->1].
    B, C, H, W = 2, 4, 16, 16
    input_dim = C * H * W
    encoder_hidden_dims = [256, 64]

    x = jax.random.normal(k_x, (B, C, H, W), dtype=jnp.float32)
    params = build_params(k_p, input_dim, encoder_hidden_dims)
    weights, b_packed, meta = pack_for_kernel(params)
    forward = make_forward(meta)

    out, out_mean = forward(weights, b_packed, x)
    out = jax.block_until_ready(out)
    out_mean = jax.block_until_ready(out_mean)

    assert out.shape == (B, C, H, W), out.shape
    assert out_mean.shape == (B, 1, 1), out_mean.shape
    assert jnp.all(jnp.isfinite(out)) and jnp.all(jnp.isfinite(out_mean))

    ref_out, ref_mean = reference_forward(params, x)
    assert jnp.allclose(out, ref_out, rtol=2e-2, atol=2e-2), \
        float(jnp.max(jnp.abs(out - ref_out)))
    assert jnp.allclose(out_mean, ref_mean, rtol=2e-2, atol=2e-2), \
        float(jnp.max(jnp.abs(out_mean - ref_mean)))

    print("KERNEL_OK")
</pallas_src>

<mosaic_0001>
module attributes {stable_mosaic.version = 11 : i64} {
  func.func @kernel(%arg0: i32, %arg1: memref<16x1024xf32, #tpu.memory_space<vmem>>, %arg2: memref<1024x256xbf16, #tpu.memory_space<any>>, %arg3: memref<256x64xbf16, #tpu.memory_space<any>>, %arg4: memref<64x384xbf16, #tpu.memory_space<any>>, %arg5: memref<128x128xbf16, #tpu.memory_space<any>>, %arg6: memref<256x1024xbf16, #tpu.memory_space<any>>, %arg7: memref<1x1920xf32, #tpu.memory_space<vmem>>, %arg8: memref<16x1024xf32, #tpu.memory_space<vmem>>, %arg9: memref<16x128xf32, #tpu.memory_space<vmem>>, %arg10: memref<1024x256xbf16, #tpu.memory_space<vmem>>, %arg11: memref<256x64xbf16, #tpu.memory_space<vmem>>, %arg12: memref<64x384xbf16, #tpu.memory_space<vmem>>, %arg13: memref<128x128xbf16, #tpu.memory_space<vmem>>, %arg14: memref<256x1024xbf16, #tpu.memory_space<vmem>>, %arg15: memref<8x!tpu.dma_semaphore, #tpu.memory_space<semaphore_mem>>) attributes {dimension_semantics = [#tpu.dimension_semantics<arbitrary>], iteration_bounds = array<i64: 1>, scalar_prefetch = 0 : i64, scratch_operands = 6 : i64, tpu.core_type = #tpu.core_type<tc>, window_params = [{transform_indices = @transform_0, window_bounds = array<i64: 16, 1024>}, {}, {}, {}, {}, {}, {pipeline_mode = #tpu.pipeline_mode<synchronous>, transform_indices = @transform_6, window_bounds = array<i64: 1, 1920>}, {transform_indices = @transform_7, window_bounds = array<i64: 16, 1024>}, {transform_indices = @transform_8, window_bounds = array<i64: 16, 128>}]} {
    %c0_i32 = arith.constant 0 : i32
    %0 = arith.cmpi eq, %arg0, %c0_i32 : i32
    %1 = arith.extui %0 : i1 to i32
    %c0_i32_0 = arith.constant 0 : i32
    %c1_i32 = arith.constant 1 : i32
    %c2_i32 = arith.constant 2 : i32
    %c3_i32 = arith.constant 3 : i32
    %c4_i32 = arith.constant 4 : i32
    %c5_i32 = arith.constant 5 : i32
    %c6_i32 = arith.constant 6 : i32
    %c7_i32 = arith.constant 7 : i32
    %c0_i32_1 = arith.constant 0 : i32
    %2 = arith.cmpi ne, %1, %c0_i32_1 : i32
    scf.if %2 {
      %c0_i32_63 = arith.constant 0 : i32
      %c0_i32_64 = arith.constant 0 : i32
      %83 = tpu.memref_slice %arg2[%c0_i32_63, %c0_i32_64] : memref<1024x256xbf16, #tpu.memory_space<any>> -> memref<256x256xbf16, #tpu.memory_space<any>>
      %c0_i32_65 = arith.constant 0 : i32
      %c0_i32_66 = arith.constant 0 : i32
      %84 = tpu.memref_slice %arg10[%c0_i32_65, %c0_i32_66] : memref<1024x256xbf16, #tpu.memory_space<vmem>> -> memref<256x256xbf16, #tpu.memory_space<vmem>>
      %85 = tpu.memref_slice %arg15[%c0_i32_0] : memref<8x!tpu.dma_semaphore, #tpu.memory_space<semaphore_mem>> -> memref<1x!tpu.dma_semaphore, #tpu.memory_space<semaphore_mem>>
      %86 = tpu.memref_squeeze %85 : memref<1x!tpu.dma_semaphore, #tpu.memory_space<semaphore_mem>> -> memref<!tpu.dma_semaphore, #tpu.memory_space<semaphore_mem>>
      tpu.enqueue_dma source(%83 : memref<256x256xbf16, #tpu.memory_space<any>>) target(%84 : memref<256x256xbf16, #tpu.memory_space<vmem>>) target_semaphore(%86 : memref<!tpu.dma_semaphore, #tpu.memory_space<semaphore_mem>>)
      %c256_i32 = arith.constant 256 : i32
      %c0_i32_67 = arith.constant 0 : i32
      %87 = tpu.memref_slice %arg2[%c256_i32, %c0_i32_67] : memref<1024x256xbf16, #tpu.memory_space<any>> -> memref<256x256xbf16, #tpu.memory_space<any>>
      %c256_i32_68 = arith.constant 256 : i32
      %c0_i32_69 = arith.constant 0 : i32
      %88 = tpu.memref_slice %arg10[%c256_i32_68, %c0_i32_69] : memref<1024x256xbf16, #tpu.memory_space<vmem>> -> memref<256x256xbf16, #tpu.memory_space<vmem>>
      %89 = tpu.memref_slice %arg15[%c1_i32] : memref<8x!tpu.dma_semaphore, #tpu.memory_space<semaphore_mem>> -> memref<1x!tpu.dma_semaphore, #tpu.memory_space<semaphore_mem>>
      %90 = tpu.memref_squeeze %89 : memref<1x!tpu.dma_semaphore, #tpu.memory_space<semaphore_mem>> -> memref<!tpu.dma_semaphore, #tpu.memory_space<semaphore_mem>>
      tpu.enqueue_dma source(%87 : memref<256x256xbf16, #tpu.memory_space<any>>) target(%88 : memref<256x256xbf16, #tpu.memory_space<vmem>>) target_semaphore(%90 : memref<!tpu.dma_semaphore, #tpu.memory_space<semaphore_mem>>)
      %c512_i32 = arith.constant 512 : i32
      %c0_i32_70 = arith.constant 0 : i32
      %91 = tpu.memref_slice %arg2[%c512_i32, %c0_i32_70] : memref<1024x256xbf16, #tpu.memory_space<any>> -> memref<256x256xbf16, #tpu.memory_space<any>>
      %c512_i32_71 = arith.constant 512 : i32
      %c0_i32_72 = arith.constant 0 : i32
      %92 = tpu.memref_slice %arg10[%c512_i32_71, %c0_i32_72] : memref<1024x256xbf16, #tpu.memory_space<vmem>> -> memref<256x256xbf16, #tpu.memory_space<vmem>>
      %93 = tpu.memref_slice %arg15[%c2_i32] : memref<8x!tpu.dma_semaphore, #tpu.memory_space<semaphore_mem>> -> memref<1x!tpu.dma_semaphore, #tpu.memory_space<semaphore_mem>>
      %94 = tpu.memref_squeeze %93 : memref<1x!tpu.dma_semaphore, #tpu.memory_space<semaphore_mem>> -> memref<!tpu.dma_semaphore, #tpu.memory_space<semaphore_mem>>
      tpu.enqueue_dma source(%91 : memref<256x256xbf16, #tpu.memory_space<any>>) target(%92 : memref<256x256xbf16, #tpu.memory_space<vmem>>) target_semaphore(%94 : memref<!tpu.dma_semaphore, #tpu.memory_space<semaphore_mem>>)
      %c768_i32 = arith.constant 768 : i32
      %c0_i32_73 = arith.constant 0 : i32
      %95 = tpu.memref_slice %arg2[%c768_i32, %c0_i32_73] : memref<1024x256xbf16, #tpu.memory_space<any>> -> memref<256x256xbf16, #tpu.memory_space<any>>
      %c768_i32_74 = arith.constant 768 : i32
      %c0_i32_75 = arith.constant 0 : i32
      %96 = tpu.memref_slice %arg10[%c768_i32_74, %c0_i32_75] : memref<1024x256xbf16, #tpu.memory_space<vmem>> -> memref<256x256xbf16, #tpu.memory_space<vmem>>
      %97 = tpu.memref_slice %arg15[%c3_i32] : memref<8x!tpu.dma_semaphore, #tpu.memory_space<semaphore_mem>> -> memref<1x!tpu.dma_semaphore, #tpu.memory_space<semaphore_mem>>
      %98 = tpu.memref_squeeze %97 : memref<1x!tpu.dma_semaphore, #tpu.memory_space<semaphore_mem>> -> memref<!tpu.dma_semaphore, #tpu.memory_space<semaphore_mem>>
      tpu.enqueue_dma source(%95 : memref<256x256xbf16, #tpu.memory_space<any>>) target(%96 : memref<256x256xbf16, #tpu.memory_space<vmem>>) target_semaphore(%98 : memref<!tpu.dma_semaphore, #tpu.memory_space<semaphore_mem>>)
      %99 = tpu.memref_slice %arg15[%c4_i32] : memref<8x!tpu.dma_semaphore, #tpu.memory_space<semaphore_mem>> -> memref<1x!tpu.dma_semaphore, #tpu.memory_space<semaphore_mem>>
      %100 = tpu.memref_squeeze %99 : memref<1x!tpu.dma_semaphore, #tpu.memory_space<semaphore_mem>> -> memref<!tpu.dma_semaphore, #tpu.memory_space<semaphore_mem>>
      tpu.enqueue_dma source(%arg3 : memref<256x64xbf16, #tpu.memory_space<any>>) target(%arg11 : memref<256x64xbf16, #tpu.memory_space<vmem>>) target_semaphore(%100 : memref<!tpu.dma_semaphore, #tpu.memory_space<semaphore_mem>>)
      %101 = tpu.memref_slice %arg15[%c5_i32] : memref<8x!tpu.dma_semaphore, #tpu.memory_space<semaphore_mem>> -> memref<1x!tpu.dma_semaphore, #tpu.memory_space<semaphore_mem>>
      %102 = tpu.memref_squeeze %101 : memref<1x!tpu.dma_semaphore, #tpu.memory_space<semaphore_mem>> -> memref<!tpu.dma_semaphore, #tpu.memory_space<semaphore_mem>>
      tpu.enqueue_dma source(%arg4 : memref<64x384xbf16, #tpu.memory_space<any>>) target(%arg12 : memref<64x384xbf16, #tpu.memory_space<vmem>>) target_semaphore(%102 : memref<!tpu.dma_semaphore, #tpu.memory_space<semaphore_mem>>)
      %103 = tpu.memref_slice %arg15[%c6_i32] : memref<8x!tpu.dma_semaphore, #tpu.memory_space<semaphore_mem>> -> memref<1x!tpu.dma_semaphore, #tpu.memory_space<semaphore_mem>>
      %104 = tpu.memref_squeeze %103 : memref<1x!tpu.dma_semaphore, #tpu.memory_space<semaphore_mem>> -> memref<!tpu.dma_semaphore, #tpu.memory_space<semaphore_mem>>
      tpu.enqueue_dma source(%arg5 : memref<128x128xbf16, #tpu.memory_space<any>>) target(%arg13 : memref<128x128xbf16, #tpu.memory_space<vmem>>) target_semaphore(%104 : memref<!tpu.dma_semaphore, #tpu.memory_space<semaphore_mem>>)
      %105 = tpu.memref_slice %arg15[%c7_i32] : memref<8x!tpu.dma_semaphore, #tpu.memory_space<semaphore_mem>> -> memref<1x!tpu.dma_semaphore, #tpu.memory_space<semaphore_mem>>
      %106 = tpu.memref_squeeze %105 : memref<1x!tpu.dma_semaphore, #tpu.memory_space<semaphore_mem>> -> memref<!tpu.dma_semaphore, #tpu.memory_space<semaphore_mem>>
      tpu.enqueue_dma source(%arg6 : memref<256x1024xbf16, #tpu.memory_space<any>>) target(%arg14 : memref<256x1024xbf16, #tpu.memory_space<vmem>>) target_semaphore(%106 : memref<!tpu.dma_semaphore, #tpu.memory_space<semaphore_mem>>)
    } else {
    }
    %c0 = arith.constant 0 : index
    %c0_2 = arith.constant 0 : index
    %3 = vector.load %arg1[%c0, %c0_2] : memref<16x1024xf32, #tpu.memory_space<vmem>>, vector<16x1024xf32>
    %4 = arith.truncf %3 : vector<16x1024xf32> to vector<16x1024xbf16>
    %cst = arith.constant 0.000000e+00 : f32
    %5 = vector.broadcast %cst : f32 to vector<16x256xf32>
    %c0_i32_3 = arith.constant 0 : i32
    %6 = arith.cmpi eq, %arg0, %c0_i32_3 : i32
    %7 = arith.extui %6 : i1 to i32
    %c0_i32_4 = arith.constant 0 : i32
    %c0_i32_5 = arith.constant 0 : i32
    %8 = arith.cmpi ne, %7, %c0_i32_5 : i32
    scf.if %8 {
      %c0_i32_63 = arith.constant 0 : i32
      %c0_i32_64 = arith.constant 0 : i32
      %83 = tpu.memref_slice %arg2[%c0_i32_63, %c0_i32_64] : memref<1024x256xbf16, #tpu.memory_space<any>> -> memref<256x256xbf16, #tpu.memory_space<any>>
      %c0_i32_65 = arith.constant 0 : i32
      %c0_i32_66 = arith.constant 0 : i32
      %84 = tpu.memref_slice %arg10[%c0_i32_65, %c0_i32_66] : memref<1024x256xbf16, #tpu.memory_space<vmem>> -> memref<256x256xbf16, #tpu.memory_space<vmem>>
      %85 = tpu.memref_slice %arg15[%c0_i32_4] : memref<8x!tpu.dma_semaphore, #tpu.memory_space<semaphore_mem>> -> memref<1x!tpu.dma_semaphore, #tpu.memory_space<semaphore_mem>>
      %86 = tpu.memref_squeeze %85 : memref<1x!tpu.dma_semaphore, #tpu.memory_space<semaphore_mem>> -> memref<!tpu.dma_semaphore, #tpu.memory_space<semaphore_mem>>
      tpu.wait_dma2 semaphore(%86 : memref<!tpu.dma_semaphore, #tpu.memory_space<semaphore_mem>>) src(%83 : memref<256x256xbf16, #tpu.memory_space<any>>) dst(%84 : memref<256x256xbf16, #tpu.memory_space<vmem>>)
    } else {
    }
    %9 = vector.extract_strided_slice %4 {offsets = [0, 0], sizes = [16, 256], strides = [1, 1]} : vector<16x1024xbf16> to vector<16x256xbf16>
    %c0_6 = arith.constant 0 : index
    %c0_7 = arith.constant 0 : index
    %10 = vector.load %arg10[%c0_6, %c0_7] : memref<1024x256xbf16, #tpu.memory_space<vmem>>, vector<256x256xbf16>
    %cst_8 = arith.constant dense<0.000000e+00> : vector<16x256xf32>
    %11 = tpu.matmul %9, %10, %cst_8 {dimension_numbers = #tpu.dot_dimension_numbers<[1], [0], [0], [1], [0, 0, 1, 1], [], []>} : vector<16x256xbf16>, vector<256x256xbf16>, vector<16x256xf32> -> vector<16x256xf32>
    %12 = arith.addf %5, %11 : vector<16x256xf32>
    %c0_i32_9 = arith.constant 0 : i32
    %13 = arith.cmpi eq, %arg0, %c0_i32_9 : i32
    %14 = arith.extui %13 : i1 to i32
    %c1_i32_10 = arith.constant 1 : i32
    %c0_i32_11 = arith.constant 0 : i32
    %15 = arith.cmpi ne, %14, %c0_i32_11 : i32
    scf.if %15 {
      %c256_i32 = arith.constant 256 : i32
      %c0_i32_63 = arith.constant 0 : i32
      %83 = tpu.memref_slice %arg2[%c256_i32, %c0_i32_63] : memref<1024x256xbf16, #tpu.memory_space<any>> -> memref<256x256xbf16, #tpu.memory_space<any>>
      %c256_i32_64 = arith.constant 256 : i32
      %c0_i32_65 = arith.constant 0 : i32
      %84 = tpu.memref_slice %arg10[%c256_i32_64, %c0_i32_65] : memref<1024x256xbf16, #tpu.memory_space<vmem>> -> memref<256x256xbf16, #tpu.memory_space<vmem>>
      %85 = tpu.memref_slice %arg15[%c1_i32_10] : memref<8x!tpu.dma_semaphore, #tpu.memory_space<semaphore_mem>> -> memref<1x!tpu.dma_semaphore, #tpu.memory_space<semaphore_mem>>
      %86 = tpu.memref_squeeze %85 : memref<1x!tpu.dma_semaphore, #tpu.memory_space<semaphore_mem>> -> memref<!tpu.dma_semaphore, #tpu.memory_space<semaphore_mem>>
      tpu.wait_dma2 semaphore(%86 : memref<!tpu.dma_semaphore, #tpu.memory_space<semaphore_mem>>) src(%83 : memref<256x256xbf16, #tpu.memory_space<any>>) dst(%84 : memref<256x256xbf16, #tpu.memory_space<vmem>>)
    } else {
    }
    %16 = vector.extract_strided_slice %4 {offsets = [0, 256], sizes = [16, 256], strides = [1, 1]} : vector<16x1024xbf16> to vector<16x256xbf16>
    %c256 = arith.constant 256 : index
    %c0_12 = arith.constant 0 : index
    %17 = vector.load %arg10[%c256, %c0_12] : memref<1024x256xbf16, #tpu.memory_space<vmem>>, vector<256x256xbf16>
    %cst_13 = arith.constant dense<0.000000e+00> : vector<16x256xf32>
    %18 = tpu.matmul %16, %17, %cst_13 {dimension_numbers = #tpu.dot_dimension_numbers<[1], [0], [0], [1], [0, 0, 1, 1], [], []>} : vector<16x256xbf16>, vector<256x256xbf16>, vector<16x256xf32> -> vector<16x256xf32>
    %19 = arith.addf %12, %18 : vector<16x256xf32>
    %c0_i32_14 = arith.constant 0 : i32
    %20 = arith.cmpi eq, %arg0, %c0_i32_14 : i32
    %21 = arith.extui %20 : i1 to i32
    %c2_i32_15 = arith.constant 2 : i32
    %c0_i32_16 = arith.constant 0 : i32
    %22 = arith.cmpi ne, %21, %c0_i32_16 : i32
    scf.if %22 {
      %c512_i32 = arith.constant 512 : i32
      %c0_i32_63 = arith.constant 0 : i32
      %83 = tpu.memref_slice %arg2[%c512_i32, %c0_i32_63] : memref<1024x256xbf16, #tpu.memory_space<any>> -> memref<256x256xbf16, #tpu.memory_space<any>>
      %c512_i32_64 = arith.constant 512 : i32
      %c0_i32_65 = arith.constant 0 : i32
      %84 = tpu.memref_slice %arg10[%c512_i32_64, %c0_i32_65] : memref<1024x256xbf16, #tpu.memory_space<vmem>> -> memref<256x256xbf16, #tpu.memory_space<vmem>>
      %85 = tpu.memref_slice %arg15[%c2_i32_15] : memref<8x!tpu.dma_semaphore, #tpu.memory_space<semaphore_mem>> -> memref<1x!tpu.dma_semaphore, #tpu.memory_space<semaphore_mem>>
      %86 = tpu.memref_squeeze %85 : memref<1x!tpu.dma_semaphore, #tpu.memory_space<semaphore_mem>> -> memref<!tpu.dma_semaphore, #tpu.memory_space<semaphore_mem>>
      tpu.wait_dma2 semaphore(%86 : memref<!tpu.dma_semaphore, #tpu.memory_space<semaphore_mem>>) src(%83 : memref<256x256xbf16, #tpu.memory_space<any>>) dst(%84 : memref<256x256xbf16, #tpu.memory_space<vmem>>)
    } else {
    }
    %23 = vector.extract_strided_slice %4 {offsets = [0, 512], sizes = [16, 256], strides = [1, 1]} : vector<16x1024xbf16> to vector<16x256xbf16>
    %c512 = arith.constant 512 : index
    %c0_17 = arith.constant 0 : index
    %24 = vector.load %arg10[%c512, %c0_17] : memref<1024x256xbf16, #tpu.memory_space<vmem>>, vector<256x256xbf16>
    %cst_18 = arith.constant dense<0.000000e+00> : vector<16x256xf32>
    %25 = tpu.matmul %23, %24, %cst_18 {dimension_numbers = #tpu.dot_dimension_numbers<[1], [0], [0], [1], [0, 0, 1, 1], [], []>} : vector<16x256xbf16>, vector<256x256xbf16>, vector<16x256xf32> -> vector<16x256xf32>
    %26 = arith.addf %19, %25 : vector<16x256xf32>
    %c0_i32_19 = arith.constant 0 : i32
    %27 = arith.cmpi eq, %arg0, %c0_i32_19 : i32
    %28 = arith.extui %27 : i1 to i32
    %c3_i32_20 = arith.constant 3 : i32
    %c0_i32_21 = arith.constant 0 : i32
    %29 = arith.cmpi ne, %28, %c0_i32_21 : i32
    scf.if %29 {
      %c768_i32 = arith.constant 768 : i32
      %c0_i32_63 = arith.constant 0 : i32
      %83 = tpu.memref_slice %arg2[%c768_i32, %c0_i32_63] : memref<1024x256xbf16, #tpu.memory_space<any>> -> memref<256x256xbf16, #tpu.memory_space<any>>
      %c768_i32_64 = arith.constant 768 : i32
      %c0_i32_65 = arith.constant 0 : i32
      %84 = tpu.memref_slice %arg10[%c768_i32_64, %c0_i32_65] : memref<1024x256xbf16, #tpu.memory_space<vmem>> -> memref<256x256xbf16, #tpu.memory_space<vmem>>
      %85 = tpu.memref_slice %arg15[%c3_i32_20] : memref<8x!tpu.dma_semaphore, #tpu.memory_space<semaphore_mem>> -> memref<1x!tpu.dma_semaphore, #tpu.memory_space<semaphore_mem>>
      %86 = tpu.memref_squeeze %85 : memref<1x!tpu.dma_semaphore, #tpu.memory_space<semaphore_mem>> -> memref<!tpu.dma_semaphore, #tpu.memory_space<semaphore_mem>>
      tpu.wait_dma2 semaphore(%86 : memref<!tpu.dma_semaphore, #tpu.memory_space<semaphore_mem>>) src(%83 : memref<256x256xbf16, #tpu.memory_space<any>>) dst(%84 : memref<256x256xbf16, #tpu.memory_space<vmem>>)
    } else {
    }
    %30 = vector.extract_strided_slice %4 {offsets = [0, 768], sizes = [16, 256], strides = [1, 1]} : vector<16x1024xbf16> to vector<16x256xbf16>
    %c768 = arith.constant 768 : index
    %c0_22 = arith.constant 0 : index
    %31 = vector.load %arg10[%c768, %c0_22] : memref<1024x256xbf16, #tpu.memory_space<vmem>>, vector<256x256xbf16>
    %cst_23 = arith.constant dense<0.000000e+00> : vector<16x256xf32>
    %32 = tpu.matmul %30, %31, %cst_23 {dimension_numbers = #tpu.dot_dimension_numbers<[1], [0], [0], [1], [0, 0, 1, 1], [], []>} : vector<16x256xbf16>, vector<256x256xbf16>, vector<16x256xf32> -> vector<16x256xf32>
    %33 = arith.addf %26, %32 : vector<16x256xf32>
    %c0_24 = arith.constant 0 : index
    %c0_25 = arith.constant 0 : index
    %34 = vector.load %arg7[%c0_24, %c0_25] : memref<1x1920xf32, #tpu.memory_space<vmem>>, vector<1x256xf32>
    %35 = vector.broadcast %34 : vector<1x256xf32> to vector<16x256xf32>
    %36 = arith.addf %33, %35 : vector<16x256xf32>
    %cst_26 = arith.constant 0.000000e+00 : f32
    %37 = vector.broadcast %cst_26 : f32 to vector<16x256xf32>
    %38 = arith.maximumf %36, %37 : vector<16x256xf32>
    %39 = arith.truncf %38 : vector<16x256xf32> to vector<16x256xbf16>
    %c0_i32_27 = arith.constant 0 : i32
    %40 = arith.cmpi eq, %arg0, %c0_i32_27 : i32
    %41 = arith.extui %40 : i1 to i32
    %c4_i32_28 = arith.constant 4 : i32
    %c0_i32_29 = arith.constant 0 : i32
    %42 = arith.cmpi ne, %41, %c0_i32_29 : i32
    scf.if %42 {
      %83 = tpu.memref_slice %arg15[%c4_i32_28] : memref<8x!tpu.dma_semaphore, #tpu.memory_space<semaphore_mem>> -> memref<1x!tpu.dma_semaphore, #tpu.memory_space<semaphore_mem>>
      %84 = tpu.memref_squeeze %83 : memref<1x!tpu.dma_semaphore, #tpu.memory_space<semaphore_mem>> -> memref<!tpu.dma_semaphore, #tpu.memory_space<semaphore_mem>>
      tpu.wait_dma2 semaphore(%84 : memref<!tpu.dma_semaphore, #tpu.memory_space<semaphore_mem>>) src(%arg3 : memref<256x64xbf16, #tpu.memory_space<any>>) dst(%arg11 : memref<256x64xbf16, #tpu.memory_space<vmem>>)
    } else {
    }
    %c0_30 = arith.constant 0 : index
    %c0_31 = arith.constant 0 : index
    %43 = vector.load %arg11[%c0_30, %c0_31] : memref<256x64xbf16, #tpu.memory_space<vmem>>, vector<256x64xbf16>
    %cst_32 = arith.constant dense<0.000000e+00> : vector<16x64xf32>
    %44 = tpu.matmul %39, %43, %cst_32 {dimension_numbers = #tpu.dot_dimension_numbers<[1], [0], [0], [1], [0, 0, 1, 1], [], []>} : vector<16x256xbf16>, vector<256x64xbf16>, vector<16x64xf32> -> vector<16x64xf32>
    %c0_33 = arith.constant 0 : index
    %c256_34 = arith.constant 256 : index
    %45 = vector.load %arg7[%c0_33, %c256_34] : memref<1x1920xf32, #tpu.memory_space<vmem>>, vector<1x64xf32>
    %46 = vector.broadcast %45 : vector<1x64xf32> to vector<16x64xf32>
    %47 = arith.addf %44, %46 : vector<16x64xf32>
    %cst_35 = arith.constant 0.000000e+00 : f32
    %48 = vector.broadcast %cst_35 : f32 to vector<16x64xf32>
    %49 = arith.maximumf %47, %48 : vector<16x64xf32>
    %50 = arith.truncf %49 : vector<16x64xf32> to vector<16x64xbf16>
    %c0_i32_36 = arith.constant 0 : i32
    %51 = arith.cmpi eq, %arg0, %c0_i32_36 : i32
    %52 = arith.extui %51 : i1 to i32
    %c5_i32_37 = arith.constant 5 : i32
    %c0_i32_38 = arith.constant 0 : i32
    %53 = arith.cmpi ne, %52, %c0_i32_38 : i32
    scf.if %53 {
      %83 = tpu.memref_slice %arg15[%c5_i32_37] : memref<8x!tpu.dma_semaphore, #tpu.memory_space<semaphore_mem>> -> memref<1x!tpu.dma_semaphore, #tpu.memory_space<semaphore_mem>>
      %84 = tpu.memref_squeeze %83 : memref<1x!tpu.dma_semaphore, #tpu.memory_space<semaphore_mem>> -> memref<!tpu.dma_semaphore, #tpu.memory_space<semaphore_mem>>
      tpu.wait_dma2 semaphore(%84 : memref<!tpu.dma_semaphore, #tpu.memory_space<semaphore_mem>>) src(%arg4 : memref<64x384xbf16, #tpu.memory_space<any>>) dst(%arg12 : memref<64x384xbf16, #tpu.memory_space<vmem>>)
    } else {
    }
    %c0_39 = arith.constant 0 : index
    %c0_40 = arith.constant 0 : index
    %54 = vector.load %arg12[%c0_39, %c0_40] : memref<64x384xbf16, #tpu.memory_space<vmem>>, vector<64x384xbf16>
    %cst_41 = arith.constant dense<0.000000e+00> : vector<16x384xf32>
    %55 = tpu.matmul %50, %54, %cst_41 {dimension_numbers = #tpu.dot_dimension_numbers<[1], [0], [0], [1], [0, 0, 1, 1], [], []>} : vector<16x64xbf16>, vector<64x384xbf16>, vector<16x384xf32> -> vector<16x384xf32>
    %c0_42 = arith.constant 0 : index
    %c384 = arith.constant 384 : index
    %56 = vector.load %arg7[%c0_42, %c384] : memref<1x1920xf32, #tpu.memory_space<vmem>>, vector<1x384xf32>
    %57 = vector.broadcast %56 : vector<1x384xf32> to vector<16x384xf32>
    %58 = arith.addf %55, %57 : vector<16x384xf32>
    %cst_43 = arith.constant 0.000000e+00 : f32
    %59 = vector.broadcast %cst_43 : f32 to vector<16x384xf32>
    %60 = arith.maximumf %58, %59 : vector<16x384xf32>
    %61 = vector.extract_strided_slice %60 {offsets = [0, 0], sizes = [16, 128], strides = [1, 1]} : vector<16x384xf32> to vector<16x128xf32>
    %62 = arith.truncf %61 : vector<16x128xf32> to vector<16x128xbf16>
    %63 = vector.extract_strided_slice %60 {offsets = [0, 128], sizes = [16, 256], strides = [1, 1]} : vector<16x384xf32> to vector<16x256xf32>
    %64 = arith.truncf %63 : vector<16x256xf32> to vector<16x256xbf16>
    %c0_i32_44 = arith.constant 0 : i32
    %65 = arith.cmpi eq, %arg0, %c0_i32_44 : i32
    %66 = arith.extui %65 : i1 to i32
    %c6_i32_45 = arith.constant 6 : i32
    %c0_i32_46 = arith.constant 0 : i32
    %67 = arith.cmpi ne, %66, %c0_i32_46 : i32
    scf.if %67 {
      %83 = tpu.memref_slice %arg15[%c6_i32_45] : memref<8x!tpu.dma_semaphore, #tpu.memory_space<semaphore_mem>> -> memref<1x!tpu.dma_semaphore, #tpu.memory_space<semaphore_mem>>
      %84 = tpu.memref_squeeze %83 : memref<1x!tpu.dma_semaphore, #tpu.memory_space<semaphore_mem>> -> memref<!tpu.dma_semaphore, #tpu.memory_space<semaphore_mem>>
      tpu.wait_dma2 semaphore(%84 : memref<!tpu.dma_semaphore, #tpu.memory_space<semaphore_mem>>) src(%arg5 : memref<128x128xbf16, #tpu.memory_space<any>>) dst(%arg13 : memref<128x128xbf16, #tpu.memory_space<vmem>>)
    } else {
    }
    %c0_47 = arith.constant 0 : index
    %c0_48 = arith.constant 0 : index
    %68 = vector.load %arg13[%c0_47, %c0_48] : memref<128x128xbf16, #tpu.memory_space<vmem>>, vector<128x128xbf16>
    %cst_49 = arith.constant dense<0.000000e+00> : vector<16x128xf32>
    %69 = tpu.matmul %62, %68, %cst_49 {dimension_numbers = #tpu.dot_dimension_numbers<[1], [0], [0], [1], [0, 0, 1, 1], [], []>} : vector<16x128xbf16>, vector<128x128xbf16>, vector<16x128xf32> -> vector<16x128xf32>
    %c0_50 = arith.constant 0 : index
    %c768_51 = arith.constant 768 : index
    %70 = vector.load %arg7[%c0_50, %c768_51] : memref<1x1920xf32, #tpu.memory_space<vmem>>, vector<1x128xf32>
    %71 = vector.broadcast %70 : vector<1x128xf32> to vector<16x128xf32>
    %72 = arith.addf %69, %71 : vector<16x128xf32>
    %c0_52 = arith.constant 0 : index
    %c0_53 = arith.constant 0 : index
    %73 = vector.load %arg9[%c0_52, %c0_53] : memref<16x128xf32, #tpu.memory_space<vmem>>, vector<16x128xf32>
    tpu.vector_store %arg9[%c0_52, %c0_53], %72 {strides = array<i32>} : memref<16x128xf32, #tpu.memory_space<vmem>>, vector<16x128xf32>,
    %c0_i32_54 = arith.constant 0 : i32
    %74 = arith.cmpi eq, %arg0, %c0_i32_54 : i32
    %75 = arith.extui %74 : i1 to i32
    %c7_i32_55 = arith.constant 7 : i32
    %c0_i32_56 = arith.constant 0 : i32
    %76 = arith.cmpi ne, %75, %c0_i32_56 : i32
    scf.if %76 {
      %83 = tpu.memref_slice %arg15[%c7_i32_55] : memref<8x!tpu.dma_semaphore, #tpu.memory_space<semaphore_mem>> -> memref<1x!tpu.dma_semaphore, #tpu.memory_space<semaphore_mem>>
      %84 = tpu.memref_squeeze %83 : memref<1x!tpu.dma_semaphore, #tpu.memory_space<semaphore_mem>> -> memref<!tpu.dma_semaphore, #tpu.memory_space<semaphore_mem>>
      tpu.wait_dma2 semaphore(%84 : memref<!tpu.dma_semaphore, #tpu.memory_space<semaphore_mem>>) src(%arg6 : memref<256x1024xbf16, #tpu.memory_space<any>>) dst(%arg14 : memref<256x1024xbf16, #tpu.memory_space<vmem>>)
    } else {
    }
    %c0_57 = arith.constant 0 : index
    %c0_58 = arith.constant 0 : index
    %77 = vector.load %arg14[%c0_57, %c0_58] : memref<256x1024xbf16, #tpu.memory_space<vmem>>, vector<256x1024xbf16>
    %cst_59 = arith.constant dense<0.000000e+00> : vector<16x1024xf32>
    %78 = tpu.matmul %64, %77, %cst_59 {dimension_numbers = #tpu.dot_dimension_numbers<[1], [0], [0], [1], [0, 0, 1, 1], [], []>} : vector<16x256xbf16>, vector<256x1024xbf16>, vector<16x1024xf32> -> vector<16x1024xf32>
    %c0_60 = arith.constant 0 : index
    %c896 = arith.constant 896 : index
    %79 = vector.load %arg7[%c0_60, %c896] : memref<1x1920xf32, #tpu.memory_space<vmem>>, vector<1x1024xf32>
    %80 = vector.broadcast %79 : vector<1x1024xf32> to vector<16x1024xf32>
    %81 = arith.addf %78, %80 : vector<16x1024xf32>
    %c0_61 = arith.constant 0 : index
    %c0_62 = arith.constant 0 : index
    %82 = vector.load %arg8[%c0_61, %c0_62] : memref<16x1024xf32, #tpu.memory_space<vmem>>, vector<16x1024xf32>
    tpu.vector_store %arg8[%c0_61, %c0_62], %81 {strides = array<i32>} : memref<16x1024xf32, #tpu.memory_space<vmem>>, vector<16x1024xf32>,
    return
  }
  func.func @transform_0(%arg0: i32) -> (i32, i32) {
    %c0_i32 = arith.constant 0 : i32
    %c0_i32_0 = arith.constant 0 : i32
    return %arg0, %c0_i32 : i32, i32
  }
  func.func @transform_6(%arg0: i32) -> (i32, i32) {
    %c0_i32 = arith.constant 0 : i32
    %c0_i32_0 = arith.constant 0 : i32
    %c0_i32_1 = arith.constant 0 : i32
    return %c0_i32, %c0_i32_0 : i32, i32
  }
  func.func @transform_7(%arg0: i32) -> (i32, i32) {
    %c0_i32 = arith.constant 0 : i32
    %c0_i32_0 = arith.constant 0 : i32
    return %arg0, %c0_i32 : i32, i32
  }
  func.func @transform_8(%arg0: i32) -> (i32, i32) {
    %c0_i32 = arith.constant 0 : i32
    %c0_i32_0 = arith.constant 0 : i32
    return %arg0, %c0_i32 : i32, i32
  }
}

</mosaic_0001>

<bundles_post_ra>
// kernel: forward.1
= control target key start
LH: loop header
LB: loop body
LE: loop exit
PB: predicated region body
PF: predicated region fallthrough
CT: control target
= control target key end

     0   :  { %s4469_s30 = smov [#allocation2]   ;;  %s4470_s23 = smov [#allocation2 + $0x100]   ;;  %s5037_s0 = inlined_call_operand.vmem [shape: f32[16,1024], index: 0, kind: input, shape index: {}]   ;;  %s5038_s1 = inlined_call_operand.hbm [shape: bf16[1024,256], index: 1, kind: input, shape index: {}]   ;;  %s5039_s3 = inlined_call_operand.vmem [shape: bf16[64,384], index: 3, kind: input, shape index: {}]   ;;  %s5040_s4 = inlined_call_operand.vmem [shape: bf16[128,128], index: 4, kind: input, shape index: {}]   ;;  %s5041_s5 = inlined_call_operand.hbm [shape: bf16[256,1024], index: 5, kind: input, shape index: {}]   ;;  %s5042_s6 = inlined_call_operand.vmem [shape: f32[1,1920], index: 6, kind: input, shape index: {}]   ;;  %s5043_s7 = inlined_call_operand.vmem [shape: f32[16,1024], index: 7, kind: output, shape index: {0}]   ;;  %s5044_s8 = inlined_call_operand.vmem [shape: f32[16,128], index: 8, kind: output, shape index: {1}]   ;;  %s5045_s2 = inlined_call_operand.vmem [shape: bf16[256,64], index: 2, kind: input, shape index: {}]  }
   0x1   :  { %s30_s29 = sshll.u32 %s5038_s1, 4  ;;  %s32_s9 = sshll.u32 %s4469_s30, 4  ;;  %v95_v0 = vld [vmem:[%s5045_s2] sm:$0xff]  ;;  %v97_v1 = vld [vmem:[%s5045_s2 + $0x8] sm:$0xff]  ;;  %v99_v2 = vld [vmem:[%s5045_s2 + $0x10] sm:$0xff]  ;;  %s31_s29 = int_to_ptr.hbm [resolvable:$true] %s30_s29  ;;  %s33_s9 = int_to_ptr.vmem [resolvable:$true] %s32_s9 }
   0x2   :  { %96 = vst [vmem:[#allocation3 + $0x30] sm:$0xff] %v95_v0  ;;  %v101_v3 = vld [vmem:[%s5045_s2 + $0x18] sm:$0xff]  ;;  %35 = dma.hbm_to_vmem [thread:$0]  %s31_s29, 4096, %s33_s9, [#allocation7]  ;;  %v103_v4 = vld [vmem:[%s5045_s2 + $0x20] sm:$0xff]  ;;  %v105_v5 = vld [vmem:[%s5045_s2 + $0x28] sm:$0xff] }
   0x3   :  { %98 = vst [vmem:[#allocation3] sm:$0xff] %v97_v1  ;;  %s36_s22 = scalar_lea.hbm %s5038_s1, 256  ;;  %s48_s24 = sshll.u32 %s4470_s23, 4  ;;  %v107_v6 = vld [vmem:[%s5045_s2 + $0x30] sm:$0xff]  ;;  %v109_v7 = vld [vmem:[%s5045_s2 + $0x38] sm:$0xff]  ;;  %v111_v8 = vld [vmem:[%s5045_s2 + $0x40] sm:$0xff]  ;;  %s49_s24 = int_to_ptr.vmem [resolvable:$true] %s48_s24 }
   0x4   :  { %100 = vst [vmem:[#allocation3 + $0x58] sm:$0xff] %v99_v2  ;;  %s46_s27 = sshll.u32 %s36_s22, 4  ;;  %s52_s10 = scalar_lea.hbm %s5038_s1, 512  ;;  %v113_v9 = vld [vmem:[%s5045_s2 + $0x48] sm:$0xff]  ;;  %v115_v10 = vld [vmem:[%s5045_s2 + $0x50] sm:$0xff]  ;;  %v117_v11 = vld [vmem:[%s5045_s2 + $0x58] sm:$0xff]  ;;  %s47_s27 = int_to_ptr.hbm [resolvable:$true] %s46_s27 }
   0x5   :  { %102 = vst [vmem:[#allocation3 + $0x18] sm:$0xff] %v101_v3  ;;  %51 = dma.hbm_to_vmem [thread:$0]  %s47_s27, 4096, %s49_s24, [#allocation7 + $0x1]  ;;  %v119_v12 = vld [vmem:[%s5045_s2 + $0x60] sm:$0xff]  ;;  %v121_v13 = vld [vmem:[%s5045_s2 + $0x68] sm:$0xff]  ;;  %v123_v14 = vld [vmem:[%s5045_s2 + $0x70] sm:$0xff] }
   0x6   :  { %104 = vst [vmem:[#allocation3 + $0x50] sm:$0xff] %v103_v4  ;;  %s62_s15 = sshll.u32 %s52_s10, 4  ;;  %s4471_s18 = smov [#allocation2 + $0x200]   ;;  %v125_v15 = vld [vmem:[%s5045_s2 + $0x78] sm:$0xff]  ;;  %s63_s15 = int_to_ptr.hbm [resolvable:$true] %s62_s15 }
   0x7   :  { %106 = vst [vmem:[#allocation3 + $0x68] sm:$0xff] %v105_v5  ;;  %s64_s19 = sshll.u32 %s4471_s18, 4  ;;  %s68_s24 = scalar_lea.hbm %s5038_s1, 768  ;;  %s65_s19 = int_to_ptr.vmem [resolvable:$true] %s64_s19 }
   0x8   :  { %108 = vst [vmem:[#allocation3 + $0x8] sm:$0xff] %v107_v6  ;;  %67 = dma.hbm_to_vmem [thread:$0]  %s63_s15, 4096, %s65_s19, [#allocation7 + $0x2] }
   0x9   :  { %110 = vst [vmem:[#allocation3 + $0x48] sm:$0xff] %v109_v7  ;;  %s78_s29 = sshll.u32 %s68_s24, 4  ;;  %s4472_s10 = smov [#allocation2 + $0x300]   ;;  %s79_s29 = int_to_ptr.hbm [resolvable:$true] %s78_s29 }
   0xa   :  { %112 = vst [vmem:[#allocation3 + $0x40] sm:$0xff] %v111_v8  ;;  %s80_s1 = sshll.u32 %s4472_s10, 4  ;;  %s81_s1 = int_to_ptr.vmem [resolvable:$true] %s80_s1 }
   0xb   :  { %114 = vst [vmem:[#allocation3 + $0x20] sm:$0xff] %v113_v9  ;;  %83 = dma.hbm_to_vmem [thread:$0]  %s79_s29, 4096, %s81_s1, [#allocation7 + $0x3] }
   0xc   :  { %116 = vst [vmem:[#allocation3 + $0x10] sm:$0xff] %v115_v10 }
   0xd   :  { %118 = vst [vmem:[#allocation3 + $0x38] sm:$0xff] %v117_v11 }
   0xe   :  { %120 = vst [vmem:[#allocation3 + $0x60] sm:$0xff] %v119_v12 }
   0xf   :  { %122 = vst [vmem:[#allocation3 + $0x70] sm:$0xff] %v121_v13 }
  0x10   :  { %124 = vst [vmem:[#allocation3 + $0x78] sm:$0xff] %v123_v14 }
  0x11   :  { %126 = vst [vmem:[#allocation3 + $0x28] sm:$0xff] %v125_v15 }
  0x12   :  { %132 = vsyncadd [#allocation7 + $0x4], 2048  ;;  %v144_v16 = vld [vmem:[%s5039_s3] sm:$0xff]  ;;  %v146_v17 = vld [vmem:[%s5039_s3 + $0x8] sm:$0xff] }
  0x13   :  { %145 = vst [vmem:[#allocation4] sm:$0xff] %v144_v16  ;;  %v148_v18 = vld [vmem:[%s5039_s3 + $0x10] sm:$0xff]  ;;  %v150_v19 = vld [vmem:[%s5039_s3 + $0x18] sm:$0xff]  ;;  %v152_v20 = vld [vmem:[%s5039_s3 + $0x20] sm:$0xff] }
  0x14   :  { %147 = vst [vmem:[#allocation4 + $0x8] sm:$0xff] %v146_v17  ;;  %v154_v21 = vld [vmem:[%s5039_s3 + $0x28] sm:$0xff]  ;;  %v156_v22 = vld [vmem:[%s5039_s3 + $0x30] sm:$0xff]  ;;  %v158_v23 = vld [vmem:[%s5039_s3 + $0x38] sm:$0xff] }
  0x15   :  { %149 = vst [vmem:[#allocation4 + $0x10] sm:$0xff] %v148_v18  ;;  %v160_v24 = vld [vmem:[%s5039_s3 + $0x40] sm:$0xff]  ;;  %v162_v25 = vld [vmem:[%s5039_s3 + $0x48] sm:$0xff]  ;;  %v164_v26 = vld [vmem:[%s5039_s3 + $0x50] sm:$0xff] }
  0x16   :  { %151 = vst [vmem:[#allocation4 + $0x18] sm:$0xff] %v150_v19  ;;  %v166_v27 = vld [vmem:[%s5039_s3 + $0x58] sm:$0xff] }
  0x17   :  { %153 = vst [vmem:[#allocation4 + $0x20] sm:$0xff] %v152_v20 }
  0x18   :  { %155 = vst [vmem:[#allocation4 + $0x28] sm:$0xff] %v154_v21 }
  0x19   :  { %157 = vst [vmem:[#allocation4 + $0x30] sm:$0xff] %v156_v22 }
  0x1a   :  { %159 = vst [vmem:[#allocation4 + $0x38] sm:$0xff] %v158_v23 }
  0x1b   :  { %161 = vst [vmem:[#allocation4 + $0x40] sm:$0xff] %v160_v24 }
  0x1c   :  { %163 = vst [vmem:[#allocation4 + $0x48] sm:$0xff] %v162_v25 }
  0x1d   :  { %165 = vst [vmem:[#allocation4 + $0x50] sm:$0xff] %v164_v26 }
  0x1e   :  { %167 = vst [vmem:[#allocation4 + $0x58] sm:$0xff] %v166_v27 }
  0x1f   :  { %173 = vsyncadd [#allocation7 + $0x5], 1536  ;;  %v185_v28 = vld [vmem:[%s5040_s4] sm:$0xff]  ;;  %v187_v29 = vld [vmem:[%s5040_s4 + $0x8] sm:$0xff] }
  0x20   :  { %186 = vst [vmem:[#allocation5 + $0x28] sm:$0xff] %v185_v28  ;;  %v189_v30 = vld [vmem:[%s5040_s4 + $0x10] sm:$0xff]  ;;  %v191_v31 = vld [vmem:[%s5040_s4 + $0x18] sm:$0xff]  ;;  %v193_v32 = vld [vmem:[%s5040_s4 + $0x20] sm:$0xff] }
  0x21   :  { %188 = vst [vmem:[#allocation5] sm:$0xff] %v187_v29  ;;  %v195_v33 = vld [vmem:[%s5040_s4 + $0x28] sm:$0xff]  ;;  %v197_v34 = vld [vmem:[%s5040_s4 + $0x30] sm:$0xff]  ;;  %v199_v35 = vld [vmem:[%s5040_s4 + $0x38] sm:$0xff] }
  0x22   :  { %190 = vst [vmem:[#allocation5 + $0x10] sm:$0xff] %v189_v30 }
  0x23   :  { %192 = vst [vmem:[#allocation5 + $0x20] sm:$0xff] %v191_v31 }
  0x24   :  { %194 = vst [vmem:[#allocation5 + $0x18] sm:$0xff] %v193_v32 }
  0x25   :  { %196 = vst [vmem:[#allocation5 + $0x8] sm:$0xff] %v195_v33 }
  0x26   :  { %198 = vst [vmem:[#allocation5 + $0x38] sm:$0xff] %v197_v34 }
  0x27   :  { %200 = vst [vmem:[#allocation5 + $0x30] sm:$0xff] %v199_v35 }
  0x28   :  { %206 = vsyncadd [#allocation7 + $0x6], 1024  ;;  %s215_s9 = sshll.u32 %s5041_s5, 4  ;;  %v221_v36 = vld [vmem:[%s5037_s0] sm:$0xff]  ;;  %v222_v37 = vld [vmem:[%s5037_s0 + $0x8] sm:$0xff]  ;;  %s4473_s13 = smov [#allocation6]   ;;  %s216_s9 = int_to_ptr.hbm [resolvable:$true] %s215_s9 }
  0x29   :  { %s217_s14 = sshll.u32 %s4473_s13, 4  ;;  %v223_v38 = vld [vmem:[%s5037_s0 + $0x10] sm:$0xff]  ;;  %v224_v39 = vld [vmem:[%s5037_s0 + $0x18] sm:$0xff]  ;;  %v225_v40 = vld [vmem:[%s5037_s0 + $0x20] sm:$0xff]  ;;  %v4657_v41 = vpack.c.bf16 %v222_v37, %v221_v36  ;;  %s218_s14 = int_to_ptr.vmem [resolvable:$true] %s217_s14 }
  0x2a   :  { %v226_v42 = vld [vmem:[%s5037_s0 + $0x28] sm:$0xff]  ;;  %v227_v43 = vld [vmem:[%s5037_s0 + $0x30] sm:$0xff]  ;;  %v228_v44 = vld [vmem:[%s5037_s0 + $0x38] sm:$0xff]  ;;  %v4668_v45 = vpack.c.bf16 %v224_v39, %v223_v38  ;;  %220 = dma.hbm_to_vmem [thread:$0]  %s216_s9, 16384, %s218_s14, [#allocation7 + $0x7] }
  0x2b   :  { %5052 = vst [vmem:[#allocation31_spill] sm:$0xff] %v4657_v41  ;;  %v229_v46 = vld [vmem:[%s5037_s0 + $0x40] sm:$0xff]  ;;  %v230_v47 = vld [vmem:[%s5037_s0 + $0x48] sm:$0xff]  ;;  %v231_v48 = vld [vmem:[%s5037_s0 + $0x50] sm:$0xff]  ;;  %v4679_v49 = vpack.c.bf16 %v226_v42, %v225_v40  ;;  %v4681_v50 = vpack.c.bf16 %v228_v44, %v227_v43 }
  0x2c   :  { %v232_v51 = vld [vmem:[%s5037_s0 + $0x58] sm:$0xff]  ;;  %v233_v52 = vld [vmem:[%s5037_s0 + $0x60] sm:$0xff]  ;;  %v234_v53 = vld [vmem:[%s5037_s0 + $0x68] sm:$0xff]  ;;  %v4692_v54 = vpack.c.bf16 %v230_v47, %v229_v46 }
  0x2d   :  { %5053 = vst [vmem:[#allocation32_spill] sm:$0xff] %v4679_v49  ;;  %v235_v55 = vld [vmem:[%s5037_s0 + $0x70] sm:$0xff]  ;;  %v236_v56 = vld [vmem:[%s5037_s0 + $0x78] sm:$0xff]  ;;  %v4700_v57 = vpack.c.bf16 %v232_v51, %v231_v48  ;;  %v4702_v58 = vpack.c.bf16 %v234_v53, %v233_v52 }
  0x2e   :  { %5054 = vst [vmem:[#allocation33_spill] sm:$0xff] %v4681_v50  ;;  %v4704_v59 = vpack.c.bf16 %v236_v56, %v235_v55 }
  0x2f   :  { %5055 = vst [vmem:[#allocation34_spill] sm:$0xff] %v4692_v54 }
  0x30   :  { %5056 = vst [vmem:[#allocation35_spill] sm:$0xff] %v4702_v58 }
  0x31   :  { %5057 = vst [vmem:[#allocation36_spill] sm:$0xff] %v4704_v59 }
  0x32   :  { %4453 = dma.done.wait [#allocation7], 4096 }
  0x33   :  { %4454 = vsyncadd [#allocation7], 4294963200  ;;  %v4706_v60 = vld [vmem:[#allocation2 + $0x4] sm:$0xf]  ;;  %v4708_v61 = vld [vmem:[#allocation2] sm:$0xf] }
  0x34   :  { %5058 = vst [vmem:[#allocation37_spill] sm:$0xff] %v4706_v60  ;;  %v4710_v62 = vld [vmem:[#allocation2 + $0x8] sm:$0xf0]  ;;  %v4712_v63 = vld [vmem:[#allocation2 + $0x4] sm:$0xf0] }
  0x35   :  { %5059 = vst [vmem:[#allocation38_spill] sm:$0xff] %v4708_v61  ;;  %v4714_v0 = vld [vmem:[#allocation2 + $0x14] sm:$0xf]  ;;  %v4716_v1 = vld [vmem:[#allocation2 + $0x10] sm:$0xf] }
  0x36   :  { %5060 = vst [vmem:[#allocation39_spill] sm:$0xff] %v4710_v62  ;;  %v4718_v2 = vld [vmem:[#allocation2 + $0x18] sm:$0xf0]  ;;  %v4720_v3 = vld [vmem:[#allocation2 + $0x14] sm:$0xf0] }
  0x37   :  { %5061 = vst [vmem:[#allocation40_spill] sm:$0xff] %v4712_v63  ;;  %v4722_v4 = vld [vmem:[#allocation2 + $0x24] sm:$0xf]  ;;  %v4724_v5 = vld [vmem:[#allocation2 + $0x20] sm:$0xf] }
  0x38   :  { %5062 = vst [vmem:[#allocation41_spill] sm:$0xff] %v4714_v0  ;;  %v4726_v6 = vld [vmem:[#allocation2 + $0x28] sm:$0xf0]  ;;  %v4728_v7 = vld [vmem:[#allocation2 + $0x24] sm:$0xf0] }
  0x39   :  { %5063 = vst [vmem:[#allocation42_spill] sm:$0xff] %v4716_v1  ;;  %v4730_v8 = vld [vmem:[#allocation2 + $0x34] sm:$0xf]  ;;  %v4732_v9 = vld [vmem:[#allocation2 + $0x30] sm:$0xf] }
  0x3a   :  { %5064 = vst [vmem:[#allocation43_spill] sm:$0xff] %v4718_v2  ;;  %v4734_v10 = vld [vmem:[#allocation2 + $0x38] sm:$0xf0]  ;;  %v4736_v11 = vld [vmem:[#allocation2 + $0x34] sm:$0xf0] }
  0x3b   :  { %5065 = vst [vmem:[#allocation44_spill] sm:$0xff] %v4720_v3  ;;  %v4738_v12 = vld [vmem:[#allocation2 + $0x44] sm:$0xf]  ;;  %v4740_v13 = vld [vmem:[#allocation2 + $0x40] sm:$0xf] }
  0x3c   :  { %5066 = vst [vmem:[#allocation45_spill] sm:$0xff] %v4722_v4  ;;  %v4742_v14 = vld [vmem:[#allocation2 + $0x48] sm:$0xf0]  ;;  %v4744_v15 = vld [vmem:[#allocation2 + $0x44] sm:$0xf0] }
  0x3d   :  { %5067 = vst [vmem:[#allocation46_spill] sm:$0xff] %v4724_v5  ;;  %v4746_v16 = vld [vmem:[#allocation2 + $0x54] sm:$0xf]  ;;  %v4748_v17 = vld [vmem:[#allocation2 + $0x50] sm:$0xf] }
  0x3e   :  { %5068 = vst [vmem:[#allocation47_spill] sm:$0xff] %v4726_v6  ;;  %v4750_v18 = vld [vmem:[#allocation2 + $0x58] sm:$0xf0]  ;;  %v4752_v19 = vld [vmem:[#allocation2 + $0x54] sm:$0xf0] }
  0x3f   :  { %5069 = vst [vmem:[#allocation48_spill] sm:$0xff] %v4728_v7  ;;  %v4754_v20 = vld [vmem:[#allocation2 + $0x64] sm:$0xf]  ;;  %v4756_v21 = vld [vmem:[#allocation2 + $0x60] sm:$0xf] }
  0x40   :  { %5070 = vst [vmem:[#allocation49_spill] sm:$0xff] %v4730_v8  ;;  %v4758_v22 = vld [vmem:[#allocation2 + $0x68] sm:$0xf0]  ;;  %v4760_v23 = vld [vmem:[#allocation2 + $0x64] sm:$0xf0] }
  0x41   :  { %5071 = vst [vmem:[#allocation50_spill] sm:$0xff] %v4734_v10  ;;  %v4762_v24 = vld [vmem:[#allocation2 + $0x74] sm:$0xf]  ;;  %v4764_v25 = vld [vmem:[#allocation2 + $0x70] sm:$0xf] }
  0x42   :  { %v4766_v26 = vld [vmem:[#allocation2 + $0x78] sm:$0xf0]  ;;  %v4768_v27 = vld [vmem:[#allocation2 + $0x74] sm:$0xf0]  ;;  %v4770_v28 = vld [vmem:[#allocation2 + $0x84] sm:$0xf] }
  0x43   :  { %5072 = vst [vmem:[#allocation51_spill] sm:$0xff] %v4770_v28  ;;  %v4772_v29 = vld [vmem:[#allocation2 + $0x80] sm:$0xf]  ;;  %v4774_v30 = vld [vmem:[#allocation2 + $0x88] sm:$0xf0] }
  0x44   :  { %5073 = vst [vmem:[#allocation52_spill] sm:$0xff] %v4772_v29  ;;  %v4776_v31 = vld [vmem:[#allocation2 + $0x84] sm:$0xf0]  ;;  %v4778_v32 = vld [vmem:[#allocation2 + $0x94] sm:$0xf] }
  0x45   :  { %5074 = vst [vmem:[#allocation53_spill] sm:$0xff] %v4774_v30  ;;  %v4780_v33 = vld [vmem:[#allocation2 + $0x90] sm:$0xf]  ;;  %v4782_v34 = vld [vmem:[#allocation2 + $0x98] sm:$0xf0] }
  0x46   :  { %5075 = vst [vmem:[#allocation54_spill] sm:$0xff] %v4776_v31  ;;  %v4784_v35 = vld [vmem:[#allocation2 + $0x94] sm:$0xf0]  ;;  %v4786_v36 = vld [vmem:[#allocation2 + $0xa4] sm:$0xf] }
  0x47   :  { %5076 = vst [vmem:[#allocation55_spill] sm:$0xff] %v4778_v32  ;;  %v4788_v37 = vld [vmem:[#allocation2 + $0xa0] sm:$0xf]  ;;  %v4790_v38 = vld [vmem:[#allocation2 + $0xa8] sm:$0xf0] }
  0x48   :  { %5077 = vst [vmem:[#allocation56_spill] sm:$0xff] %v4780_v33  ;;  %v4792_v39 = vld [vmem:[#allocation2 + $0xa4] sm:$0xf0]  ;;  %v4794_v40 = vld [vmem:[#allocation2 + $0xb4] sm:$0xf] }
  0x49   :  { %5078 = vst [vmem:[#allocation57_spill] sm:$0xff] %v4782_v34  ;;  %v4796_v42 = vld [vmem:[#allocation2 + $0xb0] sm:$0xf]  ;;  %v4798_v43 = vld [vmem:[#allocation2 + $0xb8] sm:$0xf0] }
  0x4a   :  { %5079 = vst [vmem:[#allocation58_spill] sm:$0xff] %v4784_v35  ;;  %v4800_v44 = vld [vmem:[#allocation2 + $0xb4] sm:$0xf0]  ;;  %v4802_v46 = vld [vmem:[#allocation2 + $0xc4] sm:$0xf] }
  0x4b   :  { %5080 = vst [vmem:[#allocation59_spill] sm:$0xff] %v4786_v36  ;;  %v4804_v47 = vld [vmem:[#allocation2 + $0xc0] sm:$0xf]  ;;  %v4806_v48 = vld [vmem:[#allocation2 + $0xc8] sm:$0xf0] }
  0x4c   :  { %5081 = vst [vmem:[#allocation60_spill] sm:$0xff] %v4788_v37  ;;  %v4808_v51 = vld [vmem:[#allocation2 + $0xc4] sm:$0xf0]  ;;  %v4810_v52 = vld [vmem:[#allocation2 + $0xd4] sm:$0xf] }
  0x4d   :  { %5082 = vst [vmem:[#allocation61_spill] sm:$0xff] %v4790_v38  ;;  %v4812_v53 = vld [vmem:[#allocation2 + $0xd0] sm:$0xf]  ;;  %v4814_v55 = vld [vmem:[#allocation2 + $0xd8] sm:$0xf0] }
  0x4e   :  { %5083 = vst [vmem:[#allocation62_spill] sm:$0xff] %v4792_v39  ;;  %v4816_v56 = vld [vmem:[#allocation2 + $0xd4] sm:$0xf0]  ;;  %v4818_v59 = vld [vmem:[#allocation2 + $0xe4] sm:$0xf] }
  0x4f   :  { %5084 = vst [vmem:[#allocation63_spill] sm:$0xff] %v4794_v40  ;;  %v4820_v50 = vld [vmem:[#allocation2 + $0xe0] sm:$0xf]  ;;  %v4822_v58 = vld [vmem:[#allocation2 + $0xe8] sm:$0xf0] }
  0x50   :  { %5085 = vst [vmem:[#allocation64_spill] sm:$0xff] %v4798_v43  ;;  %v4824_v49 = vld [vmem:[#allocation2 + $0xe4] sm:$0xf0]  ;;  %v4826_v28 = vld [vmem:[#allocation2 + $0xf4] sm:$0xf] }
  0x51   :  { %v4828_v30 = vld [vmem:[#allocation2 + $0xf0] sm:$0xf]  ;;  %v4830_v60 = vld [vmem:[#allocation2 + $0xf8] sm:$0xf0]  ;;  %v4832_v62 = vld [vmem:[#allocation2 + $0xf4] sm:$0xf0] }
  0x52   :  { %4455 = dma.done.wait [#allocation7 + $0x1], 4096 }
  0x53   :  { %4456 = vsyncadd [#allocation7 + $0x1], 4294963200  ;;  %v2913_v31 = vld [vmem:[#allocation2 + $0x170] sm:$0xf]  ;;  %v4081_v29 = vld [vmem:[#allocation2 + $0x174] sm:$0xf0]  ;;  %v326_v10 = vunpack.c.l.b16 %v4668_v45 }
  0x54   :  { %v2977_v63 = vld [vmem:[#allocation2 + $0x1f0] sm:$0xf]  ;;  %v2914_v61 = vor.u32 %v4081_v29, %v2913_v31  ;;  %v4097_v54 = vld [vmem:[#allocation2 + $0x1f4] sm:$0xf0]  ;;  %v4080_v41 = vld [vmem:[#allocation2 + $0x174] sm:$0xf] }
  0x55   :  { %v2915_v32 = vld [vmem:[#allocation2 + $0x178] sm:$0xf0]  ;;  %v2978_v34 = vor.u32 %v4097_v54, %v2977_v63  ;;  %v4096_v2 = vld [vmem:[#allocation2 + $0x1f4] sm:$0xf]  ;;  %v2905_v33 = vld [vmem:[#allocation2 + $0x160] sm:$0xf] }
  0x56   :  { %v2918_v0 = vor.u32 %v4080_v41, %v2915_v32  ;;  %v2979_v35 = vld [vmem:[#allocation2 + $0x1f8] sm:$0xf0]  ;;  %494 = vmatpush.bf16.msra.mxu0 %v2914_v61  ;;  %v4079_v1 = vld [vmem:[#allocation2 + $0x164] sm:$0xf0]  ;;  %v2969_v36 = vld [vmem:[#allocation2 + $0x1e0] sm:$0xf] }
  0x57   :  { %v2982_v3 = vor.u32 %v4096_v2, %v2979_v35  ;;  %v4095_v38 = vld [vmem:[#allocation2 + $0x1e4] sm:$0xf0]  ;;  %508 = vmatpush.bf16.msra.mxu1 %v2978_v34  ;;  %v2906_v4 = vor.u32 %v4079_v1, %v2905_v33  ;;  %v4078_v39 = vld [vmem:[#allocation2 + $0x164] sm:$0xf]  ;;  %v2907_v37 = vld [vmem:[#allocation2 + $0x168] sm:$0xf0] }
  0x58   :  { %522 = vmatpush.bf16.msra.mxu2 %v2918_v0  ;;  %v2970_v6 = vor.u32 %v4095_v38, %v2969_v36  ;;  %v4094_v29 = vld [vmem:[#allocation2 + $0x1e4] sm:$0xf]  ;;  %v2910_v31 = vor.u32 %v4078_v39, %v2907_v37  ;;  %v2971_v7 = vld [vmem:[#allocation2 + $0x1e8] sm:$0xf0]  ;;  %v2897_v54 = vld [vmem:[#allocation2 + $0x150] sm:$0xf] }
  0x59   :  { %536 = vmatpush.bf16.msra.mxu3 %v2982_v3  ;;  %v4077_v41 = vld [vmem:[#allocation2 + $0x154] sm:$0xf0]  ;;  %v2974_v63 = vor.u32 %v4094_v29, %v2971_v7  ;;  %v2961_v32 = vld [vmem:[#allocation2 + $0x1d0] sm:$0xf]  ;;  %v4076_v61 = vld [vmem:[#allocation2 + $0x154] sm:$0xf] }
  0x5a   :  { %v4093_v5 = vld [vmem:[#allocation2 + $0x1d4] sm:$0xf0]  ;;  %495 = vmatpush.bf16.msra.mxu0 %v2906_v4  ;;  %v2898_v2 = vor.u32 %v4077_v41, %v2897_v54  ;;  %v2899_v35 = vld [vmem:[#allocation2 + $0x158] sm:$0xf0]  ;;  %v4092_v40 = vld [vmem:[#allocation2 + $0x1d4] sm:$0xf] }
  0x5b   :  { %v2963_v34 = vld [vmem:[#allocation2 + $0x1d8] sm:$0xf0]  ;;  %509 = vmatpush.bf16.msra.mxu1 %v2970_v6  ;;  %v2962_v0 = vor.u32 %v4093_v5, %v2961_v32  ;;  %v2902_v1 = vor.u32 %v4076_v61, %v2899_v35  ;;  %v2889_v33 = vld [vmem:[#allocation2 + $0x140] sm:$0xf]  ;;  %v4075_v36 = vld [vmem:[#allocation2 + $0x144] sm:$0xf0] }
  0x5c   :  { %523 = vmatpush.bf16.msra.mxu2 %v2910_v31  ;;  %v2953_v3 = vld [vmem:[#allocation2 + $0x1c0] sm:$0xf]  ;;  %v2966_v37 = vor.u32 %v4092_v40, %v2963_v34  ;;  %v4091_v38 = vld [vmem:[#allocation2 + $0x1c4] sm:$0xf0]  ;;  %v4074_v39 = vld [vmem:[#allocation2 + $0x144] sm:$0xf]  ;;  %v2890_v4 = vor.u32 %v4075_v36, %v2889_v33 }
  0x5d   :  { %537 = vmatpush.bf16.msra.mxu3 %v2974_v63  ;;  %v2891_v7 = vld [vmem:[#allocation2 + $0x148] sm:$0xf0]  ;;  %v4090_v29 = vld [vmem:[#allocation2 + $0x1c4] sm:$0xf]  ;;  %v2954_v54 = vor.u32 %v4091_v38, %v2953_v3  ;;  %v2881_v6 = vld [vmem:[#allocation2 + $0x130] sm:$0xf] }
  0x5e   :  { %v2955_v43 = vld [vmem:[#allocation2 + $0x1c8] sm:$0xf0]  ;;  %496 = vmatpush.bf16.msra.mxu0 %v2898_v2  ;;  %v2894_v41 = vor.u32 %v4074_v39, %v2891_v7  ;;  %v4073_v31 = vld [vmem:[#allocation2 + $0x134] sm:$0xf0]  ;;  %v2945_v5 = vld [vmem:[#allocation2 + $0x1b0] sm:$0xf] }
  0x5f   :  { %510 = vmatpush.bf16.msra.mxu1 %v2962_v0  ;;  %v2958_v32 = vor.u32 %v4090_v29, %v2955_v43  ;;  %v4089_v61 = vld [vmem:[#allocation2 + $0x1b4] sm:$0xf0]  ;;  %v4072_v35 = vld [vmem:[#allocation2 + $0x134] sm:$0xf]  ;;  %v2883_v63 = vld [vmem:[#allocation2 + $0x138] sm:$0xf0]  ;;  %v2882_v8 = vor.u32 %v4073_v31, %v2881_v6 }
  0x60   :  { %524 = vmatpush.bf16.msra.mxu2 %v2902_v1  ;;  %v4088_v40 = vld [vmem:[#allocation2 + $0x1b4] sm:$0xf]  ;;  %v2947_v34 = vld [vmem:[#allocation2 + $0x1b8] sm:$0xf0]  ;;  %v2946_v2 = vor.u32 %v4089_v61, %v2945_v5  ;;  %v2886_v33 = vor.u32 %v4072_v35, %v2883_v63  ;;  %v2873_v0 = vld [vmem:[#allocation2 + $0x120] sm:$0xf] }
  0x61   :  { %538 = vmatpush.bf16.msra.mxu3 %v2966_v37  ;;  %v4071_v1 = vld [vmem:[#allocation2 + $0x124] sm:$0xf0]  ;;  %v2937_v36 = vld [vmem:[#allocation2 + $0x1a0] sm:$0xf]  ;;  %v2950_v3 = vor.u32 %v4088_v40, %v2947_v34  ;;  %v4070_v39 = vld [vmem:[#allocation2 + $0x124] sm:$0xf] }
  0x62   :  { %497 = vmatpush.bf16.msra.mxu0 %v2890_v4  ;;  %v4087_v38 = vld [vmem:[#allocation2 + $0x1a4] sm:$0xf0]  ;;  %v2875_v37 = vld [vmem:[#allocation2 + $0x128] sm:$0xf0]  ;;  %v4086_v43 = vld [vmem:[#allocation2 + $0x1a4] sm:$0xf]  ;;  %v2874_v29 = vor.u32 %v4071_v1, %v2873_v0 }
  0x63   :  { %511 = vmatpush.bf16.msra.mxu1 %v2954_v54  ;;  %v2939_v7 = vld [vmem:[#allocation2 + $0x1a8] sm:$0xf0]  ;;  %v2938_v4 = vor.u32 %v4087_v38, %v2937_v36  ;;  %v2878_v6 = vor.u32 %v4070_v39, %v2875_v37  ;;  %v2865_v54 = vld [vmem:[#allocation2 + $0x110] sm:$0xf]  ;;  %v4085_v61 = vld [vmem:[#allocation2 + $0x194] sm:$0xf0] }
  0x64   :  { %525 = vmatpush.bf16.msra.mxu2 %v2894_v41  ;;  %v4069_v41 = vld [vmem:[#allocation2 + $0x114] sm:$0xf0]  ;;  %v2929_v31 = vld [vmem:[#allocation2 + $0x190] sm:$0xf]  ;;  %v2942_v5 = vor.u32 %v4086_v43, %v2939_v7  ;;  %v4068_v35 = vld [vmem:[#allocation2 + $0x114] sm:$0xf] }
  0x65   :  { %539 = vmatpush.bf16.msra.mxu3 %v2958_v32  ;;  %v2867_v32 = vld [vmem:[#allocation2 + $0x118] sm:$0xf0]  ;;  %v4084_v63 = vld [vmem:[#allocation2 + $0x194] sm:$0xf]  ;;  %v2866_v34 = vor.u32 %v4069_v41, %v2865_v54  ;;  %v2921_v1 = vld [vmem:[#allocation2 + $0x180] sm:$0xf]  ;;  %v327_v54 = vunpack.c.h.b16 %v4668_v45  ;;  %v329_v41 = vunpack.c.h.b16 %v4700_v57 }
  0x66   :  { %498 = vmatpush.bf16.msra.mxu0 %v2882_v8  ;;  %v2931_v40 = vld [vmem:[#allocation2 + $0x198] sm:$0xf0]  ;;  %v2930_v8 = vor.u32 %v4085_v61, %v2929_v31  ;;  %v2870_v0 = vor.u32 %v4068_v35, %v2867_v32  ;;  %v4083_v38 = vld [vmem:[#allocation2 + $0x184] sm:$0xf0]  ;;  %v4066_v39 = vld [vmem:[#allocation2 + $0x104] sm:$0xf]  ;;  %v3106_v61 = vor.u32 %v4832_v62, %v4828_v30  ;;  %v3046_v35 = vor.u32 %v4762_v24, %v4766_v26 }
  0x67   :  { %512 = vmatpush.bf16.msra.mxu1 %v2946_v2  ;;  %v2857_v2 = vld [vmem:[#allocation2 + $0x100] sm:$0xf]  ;;  %v2934_v36 = vor.u32 %v4084_v63, %v2931_v40  ;;  %v4082_v37 = vld [vmem:[#allocation2 + $0x184] sm:$0xf]  ;;  %v2923_v43 = vld [vmem:[#allocation2 + $0x188] sm:$0xf0]  ;;  %v3110_v32 = vor.u32 %v4826_v28, %v4830_v60  ;;  %v331_v45 = vpack.c.b16 %v329_v41, %v327_v54  ;;  %v3098_v62 = vor.u32 %v4824_v49, %v4820_v50 }
  0x68   :  { %526 = vmatpush.bf16.msra.mxu2 %v2886_v33  ;;  %v4067_v33 = vld [vmem:[#allocation2 + $0x104] sm:$0xf0]  ;;  %v2926_v31 = vor.u32 %v4082_v37, %v2923_v43  ;;  %v3038_v24 = vor.u32 %v4754_v20, %v4758_v22  ;;  %v3102_v60 = vor.u32 %v4818_v59, %v4822_v58  ;;  %v3090_v49 = vor.u32 %v4816_v56, %v4812_v53  ;;  %v5087_v20 = vld [vmem:[#allocation49_spill] sm:$0xff]  ;;  %v5094_v28 = vld [vmem:[#allocation47_spill] sm:$0xff] }
  0x69   :  { %540 = vmatpush.bf16.msra.mxu3 %v2950_v3  ;;  %v2859_v3 = vld [vmem:[#allocation2 + $0x108] sm:$0xf0]  ;;  %v2858_v7 = vor.u32 %v4067_v33, %v2857_v2  ;;  %v3030_v50 = vor.u32 %v4746_v16, %v4750_v18  ;;  %v3094_v58 = vor.u32 %v4810_v52, %v4814_v55  ;;  %v3018_v59 = vor.u32 %v4744_v15, %v4740_v13  ;;  %v5086_v15 = vld [vmem:[#allocation50_spill] sm:$0xff]  ;;  %v5095_v30 = vld [vmem:[#allocation45_spill] sm:$0xff] }
  0x6a   :  { %499 = vmatpush.bf16.msra.mxu0 %v2874_v29  ;;  %v328_v29 = vunpack.c.l.b16 %v4700_v57  ;;  %v3034_v57 = vor.u32 %v4760_v23, %v4756_v21  ;;  %v3086_v16 = vor.u32 %v4802_v46, %v4806_v48  ;;  %v3010_v18 = vor.u32 %v4736_v11, %v4732_v9  ;;  %v5088_v22 = vld [vmem:[#allocation64_spill] sm:$0xff]  ;;  %v5089_v23 = vld [vmem:[#allocation63_spill] sm:$0xff]  ;;  %v5093_v9 = vld [vmem:[#allocation62_spill] sm:$0xff] }
  0x6b   :  { %513 = vmatpush.bf16.msra.mxu1 %v2938_v4  ;;  %v2922_v4 = vor.u32 %v4083_v38, %v2921_v1  ;;  %v3074_v13 = vor.u32 %v4800_v44, %v4796_v42  ;;  %v3014_v21 = vor.u32 %v5087_v20, %v5086_v15  ;;  %v3006_v46 = vor.u32 %v5095_v30, %v5094_v28  ;;  %v5096_v42 = vld [vmem:[#allocation61_spill] sm:$0xff]  ;;  %v5097_v44 = vld [vmem:[#allocation59_spill] sm:$0xff]  ;;  %v5098_v48 = vld [vmem:[#allocation42_spill] sm:$0xff] }
  0x6c   :  { %527 = vmatpush.bf16.msra.mxu2 %v2878_v6  ;;  %v2862_v6 = vor.u32 %v4066_v39, %v2859_v3  ;;  %v330_v63 = vpack.c.b16 %v328_v29, %v326_v10  ;;  %v3026_v10 = vor.u32 %v4752_v19, %v4748_v17  ;;  %v3082_v17 = vor.u32 %v4808_v51, %v4804_v47  ;;  %v5099_v51 = vld [vmem:[#allocation44_spill] sm:$0xff]  ;;  %v5101_v55 = vld [vmem:[#allocation58_spill] sm:$0xff]  ;;  %v5102_v40 = vld [vmem:[#allocation43_spill] sm:$0xff] }
  0x6d   :  { %541 = vmatpush.bf16.msra.mxu3 %v2942_v5  ;;  %v3042_v5 = vor.u32 %v4768_v27, %v4764_v25  ;;  %v3022_v19 = vor.u32 %v4738_v12, %v4742_v14  ;;  %v3078_v12 = vor.u32 %v5089_v23, %v5088_v22  ;;  %v5090_v14 = vld [vmem:[#allocation46_spill] sm:$0xff]  ;;  %v5091_v25 = vld [vmem:[#allocation48_spill] sm:$0xff]  ;;  %v3070_v47 = vor.u32 %v5097_v44, %v5096_v42  ;;  %v5105_v2 = vld [vmem:[#allocation55_spill] sm:$0xff] }
  0x6e   :  { %500 = vmatpush.bf16.msra.mxu0 %v2866_v34  ;;  %v3002_v26 = vor.u32 %v5091_v25, %v5090_v14  ;;  %v5092_v27 = vld [vmem:[#allocation60_spill] sm:$0xff]  ;;  %v2994_v52 = vor.u32 %v5099_v51, %v5098_v48  ;;  %v5103_v34 = vld [vmem:[#allocation41_spill] sm:$0xff]  ;;  %v5106_v1 = vld [vmem:[#allocation31_spill] sm:$0xff] }
  0x6f   :  { %514 = vmatpush.bf16.msra.mxu1 %v2930_v8  ;;  %v3066_v11 = vor.u32 %v5093_v9, %v5092_v27  ;;  %v5100_v53 = vld [vmem:[#allocation56_spill] sm:$0xff]  ;;  %v2998_v8 = vor.u32 %v5103_v34, %v5102_v40  ;;  %v5107_v38 = vld [vmem:[#allocation34_spill] sm:$0xff]  ;;  %v5112_v41 = vld [vmem:[#allocation39_spill] sm:$0xff] }
  0x70   :  { %528 = vmatpush.bf16.msra.mxu2 %v2870_v0  ;;  %v3058_v56 = vor.u32 %v5101_v55, %v5100_v53  ;;  %v5104_v0 = vld [vmem:[#allocation57_spill] sm:$0xff]  ;;  %v554_v39 = vunpack.c.l.b16 %v5107_v38  ;;  %v5108_v3 = vld [vmem:[#allocation38_spill] sm:$0xff]  ;;  %v5109_v37 = vld [vmem:[#allocation40_spill] sm:$0xff]  ;;  %v555_v29 = vunpack.c.h.b16 %v5107_v38 }
  0x71   :  { %542 = vmatpush.bf16.msra.mxu3 %v2934_v36  ;;  %v3062_v33 = vor.u32 %v5105_v2, %v5104_v0  ;;  %v552_v36 = vunpack.c.l.b16 %v5106_v1  ;;  %v2986_v43 = vor.u32 %v5109_v37, %v5108_v3 }
  0x72   :  { %501 = vmatpush.bf16.msra.mxu0 %v2858_v7  ;;  %v553_v7 = vunpack.c.h.b16 %v5106_v1 }
  0x73   :  { %515 = vmatpush.bf16.msra.mxu1 %v2922_v4  ;;  %v5110_v4 = vld [vmem:[#allocation52_spill] sm:$0xff] }
  0x74   :  { %529 = vmatpush.bf16.msra.mxu2 %v2862_v6  ;;  %v5111_v6 = vld [vmem:[#allocation54_spill] sm:$0xff] }
  0x75   :  { %543 = vmatpush.bf16.msra.mxu3 %v2926_v31  ;;  %502 = vmatmul.bf16.vlgmr.msra.gmra.mxu0 %v330_v63  ;;  %v3050_v54 = vor.u32 %v5111_v6, %v5110_v4  ;;  %v5113_v31 = vld [vmem:[#allocation37_spill] sm:$0xff] }
  0x76   :  { %720 = vmatpush.bf16.msrb.mxu0 %v3042_v5  ;;  %516 = vmatmul.bf16.vlgmr.msra.gmra.mxu1 %v331_v45  ;;  %v2990_v5 = vor.u32 %v5113_v31, %v5112_v41 }
  0x77   :  { %734 = vmatpush.bf16.msrb.mxu1 %v3106_v61  ;;  %530 = vmatmul.bf16.vlgmr.msra.gmra.mxu2 %v330_v63  ;;  %v5114_v61 = vld [vmem:[#allocation53_spill] sm:$0xff]  ;;  %v556_v63 = vpack.c.b16 %v554_v39, %v552_v36 }
  0x78   :  { %748 = vmatpush.bf16.msrb.mxu2 %v3046_v35  ;;  %544 = vmatmul.bf16.vlgmr.msra.gmra.mxu3 %v331_v45  ;;  %v5115_v35 = vld [vmem:[#allocation51_spill] sm:$0xff]  ;;  %v557_v45 = vpack.c.b16 %v555_v29, %v553_v7 }
  0x79   :  { %762 = vmatpush.bf16.msrb.mxu3 %v3110_v32  ;;  %v3054_v32 = vor.u32 %v5115_v35, %v5114_v61 }
  0x7a   :  { %721 = vmatpush.bf16.msrb.mxu0 %v3034_v57 }
  0x7b   :  { %735 = vmatpush.bf16.msrb.mxu1 %v3098_v62 }
  0x7c   :  { %749 = vmatpush.bf16.msrb.mxu2 %v3038_v24 }
  0x7d   :  { %763 = vmatpush.bf16.msrb.mxu3 %v3102_v60 }
  0x7e   :  { %722 = vmatpush.bf16.msrb.mxu0 %v3026_v10 }
  0x7f   :  { %736 = vmatpush.bf16.msrb.mxu1 %v3090_v49 }
  0x80   :  { %750 = vmatpush.bf16.msrb.mxu2 %v3030_v50 }
  0x81   :  { %764 = vmatpush.bf16.msrb.mxu3 %v3094_v58 }
  0x82   :  { %723 = vmatpush.bf16.msrb.mxu0 %v3018_v59 }
  0x83   :  { %737 = vmatpush.bf16.msrb.mxu1 %v3082_v17 }
  0x84   :  { %751 = vmatpush.bf16.msrb.mxu2 %v3022_v19 }
  0x85   :  { %765 = vmatpush.bf16.msrb.mxu3 %v3086_v16 }
  0x86   :  { %724 = vmatpush.bf16.msrb.mxu0 %v3010_v18 }
  0x87   :  { %738 = vmatpush.bf16.msrb.mxu1 %v3074_v13 }
  0x88   :  { %752 = vmatpush.bf16.msrb.mxu2 %v3014_v21 }
  0x89   :  { %766 = vmatpush.bf16.msrb.mxu3 %v3078_v12 }
  0x8a   :  { %725 = vmatpush.bf16.msrb.mxu0 %v3002_v26 }
  0x8b   :  { %739 = vmatpush.bf16.msrb.mxu1 %v3066_v11 }
  0x8c   :  { %753 = vmatpush.bf16.msrb.mxu2 %v3006_v46 }
  0x8d   :  { %767 = vmatpush.bf16.msrb.mxu3 %v3070_v47 }
  0x8e   :  { %726 = vmatpush.bf16.msrb.mxu0 %v2994_v52 }
  0x8f   :  { %740 = vmatpush.bf16.msrb.mxu1 %v3058_v56 }
  0x90   :  { %754 = vmatpush.bf16.msrb.mxu2 %v2998_v8 }
  0x91   :  { %768 = vmatpush.bf16.msrb.mxu3 %v3062_v33 }
  0x92   :  { %727 = vmatpush.bf16.msrb.mxu0 %v2986_v43 }
  0x93   :  { %741 = vmatpush.bf16.msrb.mxu1 %v3050_v54 }
  0x94   :  { %755 = vmatpush.bf16.msrb.mxu2 %v2990_v5 }
  0x95   :  { %769 = vmatpush.bf16.msrb.mxu3 %v3054_v32  ;;  %728 = vmatmul.bf16.vlgmr.msrb.gmra.mxu0 %v556_v63 }
  0x96   :  { %742 = vmatmul.bf16.vlgmr.msrb.gmra.mxu1 %v557_v45 }
  0x97   :  { %756 = vmatmul.bf16.vlgmr.msrb.gmra.mxu2 %v556_v63 }
  0x98   :  { %770 = vmatmul.bf16.vlgmr.msrb.gmra.mxu3 %v557_v45 }
  0xf2   :  { %v503_v57 = vpop.f32.mrf.mxu0 }
  0xf3   :  { %v517_v62 = vpop.f32.mrf.mxu1 }
  0xf4   :  { %v518_v50 = vadd.f32 %v517_v62, %v503_v57 }
  0xfa   :  { %v531_v24 = vpop.f32.mrf.mxu2  ;;  %v505_v10 = vpop.f32.mrf.mxu0 }
  0xfb   :  { %v545_v60 = vpop.f32.mrf.mxu3  ;;  %v519_v49 = vpop.f32.mrf.mxu1 }
  0xfc   :  { %v546_v13 = vadd.f32 %v545_v60, %v531_v24  ;;  %v520_v15 = vadd.f32 %v519_v49, %v505_v10 }
 0x102   :  { %v533_v58 = vpop.f32.mrf.mxu2 }
 0x103   :  { %v547_v59 = vpop.f32.mrf.mxu3 }
 0x104   :  { %v548_v27 = vadd.f32 %v547_v59, %v533_v58 }
 0x112   :  { %v729_v17 = vpop.f32.mrf.mxu0 }
 0x113   :  { %v730_v19 = vadd.f32 %v729_v17, %v518_v50  ;;  %v743_v16 = vpop.f32.mrf.mxu1 }
 0x115   :  { %v4906_v18 = vadd.f32 %v743_v16, %v730_v19 }
 0x11a   :  { %v757_v20 = vpop.f32.mrf.mxu2  ;;  %v731_v23 = vpop.f32.mrf.mxu0 }
 0x11b   :  { %v758_v21 = vadd.f32 %v757_v20, %v546_v13  ;;  %v771_v22 = vpop.f32.mrf.mxu3  ;;  %v732_v12 = vadd.f32 %v731_v23, %v520_v15  ;;  %v745_v25 = vpop.f32.mrf.mxu1 }
 0x11d   :  { %v4908_v14 = vadd.f32 %v771_v22, %v758_v21  ;;  %v4910_v26 = vadd.f32 %v745_v25, %v732_v12 }
 0x122   :  { %v759_v9 = vpop.f32.mrf.mxu2 }
 0x123   :  { %v760_v11 = vadd.f32 %v759_v9, %v548_v27  ;;  %v773_v28 = vpop.f32.mrf.mxu3 }
 0x125   :  { %v4912_v30 = vadd.f32 %v773_v28, %v760_v11 }
 0x126   :  { %4457 = dma.done.wait [#allocation7 + $0x2], 4096 }
 0x127   :  { %4458 = vsyncadd [#allocation7 + $0x2], 4294963200  ;;  %v3169_v46 = vld [vmem:[#allocation2 + $0x270] sm:$0xf]  ;;  %v4113_v42 = vld [vmem:[#allocation2 + $0x274] sm:$0xf0] }
 0x128   :  { %v3233_v44 = vld [vmem:[#allocation2 + $0x2f0] sm:$0xf]  ;;  %v3170_v47 = vor.u32 %v4113_v42, %v3169_v46  ;;  %v4129_v48 = vld [vmem:[#allocation2 + $0x2f4] sm:$0xf0]  ;;  %v4112_v51 = vld [vmem:[#allocation2 + $0x274] sm:$0xf] }
 0x129   :  { %v3171_v52 = vld [vmem:[#allocation2 + $0x278] sm:$0xf0]  ;;  %v3234_v53 = vor.u32 %v4129_v48, %v3233_v44  ;;  %v4128_v56 = vld [vmem:[#allocation2 + $0x2f4] sm:$0xf]  ;;  %v3161_v34 = vld [vmem:[#allocation2 + $0x260] sm:$0xf] }
 0x12a   :  { %v3174_v55 = vor.u32 %v4112_v51, %v3171_v52  ;;  %v3235_v40 = vld [vmem:[#allocation2 + $0x2f8] sm:$0xf0]  ;;  %986 = vmatpush.bf16.msra.mxu0 %v3170_v47  ;;  %v4111_v0 = vld [vmem:[#allocation2 + $0x264] sm:$0xf0]  ;;  %v3225_v2 = vld [vmem:[#allocation2 + $0x2e0] sm:$0xf] }
 0x12b   :  { %v3238_v8 = vor.u32 %v4128_v56, %v3235_v40  ;;  %v4127_v33 = vld [vmem:[#allocation2 + $0x2e4] sm:$0xf0]  ;;  %1000 = vmatpush.bf16.msra.mxu1 %v3234_v53  ;;  %v3162_v1 = vor.u32 %v4111_v0, %v3161_v34  ;;  %v4110_v38 = vld [vmem:[#allocation2 + $0x264] sm:$0xf]  ;;  %v3163_v39 = vld [vmem:[#allocation2 + $0x268] sm:$0xf0] }
 0x12c   :  { %1014 = vmatpush.bf16.msra.mxu2 %v3174_v55  ;;  %v3226_v36 = vor.u32 %v4127_v33, %v3225_v2  ;;  %v4126_v3 = vld [vmem:[#allocation2 + $0x2e4] sm:$0xf]  ;;  %v3166_v37 = vor.u32 %v4110_v38, %v3163_v39  ;;  %v3227_v43 = vld [vmem:[#allocation2 + $0x2e8] sm:$0xf0]  ;;  %v3153_v7 = vld [vmem:[#allocation2 + $0x250] sm:$0xf] }
 0x12d   :  { %1028 = vmatpush.bf16.msra.mxu3 %v3238_v8  ;;  %v4109_v29 = vld [vmem:[#allocation2 + $0x254] sm:$0xf0]  ;;  %v3230_v4 = vor.u32 %v4126_v3, %v3227_v43  ;;  %v3217_v6 = vld [vmem:[#allocation2 + $0x2d0] sm:$0xf]  ;;  %v4108_v41 = vld [vmem:[#allocation2 + $0x254] sm:$0xf] }
 0x12e   :  { %v4125_v54 = vld [vmem:[#allocation2 + $0x2d4] sm:$0xf0]  ;;  %987 = vmatpush.bf16.msra.mxu0 %v3162_v1  ;;  %v3154_v31 = vor.u32 %v4109_v29, %v3153_v7  ;;  %v3155_v5 = vld [vmem:[#allocation2 + $0x258] sm:$0xf0]  ;;  %v4124_v61 = vld [vmem:[#allocation2 + $0x2d4] sm:$0xf] }
 0x12f   :  { %v3219_v35 = vld [vmem:[#allocation2 + $0x2d8] sm:$0xf0]  ;;  %1001 = vmatpush.bf16.msra.mxu1 %v3226_v36  ;;  %v3218_v32 = vor.u32 %v4125_v54, %v3217_v6  ;;  %v3158_v63 = vor.u32 %v4108_v41, %v3155_v5  ;;  %v3145_v45 = vld [vmem:[#allocation2 + $0x240] sm:$0xf]  ;;  %v4107_v57 = vld [vmem:[#allocation2 + $0x244] sm:$0xf0] }
 0x130   :  { %1015 = vmatpush.bf16.msra.mxu2 %v3166_v37  ;;  %v3209_v62 = vld [vmem:[#allocation2 + $0x2c0] sm:$0xf]  ;;  %v3222_v24 = vor.u32 %v4124_v61, %v3219_v35  ;;  %v4123_v60 = vld [vmem:[#allocation2 + $0x2c4] sm:$0xf0]  ;;  %v4106_v10 = vld [vmem:[#allocation2 + $0x244] sm:$0xf]  ;;  %v3146_v59 = vor.u32 %v4107_v57, %v3145_v45 }
 0x131   :  { %1029 = vmatpush.bf16.msra.mxu3 %v3230_v4  ;;  %v3147_v49 = vld [vmem:[#allocation2 + $0x248] sm:$0xf0]  ;;  %v4122_v50 = vld [vmem:[#allocation2 + $0x2c4] sm:$0xf]  ;;  %v3210_v17 = vor.u32 %v4123_v60, %v3209_v62  ;;  %v3137_v16 = vld [vmem:[#allocation2 + $0x230] sm:$0xf] }
 0x132   :  { %v3211_v58 = vld [vmem:[#allocation2 + $0x2c8] sm:$0xf0]  ;;  %988 = vmatpush.bf16.msra.mxu0 %v3154_v31  ;;  %v3150_v19 = vor.u32 %v4106_v10, %v3147_v49  ;;  %v4105_v13 = vld [vmem:[#allocation2 + $0x234] sm:$0xf0]  ;;  %v3201_v15 = vld [vmem:[#allocation2 + $0x2b0] sm:$0xf] }
 0x133   :  { %1002 = vmatpush.bf16.msra.mxu1 %v3218_v32  ;;  %v3214_v20 = vor.u32 %v4122_v50, %v3211_v58  ;;  %v4121_v21 = vld [vmem:[#allocation2 + $0x2b4] sm:$0xf0]  ;;  %v4104_v22 = vld [vmem:[#allocation2 + $0x234] sm:$0xf]  ;;  %v3139_v23 = vld [vmem:[#allocation2 + $0x238] sm:$0xf0]  ;;  %v3138_v27 = vor.u32 %v4105_v13, %v3137_v16 }
 0x134   :  { %1016 = vmatpush.bf16.msra.mxu2 %v3158_v63  ;;  %v4120_v12 = vld [vmem:[#allocation2 + $0x2b4] sm:$0xf]  ;;  %v3203_v25 = vld [vmem:[#allocation2 + $0x2b8] sm:$0xf0]  ;;  %v3202_v9 = vor.u32 %v4121_v21, %v3201_v15  ;;  %v3142_v11 = vor.u32 %v4104_v22, %v3139_v23  ;;  %v3129_v28 = vld [vmem:[#allocation2 + $0x220] sm:$0xf] }
 0x135   :  { %1030 = vmatpush.bf16.msra.mxu3 %v3222_v24  ;;  %v4103_v46 = vld [vmem:[#allocation2 + $0x224] sm:$0xf0]  ;;  %v3193_v42 = vld [vmem:[#allocation2 + $0x2a0] sm:$0xf]  ;;  %v3206_v44 = vor.u32 %v4120_v12, %v3203_v25  ;;  %v4102_v48 = vld [vmem:[#allocation2 + $0x224] sm:$0xf] }
 0x136   :  { %989 = vmatpush.bf16.msra.mxu0 %v3146_v59  ;;  %v4119_v47 = vld [vmem:[#allocation2 + $0x2a4] sm:$0xf0]  ;;  %v3131_v51 = vld [vmem:[#allocation2 + $0x228] sm:$0xf0]  ;;  %v4118_v52 = vld [vmem:[#allocation2 + $0x2a4] sm:$0xf]  ;;  %v3130_v55 = vor.u32 %v4103_v46, %v3129_v28 }
 0x137   :  { %1003 = vmatpush.bf16.msra.mxu1 %v3210_v17  ;;  %v3195_v53 = vld [vmem:[#allocation2 + $0x2a8] sm:$0xf0]  ;;  %v3194_v56 = vor.u32 %v4119_v47, %v3193_v42  ;;  %v3134_v40 = vor.u32 %v4102_v48, %v3131_v51  ;;  %v3121_v34 = vld [vmem:[#allocation2 + $0x210] sm:$0xf]  ;;  %v4101_v8 = vld [vmem:[#allocation2 + $0x214] sm:$0xf0] }
 0x138   :  { %1017 = vmatpush.bf16.msra.mxu2 %v3150_v19  ;;  %v3185_v0 = vld [vmem:[#allocation2 + $0x290] sm:$0xf]  ;;  %v3198_v2 = vor.u32 %v4118_v52, %v3195_v53  ;;  %v4117_v33 = vld [vmem:[#allocation2 + $0x294] sm:$0xf0]  ;;  %v4100_v1 = vld [vmem:[#allocation2 + $0x214] sm:$0xf]  ;;  %v3122_v3 = vor.u32 %v4101_v8, %v3121_v34 }
 0x139   :  { %1031 = vmatpush.bf16.msra.mxu3 %v3214_v20  ;;  %v3123_v36 = vld [vmem:[#allocation2 + $0x218] sm:$0xf0]  ;;  %v4116_v38 = vld [vmem:[#allocation2 + $0x294] sm:$0xf]  ;;  %v3186_v37 = vor.u32 %v4117_v33, %v3185_v0  ;;  %v3113_v7 = vld [vmem:[#allocation2 + $0x200] sm:$0xf] }
 0x13a   :  { %990 = vmatpush.bf16.msra.mxu0 %v3138_v27  ;;  %v3187_v39 = vld [vmem:[#allocation2 + $0x298] sm:$0xf0]  ;;  %v3126_v43 = vor.u32 %v4100_v1, %v3123_v36  ;;  %v4099_v29 = vld [vmem:[#allocation2 + $0x204] sm:$0xf0]  ;;  %v3177_v4 = vld [vmem:[#allocation2 + $0x280] sm:$0xf] }
 0x13b   :  { %1004 = vmatpush.bf16.msra.mxu1 %v3202_v9  ;;  %v3190_v6 = vor.u32 %v4116_v38, %v3187_v39  ;;  %v4115_v54 = vld [vmem:[#allocation2 + $0x284] sm:$0xf0]  ;;  %v4098_v41 = vld [vmem:[#allocation2 + $0x204] sm:$0xf]  ;;  %v3115_v31 = vld [vmem:[#allocation2 + $0x208] sm:$0xf0]  ;;  %v3114_v57 = vor.u32 %v4099_v29, %v3113_v7 }
 0x13c   :  { %1018 = vmatpush.bf16.msra.mxu2 %v3142_v11  ;;  %v4114_v5 = vld [vmem:[#allocation2 + $0x284] sm:$0xf]  ;;  %v3179_v61 = vld [vmem:[#allocation2 + $0x288] sm:$0xf0]  ;;  %v3178_v60 = vor.u32 %v4115_v54, %v3177_v4  ;;  %v3118_v10 = vor.u32 %v4098_v41, %v3115_v31 }
 0x13d   :  { %1032 = vmatpush.bf16.msra.mxu3 %v3206_v44  ;;  %v5116_v35 = vld [vmem:[#allocation32_spill] sm:$0xff]  ;;  %v5117_v63 = vld [vmem:[#allocation35_spill] sm:$0xff]  ;;  %v3182_v49 = vor.u32 %v4114_v5, %v3179_v61 }
 0x13e   :  { %991 = vmatpush.bf16.msra.mxu0 %v3130_v55  ;;  %v818_v32 = vunpack.c.l.b16 %v5116_v35  ;;  %v820_v45 = vunpack.c.l.b16 %v5117_v63  ;;  %v819_v62 = vunpack.c.h.b16 %v5116_v35  ;;  %v821_v24 = vunpack.c.h.b16 %v5117_v63 }
 0x13f   :  { %1005 = vmatpush.bf16.msra.mxu1 %v3194_v56 }
 0x140   :  { %1019 = vmatpush.bf16.msra.mxu2 %v3134_v40  ;;  %v822_v50 = vpack.c.b16 %v820_v45, %v818_v32  ;;  %v823_v58 = vpack.c.b16 %v821_v24, %v819_v62 }
 0x141   :  { %1033 = vmatpush.bf16.msra.mxu3 %v3198_v2 }
 0x142   :  { %992 = vmatpush.bf16.msra.mxu0 %v3122_v3 }
 0x143   :  { %1006 = vmatpush.bf16.msra.mxu1 %v3186_v37 }
 0x144   :  { %1020 = vmatpush.bf16.msra.mxu2 %v3126_v43 }
 0x145   :  { %1034 = vmatpush.bf16.msra.mxu3 %v3190_v6 }
 0x146   :  { %993 = vmatpush.bf16.msra.mxu0 %v3114_v57 }
 0x147   :  { %1007 = vmatpush.bf16.msra.mxu1 %v3178_v60 }
 0x148   :  { %1021 = vmatpush.bf16.msra.mxu2 %v3118_v10 }
 0x149   :  { %1035 = vmatpush.bf16.msra.mxu3 %v3182_v49  ;;  %994 = vmatmul.bf16.vlgmr.msra.gmra.mxu0 %v822_v50 }
 0x14a   :  { %1008 = vmatmul.bf16.vlgmr.msra.gmra.mxu1 %v823_v58 }
 0x14b   :  { %1022 = vmatmul.bf16.vlgmr.msra.gmra.mxu2 %v822_v50 }
 0x14c   :  { %1036 = vmatmul.bf16.vlgmr.msra.gmra.mxu3 %v823_v58 }
 0x1c6   :  { %v995_v59 = vpop.f32.mrf.mxu0 }
 0x1c7   :  { %v1009_v17 = vpop.f32.mrf.mxu1 }
 0x1c8   :  { %v1010_v19 = vadd.f32 %v1009_v17, %v995_v59 }
 0x1ca   :  { %v4919_v16 = vadd.f32 %v1010_v19, %v4906_v18 }
 0x1ce   :  { %v1023_v13 = vpop.f32.mrf.mxu2  ;;  %v997_v20 = vpop.f32.mrf.mxu0 }
 0x1cf   :  { %v1037_v15 = vpop.f32.mrf.mxu3  ;;  %v1011_v22 = vpop.f32.mrf.mxu1 }
 0x1d0   :  { %v1038_v21 = vadd.f32 %v1037_v15, %v1023_v13  ;;  %v1012_v23 = vadd.f32 %v1011_v22, %v997_v20 }
 0x1d2   :  { %v4922_v12 = vadd.f32 %v1038_v21, %v4908_v14  ;;  %v4925_v25 = vadd.f32 %v1012_v23, %v4910_v26 }
 0x1d6   :  { %v1025_v27 = vpop.f32.mrf.mxu2 }
 0x1d7   :  { %v1039_v9 = vpop.f32.mrf.mxu3 }
 0x1d8   :  { %v1040_v11 = vadd.f32 %v1039_v9, %v1025_v27 }
 0x1da   :  { %v4928_v28 = vadd.f32 %v1040_v11, %v4912_v30 }
 0x1db   :  { %4459 = dma.done.wait [#allocation7 + $0x3], 4096 }
 0x1dc   :  { %4460 = vsyncadd [#allocation7 + $0x3], 4294963200  ;;  %v3297_v18 = vld [vmem:[#allocation2 + $0x370] sm:$0xf]  ;;  %v4145_v46 = vld [vmem:[#allocation2 + $0x374] sm:$0xf0] }
 0x1dd   :  { %v3361_v42 = vld [vmem:[#allocation2 + $0x3f0] sm:$0xf]  ;;  %v3298_v44 = vor.u32 %v4145_v46, %v3297_v18  ;;  %v4161_v47 = vld [vmem:[#allocation2 + $0x3f4] sm:$0xf0]  ;;  %v4144_v48 = vld [vmem:[#allocation2 + $0x374] sm:$0xf] }
 0x1de   :  { %v3299_v51 = vld [vmem:[#allocation2 + $0x378] sm:$0xf0]  ;;  %v3362_v14 = vor.u32 %v4161_v47, %v3361_v42  ;;  %v4160_v53 = vld [vmem:[#allocation2 + $0x3f4] sm:$0xf]  ;;  %v3289_v55 = vld [vmem:[#allocation2 + $0x360] sm:$0xf] }
 0x1df   :  { %v3302_v52 = vor.u32 %v4144_v48, %v3299_v51  ;;  %v3363_v26 = vld [vmem:[#allocation2 + $0x3f8] sm:$0xf0]  ;;  %1256 = vmatpush.bf16.msrb.mxu0 %v3298_v44  ;;  %v4143_v40 = vld [vmem:[#allocation2 + $0x364] sm:$0xf0]  ;;  %v3353_v34 = vld [vmem:[#allocation2 + $0x3e0] sm:$0xf] }
 0x1e0   :  { %v3366_v56 = vor.u32 %v4160_v53, %v3363_v26  ;;  %v4159_v30 = vld [vmem:[#allocation2 + $0x3e4] sm:$0xf0]  ;;  %1270 = vmatpush.bf16.msrb.mxu1 %v3362_v14  ;;  %v3290_v8 = vor.u32 %v4143_v40, %v3289_v55  ;;  %v4142_v2 = vld [vmem:[#allocation2 + $0x364] sm:$0xf]  ;;  %v3291_v33 = vld [vmem:[#allocation2 + $0x368] sm:$0xf0] }
 0x1e1   :  { %1284 = vmatpush.bf16.msrb.mxu2 %v3302_v52  ;;  %v3354_v0 = vor.u32 %v4159_v30, %v3353_v34  ;;  %v4158_v1 = vld [vmem:[#allocation2 + $0x3e4] sm:$0xf]  ;;  %v3294_v36 = vor.u32 %v4142_v2, %v3291_v33  ;;  %v3355_v38 = vld [vmem:[#allocation2 + $0x3e8] sm:$0xf0]  ;;  %v3281_v39 = vld [vmem:[#allocation2 + $0x350] sm:$0xf] }
 0x1e2   :  { %1298 = vmatpush.bf16.msrb.mxu3 %v3366_v56  ;;  %v4141_v3 = vld [vmem:[#allocation2 + $0x354] sm:$0xf0]  ;;  %v3358_v37 = vor.u32 %v4158_v1, %v3355_v38  ;;  %v3345_v43 = vld [vmem:[#allocation2 + $0x3d0] sm:$0xf]  ;;  %v4140_v29 = vld [vmem:[#allocation2 + $0x354] sm:$0xf] }
 0x1e3   :  { %v4157_v7 = vld [vmem:[#allocation2 + $0x3d4] sm:$0xf0]  ;;  %1257 = vmatpush.bf16.msrb.mxu0 %v3290_v8  ;;  %v3282_v4 = vor.u32 %v4141_v3, %v3281_v39  ;;  %v3283_v6 = vld [vmem:[#allocation2 + $0x358] sm:$0xf0]  ;;  %v4156_v54 = vld [vmem:[#allocation2 + $0x3d4] sm:$0xf] }
 0x1e4   :  { %v3347_v41 = vld [vmem:[#allocation2 + $0x3d8] sm:$0xf0]  ;;  %1271 = vmatpush.bf16.msrb.mxu1 %v3354_v0  ;;  %v3346_v31 = vor.u32 %v4157_v7, %v3345_v43  ;;  %v3286_v5 = vor.u32 %v4140_v29, %v3283_v6  ;;  %v3273_v61 = vld [vmem:[#allocation2 + $0x340] sm:$0xf]  ;;  %v4139_v35 = vld [vmem:[#allocation2 + $0x344] sm:$0xf0] }
 0x1e5   :  { %1285 = vmatpush.bf16.msrb.mxu2 %v3294_v36  ;;  %v3337_v32 = vld [vmem:[#allocation2 + $0x3c0] sm:$0xf]  ;;  %v3350_v63 = vor.u32 %v4156_v54, %v3347_v41  ;;  %v4155_v45 = vld [vmem:[#allocation2 + $0x3c4] sm:$0xf0]  ;;  %v4138_v57 = vld [vmem:[#allocation2 + $0x344] sm:$0xf]  ;;  %v3274_v10 = vor.u32 %v4139_v35, %v3273_v61 }
 0x1e6   :  { %1299 = vmatpush.bf16.msrb.mxu3 %v3358_v37  ;;  %v3275_v62 = vld [vmem:[#allocation2 + $0x348] sm:$0xf0]  ;;  %v4154_v24 = vld [vmem:[#allocation2 + $0x3c4] sm:$0xf]  ;;  %v3338_v49 = vor.u32 %v4155_v45, %v3337_v32  ;;  %v3265_v58 = vld [vmem:[#allocation2 + $0x330] sm:$0xf] }
 0x1e7   :  { %v3339_v60 = vld [vmem:[#allocation2 + $0x3c8] sm:$0xf0]  ;;  %1258 = vmatpush.bf16.msrb.mxu0 %v3282_v4  ;;  %v3278_v50 = vor.u32 %v4138_v57, %v3275_v62  ;;  %v4137_v59 = vld [vmem:[#allocation2 + $0x334] sm:$0xf0]  ;;  %v3329_v17 = vld [vmem:[#allocation2 + $0x3b0] sm:$0xf] }
 0x1e8   :  { %1272 = vmatpush.bf16.msrb.mxu1 %v3346_v31  ;;  %v3342_v19 = vor.u32 %v4154_v24, %v3339_v60  ;;  %v4153_v13 = vld [vmem:[#allocation2 + $0x3b4] sm:$0xf0]  ;;  %v4136_v15 = vld [vmem:[#allocation2 + $0x334] sm:$0xf]  ;;  %v3267_v20 = vld [vmem:[#allocation2 + $0x338] sm:$0xf0]  ;;  %v3266_v23 = vor.u32 %v4137_v59, %v3265_v58 }
 0x1e9   :  { %1286 = vmatpush.bf16.msrb.mxu2 %v3286_v5  ;;  %v4152_v21 = vld [vmem:[#allocation2 + $0x3b4] sm:$0xf]  ;;  %v3331_v22 = vld [vmem:[#allocation2 + $0x3b8] sm:$0xf0]  ;;  %v3330_v27 = vor.u32 %v4153_v13, %v3329_v17  ;;  %v3270_v9 = vor.u32 %v4136_v15, %v3267_v20  ;;  %v3257_v11 = vld [vmem:[#allocation2 + $0x320] sm:$0xf] }
 0x1ea   :  { %1300 = vmatpush.bf16.msrb.mxu3 %v3350_v63  ;;  %v4135_v18 = vld [vmem:[#allocation2 + $0x324] sm:$0xf0]  ;;  %v3321_v46 = vld [vmem:[#allocation2 + $0x3a0] sm:$0xf]  ;;  %v3334_v42 = vor.u32 %v4152_v21, %v3331_v22  ;;  %v4134_v47 = vld [vmem:[#allocation2 + $0x324] sm:$0xf] }
 0x1eb   :  { %1259 = vmatpush.bf16.msrb.mxu0 %v3274_v10  ;;  %v4151_v44 = vld [vmem:[#allocation2 + $0x3a4] sm:$0xf0]  ;;  %v3259_v48 = vld [vmem:[#allocation2 + $0x328] sm:$0xf0]  ;;  %v4150_v51 = vld [vmem:[#allocation2 + $0x3a4] sm:$0xf]  ;;  %v3258_v52 = vor.u32 %v4135_v18, %v3257_v11 }
 0x1ec   :  { %1273 = vmatpush.bf16.msrb.mxu1 %v3338_v49  ;;  %v3323_v14 = vld [vmem:[#allocation2 + $0x3a8] sm:$0xf0]  ;;  %v3322_v53 = vor.u32 %v4151_v44, %v3321_v46  ;;  %v3262_v26 = vor.u32 %v4134_v47, %v3259_v48  ;;  %v3249_v55 = vld [vmem:[#allocation2 + $0x310] sm:$0xf]  ;;  %v4133_v56 = vld [vmem:[#allocation2 + $0x314] sm:$0xf0] }
 0x1ed   :  { %1287 = vmatpush.bf16.msrb.mxu2 %v3278_v50  ;;  %v3313_v40 = vld [vmem:[#allocation2 + $0x390] sm:$0xf]  ;;  %v3326_v34 = vor.u32 %v4150_v51, %v3323_v14  ;;  %v4149_v30 = vld [vmem:[#allocation2 + $0x394] sm:$0xf0]  ;;  %v4132_v8 = vld [vmem:[#allocation2 + $0x314] sm:$0xf]  ;;  %v3250_v1 = vor.u32 %v4133_v56, %v3249_v55 }
 0x1ee   :  { %1301 = vmatpush.bf16.msrb.mxu3 %v3342_v19  ;;  %v3251_v0 = vld [vmem:[#allocation2 + $0x318] sm:$0xf0]  ;;  %v4148_v2 = vld [vmem:[#allocation2 + $0x394] sm:$0xf]  ;;  %v3314_v36 = vor.u32 %v4149_v30, %v3313_v40  ;;  %v3241_v39 = vld [vmem:[#allocation2 + $0x300] sm:$0xf] }
 0x1ef   :  { %1260 = vmatpush.bf16.msrb.mxu0 %v3266_v23  ;;  %v3315_v33 = vld [vmem:[#allocation2 + $0x398] sm:$0xf0]  ;;  %v3254_v38 = vor.u32 %v4132_v8, %v3251_v0  ;;  %v4131_v3 = vld [vmem:[#allocation2 + $0x304] sm:$0xf0]  ;;  %v3305_v37 = vld [vmem:[#allocation2 + $0x380] sm:$0xf] }
 0x1f0   :  { %1274 = vmatpush.bf16.msrb.mxu1 %v3330_v27  ;;  %v3318_v43 = vor.u32 %v4148_v2, %v3315_v33  ;;  %v4147_v7 = vld [vmem:[#allocation2 + $0x384] sm:$0xf0]  ;;  %v4130_v29 = vld [vmem:[#allocation2 + $0x304] sm:$0xf]  ;;  %v3243_v4 = vld [vmem:[#allocation2 + $0x308] sm:$0xf0]  ;;  %v3242_v35 = vor.u32 %v4131_v3, %v3241_v39 }
 0x1f1   :  { %1288 = vmatpush.bf16.msrb.mxu2 %v3270_v9  ;;  %v4146_v6 = vld [vmem:[#allocation2 + $0x384] sm:$0xf]  ;;  %v3307_v54 = vld [vmem:[#allocation2 + $0x388] sm:$0xf0]  ;;  %v5118_v41 = vld [vmem:[#allocation33_spill] sm:$0xff]  ;;  %v3306_v45 = vor.u32 %v4147_v7, %v3305_v37  ;;  %v3246_v57 = vor.u32 %v4130_v29, %v3243_v4 }
 0x1f2   :  { %1302 = vmatpush.bf16.msrb.mxu3 %v3334_v42  ;;  %v1088_v31 = vunpack.c.l.b16 %v5118_v41  ;;  %v5119_v5 = vld [vmem:[#allocation36_spill] sm:$0xff]  ;;  %v1089_v32 = vunpack.c.h.b16 %v5118_v41  ;;  %v3310_v62 = vor.u32 %v4146_v6, %v3307_v54  ;;  %v1316_v58 = vld [vmem:[%s5042_s6] sm:$0x3] }
 0x1f3   :  { %1261 = vmatpush.bf16.msrb.mxu0 %v3258_v52  ;;  %v1090_v61 = vunpack.c.l.b16 %v5119_v5  ;;  %v1091_v63 = vunpack.c.h.b16 %v5119_v5  ;;  %v1318_v19 = vperm.slane %v1316_v58, 0  ;;  %v1319_v18 = vperm.slane %v1316_v58, 1 }
 0x1f4   :  { %1275 = vmatpush.bf16.msrb.mxu1 %v3322_v53 }
 0x1f5   :  { %1289 = vmatpush.bf16.msrb.mxu2 %v3262_v26  ;;  %v1092_v24 = vpack.c.b16 %v1090_v61, %v1088_v31  ;;  %v1093_v60 = vpack.c.b16 %v1091_v63, %v1089_v32 }
 0x1f6   :  { %1303 = vmatpush.bf16.msrb.mxu3 %v3326_v34 }
 0x1f7   :  { %1262 = vmatpush.bf16.msrb.mxu0 %v3250_v1 }
 0x1f8   :  { %1276 = vmatpush.bf16.msrb.mxu1 %v3314_v36 }
 0x1f9   :  { %1290 = vmatpush.bf16.msrb.mxu2 %v3254_v38 }
 0x1fa   :  { %1304 = vmatpush.bf16.msrb.mxu3 %v3318_v43 }
 0x1fb   :  { %1263 = vmatpush.bf16.msrb.mxu0 %v3242_v35 }
 0x1fc   :  { %1277 = vmatpush.bf16.msrb.mxu1 %v3306_v45 }
 0x1fd   :  { %1291 = vmatpush.bf16.msrb.mxu2 %v3246_v57 }
 0x1fe   :  { %1305 = vmatpush.bf16.msrb.mxu3 %v3310_v62  ;;  %1264 = vmatmul.bf16.vlgmr.msrb.gmra.mxu0 %v1092_v24 }
 0x1ff   :  { %1278 = vmatmul.bf16.vlgmr.msrb.gmra.mxu1 %v1093_v60 }
 0x200   :  { %1292 = vmatmul.bf16.vlgmr.msrb.gmra.mxu2 %v1092_v24 }
 0x201   :  { %1306 = vmatmul.bf16.vlgmr.msrb.gmra.mxu3 %v1093_v60 }
 0x27b   :  { %v1265_v10 = vpop.f32.mrf.mxu0 }
 0x27c   :  { %v1279_v49 = vpop.f32.mrf.mxu1 }
 0x27d   :  { %v1280_v50 = vadd.f32 %v1279_v49, %v1265_v10 }
 0x27f   :  { %v1312_v17 = vadd.f32 %v1280_v50, %v4919_v16 }
 0x281   :  { %v1322_v23 = vadd.f32 %v1318_v19, %v1312_v17 }
 0x283   :  { %v1293_v59 = vpop.f32.mrf.mxu2  ;;  %v1267_v15 = vpop.f32.mrf.mxu0  ;;  %v1326_v42 = vmax.f32 %v1322_v23, 0.0 }
 0x284   :  { %v1307_v13 = vpop.f32.mrf.mxu3  ;;  %v1281_v20 = vpop.f32.mrf.mxu1 }
 0x285   :  { %v1282_v21 = vadd.f32 %v1281_v20, %v1267_v15  ;;  %v1308_v22 = vadd.f32 %v1307_v13, %v1293_v59 }
 0x287   :  { %v1314_v27 = vadd.f32 %v1282_v21, %v4925_v25  ;;  %v1313_v11 = vadd.f32 %v1308_v22, %v4922_v12 }
 0x289   :  { %v1324_v9 = vadd.f32 %v1318_v19, %v1314_v27  ;;  %v1323_v16 = vadd.f32 %v1319_v18, %v1313_v11 }
 0x28b   :  { %v1295_v46 = vpop.f32.mrf.mxu2  ;;  %v1328_v44 = vmax.f32 %v1324_v9, 0.0  ;;  %v1327_v53 = vmax.f32 %v1323_v16, 0.0 }
 0x28c   :  { %v1309_v47 = vpop.f32.mrf.mxu3 }
 0x28d   :  { %v1310_v48 = vadd.f32 %v1309_v47, %v1295_v46  ;;  %v1330_v51 = vpack.c.bf16 %v1328_v44, %v1326_v42 }
 0x28f   :  { %v1315_v14 = vadd.f32 %v1310_v48, %v4928_v28 }
 0x291   :  { %v1325_v52 = vadd.f32 %v1319_v18, %v1315_v14 }
 0x293   :  { %v1329_v26 = vmax.f32 %v1325_v52, 0.0 }
 0x295   :  { %v1331_v55 = vpack.c.bf16 %v1329_v26, %v1327_v53 }
 0x296   :  { %4461 = dma.done.wait [#allocation7 + $0x4], 2048 }
 0x297   :  { %4462 = vsyncadd [#allocation7 + $0x4], 4294965248  ;;  %v4169_v25 = vld [vmem:[#allocation3 + $0x48] sm:$0xff]  ;;  %v4176_v40 = vld [vmem:[#allocation3 + $0x78] sm:$0xff] }
 0x298   :  { %v4177_v56 = vld [vmem:[#allocation3 + $0x28] sm:$0xff]  ;;  %1472 = vmatpush.bf16.msra.mxu0 %v4169_v25  ;;  %v4175_v30 = vld [vmem:[#allocation3 + $0x70] sm:$0xff]  ;;  %v4174_v28 = vld [vmem:[#allocation3 + $0x60] sm:$0xff] }
 0x299   :  { %1486 = vmatpush.bf16.msra.mxu1 %v4177_v56  ;;  %v4168_v12 = vld [vmem:[#allocation3 + $0x8] sm:$0xff]  ;;  %v4166_v8 = vld [vmem:[#allocation3 + $0x50] sm:$0xff]  ;;  %v4165_v0 = vld [vmem:[#allocation3 + $0x18] sm:$0xff] }
 0x29a   :  { %v4167_v34 = vld [vmem:[#allocation3 + $0x68] sm:$0xff]  ;;  %v4173_v2 = vld [vmem:[#allocation3 + $0x38] sm:$0xff]  ;;  %v4172_v1 = vld [vmem:[#allocation3 + $0x10] sm:$0xff] }
 0x29b   :  { %v4164_v33 = vld [vmem:[#allocation3 + $0x58] sm:$0xff]  ;;  %v4163_v36 = vld [vmem:[#allocation3] sm:$0xff]  ;;  %v4162_v39 = vld [vmem:[#allocation3 + $0x30] sm:$0xff] }
 0x29c   :  { %1473 = vmatpush.bf16.msra.mxu0 %v4168_v12  ;;  %v4171_v38 = vld [vmem:[#allocation3 + $0x20] sm:$0xff] }
 0x29d   :  { %1487 = vmatpush.bf16.msra.mxu1 %v4176_v40  ;;  %v4170_v3 = vld [vmem:[#allocation3 + $0x40] sm:$0xff] }
 0x29e   :  { %v4331_v7 = vld [vmem:[%s5042_s6 + $0x2] ss:$0 sm:$0xff] }
 0x2a0   :  { %1474 = vmatpush.bf16.msra.mxu0 %v4167_v34 }
 0x2a1   :  { %1488 = vmatpush.bf16.msra.mxu1 %v4175_v30 }
 0x2a4   :  { %1475 = vmatpush.bf16.msra.mxu0 %v4166_v8 }
 0x2a5   :  { %1489 = vmatpush.bf16.msra.mxu1 %v4174_v28 }
 0x2a8   :  { %1476 = vmatpush.bf16.msra.mxu0 %v4165_v0 }
 0x2a9   :  { %1490 = vmatpush.bf16.msra.mxu1 %v4173_v2 }
 0x2ac   :  { %1477 = vmatpush.bf16.msra.mxu0 %v4164_v33 }
 0x2ad   :  { %1491 = vmatpush.bf16.msra.mxu1 %v4172_v1 }
 0x2b0   :  { %1478 = vmatpush.bf16.msra.mxu0 %v4163_v36 }
 0x2b1   :  { %1492 = vmatpush.bf16.msra.mxu1 %v4171_v38 }
 0x2b4   :  { %1479 = vmatpush.bf16.msra.mxu0 %v4162_v39 }
 0x2b5   :  { %1493 = vmatpush.bf16.msra.mxu1 %v4170_v3 }
 0x2b7   :  { %1480 = vmatmul.bf16.vlgmr.msra.gmra.mxu0 %v1330_v51 }
 0x2b8   :  { %1494 = vmatmul.bf16.vlgmr.msra.gmra.mxu1 %v1331_v55 }
 0x334   :  { %v1481_v37 = vpop.f32.mrf.mxu0 }
 0x335   :  { %v1495_v43 = vpop.f32.mrf.mxu1  ;;  %v1482_v29 = vadd.f32 %v4331_v7, %v1481_v37 }
 0x337   :  { %v1496_v6 = vadd.f32 %v1495_v43, %v1482_v29 }
 0x339   :  { %v1500_v5 = vmax.f32 %v1496_v6, 0.0 }
 0x33c   :  { %v1483_v4 = vpop.f32.mrf.mxu0 }
 0x33d   :  { %v1484_v54 = vadd.f32 %v4331_v7, %v1483_v4  ;;  %v1497_v41 = vpop.f32.mrf.mxu1 }
 0x33f   :  { %v1498_v31 = vadd.f32 %v1497_v41, %v1484_v54 }
 0x341   :  { %v1501_v61 = vmax.f32 %v1498_v31, 0.0 }
 0x343   :  { %v1502_v35 = vpack.c.bf16 %v1501_v61, %v1500_v5 }
 0x344   :  { %4463 = dma.done.wait [#allocation7 + $0x5], 1536 }
 0x345   :  { %4464 = vsyncadd [#allocation7 + $0x5], 4294965760  ;;  %v3469_v32 = vld [vmem:[#allocation4 + $0x48] sm:$0xf]  ;;  %v4188_v63 = vld [vmem:[#allocation4 + $0x50] sm:$0xf0] }
 0x346   :  { %v3457_v45 = vld [vmem:[#allocation4 + $0x30] sm:$0xf]  ;;  %v3470_v57 = vor.u32 %v4188_v63, %v3469_v32  ;;  %v4185_v62 = vld [vmem:[#allocation4 + $0x38] sm:$0xf0]  ;;  %v4187_v24 = vld [vmem:[#allocation4 + $0x4c] sm:$0xf] }
 0x347   :  { %v3471_v60 = vld [vmem:[#allocation4 + $0x54] sm:$0xf0]  ;;  %v3458_v10 = vor.u32 %v4185_v62, %v3457_v45  ;;  %v4184_v50 = vld [vmem:[#allocation4 + $0x34] sm:$0xf]  ;;  %v3459_v58 = vld [vmem:[#allocation4 + $0x3c] sm:$0xf0] }
 0x348   :  { %1607 = vmatpush.bf16.msra.mxu2 %v3470_v57  ;;  %v3474_v49 = vor.u32 %v4187_v24, %v3471_v60  ;;  %v3445_v59 = vld [vmem:[#allocation4 + $0x18] sm:$0xf]  ;;  %v4182_v17 = vld [vmem:[#allocation4 + $0x20] sm:$0xf0]  ;;  %v3462_v19 = vor.u32 %v4184_v50, %v3459_v58  ;;  %v4181_v13 = vld [vmem:[#allocation4 + $0x1c] sm:$0xf] }
 0x349   :  { %v3447_v15 = vld [vmem:[#allocation4 + $0x24] sm:$0xf0]  ;;  %v3446_v20 = vor.u32 %v4182_v17, %v3445_v59  ;;  %v3433_v21 = vld [vmem:[#allocation4] sm:$0xf]  ;;  %v4179_v22 = vld [vmem:[#allocation4 + $0x8] sm:$0xf0] }
 0x34a   :  { %1621 = vmatpush.bf16.msra.mxu3 %v3474_v49  ;;  %v3477_v23 = vld [vmem:[#allocation4 + $0x50] sm:$0xf]  ;;  %v4189_v27 = vld [vmem:[#allocation4 + $0x58] sm:$0xf0]  ;;  %v3450_v9 = vor.u32 %v4181_v13, %v3447_v15  ;;  %v4178_v11 = vld [vmem:[#allocation4 + $0x4] sm:$0xf]  ;;  %v3434_v46 = vor.u32 %v4179_v22, %v3433_v21 }
 0x34b   :  { %v3435_v18 = vld [vmem:[#allocation4 + $0xc] sm:$0xf0]  ;;  %v3478_v42 = vor.u32 %v4189_v27, %v3477_v23  ;;  %v3465_v44 = vld [vmem:[#allocation4 + $0x38] sm:$0xf]  ;;  %v4186_v47 = vld [vmem:[#allocation4 + $0x40] sm:$0xf0] }
 0x34c   :  { %1608 = vmatpush.bf16.msra.mxu2 %v3458_v10  ;;  %v3438_v48 = vor.u32 %v4178_v11, %v3435_v18  ;;  %vm1599_vm0 = vcmask 523264   ;;  %v3466_v51 = vor.u32 %v4186_v47, %v3465_v44  ;;  %v3453_v16 = vld [vmem:[#allocation4 + $0x20] sm:$0xf]  ;;  %v4183_v14 = vld [vmem:[#allocation4 + $0x28] sm:$0xf0] }
 0x34d   :  { %v3454_v52 = vor.u32 %v4183_v14, %v3453_v16  ;;  %v3441_v53 = vld [vmem:[#allocation4 + $0x8] sm:$0xf]  ;;  %v4180_v26 = vld [vmem:[#allocation4 + $0x10] sm:$0xf0]  ;;  %v1527_v25 = vld [vmem:[%s5042_s6 + $0x3] sm:$0x7] }
 0x34e   :  { %1622 = vmatpush.bf16.msra.mxu3 %v3462_v19  ;;  %v3442_v55 = vor.u32 %v4180_v26, %v3441_v53  ;;  %v1529_v40 = vperm.slane %v1527_v25, 0  ;;  %v1530_v34 = vperm.slane %v1527_v25, 1  ;;  %v1531_v7 = vperm.slane %v1527_v25, 2 }
 0x350   :  { %1609 = vmatpush.bf16.msra.mxu2 %v3446_v20 }
 0x352   :  { %1623 = vmatpush.bf16.msra.mxu3 %v3450_v9 }
 0x354   :  { %1610 = vmatpush.bf16.msra.mxu2 %v3434_v46 }
 0x356   :  { %1624 = vmatpush.bf16.msra.mxu3 %v3438_v48 }
 0x357   :  { %3479 = vmatmul.msk.bf16.vlgmr.msra.gmra.mxu2 %vm1599_vm0, %v1502_v35 }
 0x358   :  { %1635 = vmatpush.bf16.msrb.mxu2 %v3478_v42 }
 0x359   :  { %3480 = vmatmul.msk.bf16.vlgmr.msra.gmra.mxu3 %vm1599_vm0, %v1502_v35 }
 0x35c   :  { %1636 = vmatpush.bf16.msrb.mxu2 %v3466_v51 }
 0x360   :  { %1637 = vmatpush.bf16.msrb.mxu2 %v3454_v52 }
 0x364   :  { %1638 = vmatpush.bf16.msrb.mxu2 %v3442_v55 }
 0x367   :  { %3481 = vmatmul.msk.bf16.vlgmr.msrb.gmra.mxu2 %vm1599_vm0, %v1502_v35 }
 0x3da   :  { %v1612_v56 = vpop.f32.mrf.mxu2 }
 0x3db   :  { %v1613_v30 = vadd.f32 %v1612_v56, %v1529_v40 }
 0x3dc   :  { %v1626_v12 = vpop.f32.mrf.mxu3 }
 0x3dd   :  { %v1627_v8 = vadd.f32 %v1626_v12, %v1530_v34  ;;  %v1645_v33 = vmax.f32 %v1613_v30, 0.0 }
 0x3df   :  { %v1646_v36 = vmax.f32 %v1627_v8, 0.0 }
 0x3e2   :  { %v1614_v28 = vpop.f32.mrf.mxu2 }
 0x3e3   :  { %v1615_v0 = vadd.f32 %v1614_v28, %v1529_v40 }
 0x3e4   :  { %v1628_v2 = vpop.f32.mrf.mxu3 }
 0x3e5   :  { %v1648_v1 = vmax.f32 %v1615_v0, 0.0  ;;  %v1629_v38 = vadd.f32 %v1628_v2, %v1530_v34 }
 0x3e7   :  { %v1651_v39 = vpack.c.bf16 %v1648_v1, %v1645_v33  ;;  %v1649_v3 = vmax.f32 %v1629_v38, 0.0 }
 0x3e9   :  { %v4947_v37 = vpack.c.bf16 %v1649_v3, %v1646_v36 }
 0x3ea   :  { %v1640_v43 = vpop.f32.mrf.mxu2 }
 0x3eb   :  { %v1641_v29 = vadd.f32 %v1640_v43, %v1531_v7 }
 0x3ed   :  { %v1647_v54 = vmax.f32 %v1641_v29, 0.0 }
 0x3f2   :  { %v1642_v4 = vpop.f32.mrf.mxu2 }
 0x3f3   :  { %v1643_v6 = vadd.f32 %v1642_v4, %v1531_v7 }
 0x3f5   :  { %v1650_v41 = vmax.f32 %v1643_v6, 0.0 }
 0x3f7   :  { %v4949_v31 = vpack.c.bf16 %v1650_v41, %v1647_v54 }
 0x3f8   :  { %4465 = dma.done.wait [#allocation7 + $0x6], 1024 }
 0x3f9   :  { %4466 = vsyncadd [#allocation7 + $0x6], 4294966272  ;;  %v4197_v5 = vld [vmem:[#allocation5 + $0x30] sm:$0xff]  ;;  %v4196_v61 = vld [vmem:[#allocation5 + $0x38] sm:$0xff] }
 0x3fa   :  { %1730 = vmatpush.bf16.msrb.mxu3 %v4197_v5  ;;  %v4195_v35 = vld [vmem:[#allocation5 + $0x8] sm:$0xff]  ;;  %v4194_v32 = vld [vmem:[#allocation5 + $0x18] sm:$0xff]  ;;  %v4193_v63 = vld [vmem:[#allocation5 + $0x20] sm:$0xff] }
 0x3fb   :  { %v4192_v45 = vld [vmem:[#allocation5 + $0x10] sm:$0xff]  ;;  %v4191_v57 = vld [vmem:[#allocation5] sm:$0xff]  ;;  %v4190_v62 = vld [vmem:[#allocation5 + $0x28] sm:$0xff] }
 0x3fc   :  { %v4332_v24 = vld [vmem:[%s5042_s6 + $0x6] ss:$0 sm:$0xff] }
 0x3fe   :  { %1731 = vmatpush.bf16.msrb.mxu3 %v4196_v61 }
 0x402   :  { %1732 = vmatpush.bf16.msrb.mxu3 %v4195_v35 }
 0x406   :  { %1733 = vmatpush.bf16.msrb.mxu3 %v4194_v32 }
 0x40a   :  { %1734 = vmatpush.bf16.msrb.mxu3 %v4193_v63 }
 0x40e   :  { %1735 = vmatpush.bf16.msrb.mxu3 %v4192_v45 }
 0x412   :  { %1736 = vmatpush.bf16.msrb.mxu3 %v4191_v57 }
 0x416   :  { %1737 = vmatpush.bf16.msrb.mxu3 %v4190_v62 }
 0x419   :  { %1738 = vmatmul.bf16.vlgmr.msrb.gmra.mxu3 %v1651_v39 }
 0x49c   :  { %v1739_v60 = vpop.f32.mrf.mxu3 }
 0x49d   :  { %v1740_v10 = vadd.f32 %v4332_v24, %v1739_v60 }
 0x49f   :  { %1744 = vst [vmem:[%s5044_s8] sm:$0xff] %v1740_v10 }
 0x4a4   :  { %v1741_v49 = vpop.f32.mrf.mxu3 }
 0x4a5   :  { %v1742_v50 = vadd.f32 %v4332_v24, %v1741_v49 }
 0x4a7   :  { %1745 = vst [vmem:[%s5044_s8 + $0x8] sm:$0xff] %v1742_v50 }
 0x4a8   :  { %4467 = dma.done.wait [#allocation7 + $0x7], 16384 }
 0x4a9   :  { %4468 = vsyncadd [#allocation7 + $0x7], 4294950912  ;;  %v3740_v58 = vld [vmem:[#allocation6 + $0x1c0] sm:$0xf]  ;;  %v4254_v15 = vld [vmem:[#allocation6 + $0x1c4] sm:$0xf] }
 0x4aa   :  { %v4258_v59 = vld [vmem:[#allocation6 + $0x1dc] sm:$0xf0]  ;;  %v3742_v20 = vld [vmem:[#allocation6 + $0x1e0] sm:$0xf0] }
 0x4ab   :  { %v3996_v17 = vld [vmem:[#allocation6 + $0x3c0] sm:$0xf]  ;;  %v3741_v19 = vor.u32 %v4258_v59, %v3740_v58  ;;  %v3745_v22 = vor.u32 %v4254_v15, %v3742_v20  ;;  %v4318_v23 = vld [vmem:[#allocation6 + $0x3c4] sm:$0xf] }
 0x4ac   :  { %v4322_v13 = vld [vmem:[#allocation6 + $0x3dc] sm:$0xf0]  ;;  %v3998_v27 = vld [vmem:[#allocation6 + $0x3e0] sm:$0xf0] }
 0x4ad   :  { %v3997_v21 = vor.u32 %v4322_v13, %v3996_v17  ;;  %v3708_v9 = vld [vmem:[#allocation6 + $0x180] sm:$0xf]  ;;  %2540 = vmatpush.bf16.msrb.mxu0 %v3741_v19  ;;  %v4001_v11 = vor.u32 %v4318_v23, %v3998_v27  ;;  %2568 = vmatpush.bf16.msra.mxu2 %v3745_v22  ;;  %v4246_v48 = vld [vmem:[#allocation6 + $0x184] sm:$0xf] }
 0x4ae   :  { %v4250_v18 = vld [vmem:[#allocation6 + $0x19c] sm:$0xf0]  ;;  %v3710_v51 = vld [vmem:[#allocation6 + $0x1a0] sm:$0xf0] }
 0x4af   :  { %v3964_v46 = vld [vmem:[#allocation6 + $0x380] sm:$0xf]  ;;  %2554 = vmatpush.bf16.msrb.mxu1 %v3997_v21  ;;  %v3709_v44 = vor.u32 %v4250_v18, %v3708_v9  ;;  %v4310_v16 = vld [vmem:[#allocation6 + $0x384] sm:$0xf]  ;;  %2582 = vmatpush.bf16.msra.mxu3 %v4001_v11  ;;  %v3713_v14 = vor.u32 %v4246_v48, %v3710_v51 }
 0x4b0   :  { %v4314_v42 = vld [vmem:[#allocation6 + $0x39c] sm:$0xf0]  ;;  %v3966_v52 = vld [vmem:[#allocation6 + $0x3a0] sm:$0xf0] }
 0x4b1   :  { %v3965_v47 = vor.u32 %v4314_v42, %v3964_v46  ;;  %v3676_v53 = vld [vmem:[#allocation6 + $0x140] sm:$0xf]  ;;  %v3969_v55 = vor.u32 %v4310_v16, %v3966_v52  ;;  %v4238_v12 = vld [vmem:[#allocation6 + $0x144] sm:$0xf]  ;;  %2541 = vmatpush.bf16.msrb.mxu0 %v3709_v44  ;;  %2569 = vmatpush.bf16.msra.mxu2 %v3713_v14 }
 0x4b2   :  { %v4242_v26 = vld [vmem:[#allocation6 + $0x15c] sm:$0xf0]  ;;  %v3678_v34 = vld [vmem:[#allocation6 + $0x160] sm:$0xf0] }
 0x4b3   :  { %v3932_v25 = vld [vmem:[#allocation6 + $0x340] sm:$0xf]  ;;  %v3677_v40 = vor.u32 %v4242_v26, %v3676_v53  ;;  %v4302_v30 = vld [vmem:[#allocation6 + $0x344] sm:$0xf]  ;;  %2555 = vmatpush.bf16.msrb.mxu1 %v3965_v47  ;;  %v3681_v0 = vor.u32 %v4238_v12, %v3678_v34  ;;  %2583 = vmatpush.bf16.msra.mxu3 %v3969_v55  ;;  %v3748_v34 = vld [vmem:[#allocation6 + $0x1c8] sm:$0xf] }
 0x4b4   :  { %v4306_v56 = vld [vmem:[#allocation6 + $0x35c] sm:$0xf0]  ;;  %v3934_v8 = vld [vmem:[#allocation6 + $0x360] sm:$0xf0] }
 0x4b5   :  { %v3933_v28 = vor.u32 %v4306_v56, %v3932_v25  ;;  %v3644_v2 = vld [vmem:[#allocation6 + $0x100] sm:$0xf]  ;;  %v3937_v36 = vor.u32 %v4302_v30, %v3934_v8  ;;  %v4230_v39 = vld [vmem:[#allocation6 + $0x104] sm:$0xf]  ;;  %2542 = vmatpush.bf16.msrb.mxu0 %v3677_v40  ;;  %2570 = vmatpush.bf16.msra.mxu2 %v3681_v0  ;;  %v4259_v30 = vld [vmem:[#allocation6 + $0x1e4] sm:$0xf0] }
 0x4b6   :  { %v4234_v33 = vld [vmem:[#allocation6 + $0x11c] sm:$0xf0]  ;;  %v3646_v3 = vld [vmem:[#allocation6 + $0x120] sm:$0xf0]  ;;  %v4004_v8 = vld [vmem:[#allocation6 + $0x3c8] sm:$0xf] }
 0x4b7   :  { %v3900_v1 = vld [vmem:[#allocation6 + $0x300] sm:$0xf]  ;;  %v4294_v43 = vld [vmem:[#allocation6 + $0x304] sm:$0xf]  ;;  %v3645_v29 = vor.u32 %v4234_v33, %v3644_v2  ;;  %2556 = vmatpush.bf16.msrb.mxu1 %v3933_v28  ;;  %v3649_v6 = vor.u32 %v4230_v39, %v3646_v3  ;;  %2584 = vmatpush.bf16.msra.mxu3 %v3937_v36  ;;  %v4323_v0 = vld [vmem:[#allocation6 + $0x3e4] sm:$0xf0] }
 0x4b8   :  { %v4298_v38 = vld [vmem:[#allocation6 + $0x31c] sm:$0xf0]  ;;  %v3902_v7 = vld [vmem:[#allocation6 + $0x320] sm:$0xf0]  ;;  %v4255_v2 = vld [vmem:[#allocation6 + $0x1cc] sm:$0xf] }
 0x4b9   :  { %v3901_v4 = vor.u32 %v4298_v38, %v3900_v1  ;;  %v3612_v54 = vld [vmem:[#allocation6 + $0xc0] sm:$0xf]  ;;  %v3905_v61 = vor.u32 %v4294_v43, %v3902_v7  ;;  %v4222_v32 = vld [vmem:[#allocation6 + $0xc4] sm:$0xf]  ;;  %2543 = vmatpush.bf16.msrb.mxu0 %v3645_v29  ;;  %2571 = vmatpush.bf16.msra.mxu2 %v3649_v6  ;;  %v3750_v33 = vld [vmem:[#allocation6 + $0x1e8] sm:$0xf0]  ;;  %v3749_v43 = vor.u32 %v4259_v30, %v3748_v34 }
 0x4ba   :  { %v4226_v41 = vld [vmem:[#allocation6 + $0xdc] sm:$0xf0]  ;;  %v3614_v63 = vld [vmem:[#allocation6 + $0xe0] sm:$0xf0]  ;;  %v4319_v38 = vld [vmem:[#allocation6 + $0x3cc] sm:$0xf]  ;;  %v4005_v7 = vor.u32 %v4323_v0, %v4004_v8  ;;  %v3753_v29 = vor.u32 %v4255_v2, %v3750_v33 }
 0x4bb   :  { %v3868_v5 = vld [vmem:[#allocation6 + $0x2c0] sm:$0xf]  ;;  %v4286_v45 = vld [vmem:[#allocation6 + $0x2c4] sm:$0xf]  ;;  %v3613_v62 = vor.u32 %v4226_v41, %v3612_v54  ;;  %2557 = vmatpush.bf16.msrb.mxu1 %v3901_v4  ;;  %v3617_v60 = vor.u32 %v4222_v32, %v3614_v63  ;;  %2585 = vmatpush.bf16.msra.mxu3 %v3905_v61  ;;  %v4006_v39 = vld [vmem:[#allocation6 + $0x3e8] sm:$0xf0] }
 0x4bc   :  { %v4290_v35 = vld [vmem:[#allocation6 + $0x2dc] sm:$0xf0]  ;;  %v3870_v57 = vld [vmem:[#allocation6 + $0x2e0] sm:$0xf0]  ;;  %v3716_v4 = vld [vmem:[#allocation6 + $0x188] sm:$0xf]  ;;  %v4009_v41 = vor.u32 %v4319_v38, %v4006_v39 }
 0x4bd   :  { %v3869_v24 = vor.u32 %v4290_v35, %v3868_v5  ;;  %v3580_v10 = vld [vmem:[#allocation6 + $0x80] sm:$0xf]  ;;  %v3873_v58 = vor.u32 %v4286_v45, %v3870_v57  ;;  %v4214_v17 = vld [vmem:[#allocation6 + $0x84] sm:$0xf]  ;;  %2544 = vmatpush.bf16.msrb.mxu0 %v3613_v62  ;;  %2572 = vmatpush.bf16.msra.mxu2 %v3617_v60  ;;  %v4251_v6 = vld [vmem:[#allocation6 + $0x1a4] sm:$0xf0] }
 0x4be   :  { %v4218_v49 = vld [vmem:[#allocation6 + $0x9c] sm:$0xf0]  ;;  %v3582_v19 = vld [vmem:[#allocation6 + $0xa0] sm:$0xf0]  ;;  %v3972_v54 = vld [vmem:[#allocation6 + $0x388] sm:$0xf]  ;;  %v3717_v45 = vor.u32 %v4251_v6, %v3716_v4 }
 0x4bf   :  { %v3836_v50 = vld [vmem:[#allocation6 + $0x280] sm:$0xf]  ;;  %v4278_v13 = vld [vmem:[#allocation6 + $0x284] sm:$0xf]  ;;  %v3581_v20 = vor.u32 %v4218_v49, %v3580_v10  ;;  %2558 = vmatpush.bf16.msrb.mxu1 %v3869_v24  ;;  %v3585_v22 = vor.u32 %v4214_v17, %v3582_v19  ;;  %2586 = vmatpush.bf16.msra.mxu3 %v3873_v58  ;;  %v4315_v5 = vld [vmem:[#allocation6 + $0x3a4] sm:$0xf0] }
 0x4c0   :  { %v4282_v59 = vld [vmem:[#allocation6 + $0x29c] sm:$0xf0]  ;;  %v3838_v15 = vld [vmem:[#allocation6 + $0x2a0] sm:$0xf0]  ;;  %v4247_v61 = vld [vmem:[#allocation6 + $0x18c] sm:$0xf]  ;;  %v3973_v57 = vor.u32 %v4315_v5, %v3972_v54 }
 0x4c1   :  { %v3837_v21 = vor.u32 %v4282_v59, %v3836_v50  ;;  %v3548_v23 = vld [vmem:[#allocation6 + $0x40] sm:$0xf]  ;;  %v3841_v11 = vor.u32 %v4278_v13, %v3838_v15  ;;  %v4206_v46 = vld [vmem:[#allocation6 + $0x44] sm:$0xf]  ;;  %2545 = vmatpush.bf16.msrb.mxu0 %v3581_v20  ;;  %2573 = vmatpush.bf16.msra.mxu2 %v3585_v22  ;;  %v3718_v35 = vld [vmem:[#allocation6 + $0x1a8] sm:$0xf0] }
 0x4c2   :  { %v4210_v27 = vld [vmem:[#allocation6 + $0x5c] sm:$0xf0]  ;;  %v3550_v42 = vld [vmem:[#allocation6 + $0x60] sm:$0xf0]  ;;  %v4311_v32 = vld [vmem:[#allocation6 + $0x38c] sm:$0xf]  ;;  %v3721_v62 = vor.u32 %v4247_v61, %v3718_v35 }
 0x4c3   :  { %v3804_v9 = vld [vmem:[#allocation6 + $0x240] sm:$0xf]  ;;  %v4270_v44 = vld [vmem:[#allocation6 + $0x244] sm:$0xf]  ;;  %v3549_v48 = vor.u32 %v4210_v27, %v3548_v23  ;;  %2559 = vmatpush.bf16.msrb.mxu1 %v3837_v21  ;;  %v3553_v52 = vor.u32 %v4206_v46, %v3550_v42  ;;  %2587 = vmatpush.bf16.msra.mxu3 %v3841_v11  ;;  %v3974_v63 = vld [vmem:[#allocation6 + $0x3a8] sm:$0xf0] }
 0x4c4   :  { %v4274_v18 = vld [vmem:[#allocation6 + $0x25c] sm:$0xf0]  ;;  %v3806_v47 = vld [vmem:[#allocation6 + $0x260] sm:$0xf0]  ;;  %v3684_v24 = vld [vmem:[#allocation6 + $0x148] sm:$0xf]  ;;  %v3977_v49 = vor.u32 %v4311_v32, %v3974_v63 }
 0x4c5   :  { %v3516_v51 = vld [vmem:[#allocation6] sm:$0xf]  ;;  %v3805_v14 = vor.u32 %v4274_v18, %v3804_v9  ;;  %v4198_v55 = vld [vmem:[#allocation6 + $0x4] sm:$0xf]  ;;  %v3809_v25 = vor.u32 %v4270_v44, %v3806_v47  ;;  %2546 = vmatpush.bf16.msrb.mxu0 %v3549_v48  ;;  %2574 = vmatpush.bf16.msra.mxu2 %v3553_v52  ;;  %v4243_v60 = vld [vmem:[#allocation6 + $0x164] sm:$0xf0] }
 0x4c6   :  { %v4202_v16 = vld [vmem:[#allocation6 + $0x1c] sm:$0xf0]  ;;  %v3518_v56 = vld [vmem:[#allocation6 + $0x20] sm:$0xf0]  ;;  %v3940_v10 = vld [vmem:[#allocation6 + $0x348] sm:$0xf]  ;;  %v3685_v13 = vor.u32 %v4243_v60, %v3684_v24 }
 0x4c7   :  { %v3772_v53 = vld [vmem:[#allocation6 + $0x200] sm:$0xf]  ;;  %v4262_v12 = vld [vmem:[#allocation6 + $0x204] sm:$0xf]  ;;  %v3517_v28 = vor.u32 %v4202_v16, %v3516_v51  ;;  %2560 = vmatpush.bf16.msrb.mxu1 %v3805_v14  ;;  %v3521_v36 = vor.u32 %v4198_v55, %v3518_v56  ;;  %2588 = vmatpush.bf16.msra.mxu3 %v3809_v25  ;;  %v4307_v50 = vld [vmem:[#allocation6 + $0x364] sm:$0xf0] }
 0x4c8   :  { %v4266_v26 = vld [vmem:[#allocation6 + $0x21c] sm:$0xf0]  ;;  %v3774_v40 = vld [vmem:[#allocation6 + $0x220] sm:$0xf0]  ;;  %v4239_v58 = vld [vmem:[#allocation6 + $0x14c] sm:$0xf]  ;;  %v3941_v15 = vor.u32 %v4307_v50, %v3940_v10 }
 0x4c9   :  { %v3773_v1 = vor.u32 %v4266_v26, %v3772_v53  ;;  %v3777_v3 = vor.u32 %v4262_v12, %v3774_v40  ;;  %2547 = vmatpush.bf16.msrb.mxu0 %v3517_v28  ;;  %2575 = vmatpush.bf16.msra.mxu2 %v3521_v36  ;;  %v3686_v59 = vld [vmem:[#allocation6 + $0x168] sm:$0xf0]  ;;  %v3652_v21 = vld [vmem:[#allocation6 + $0x108] sm:$0xf] }
 0x4ca   :  { %v4303_v17 = vld [vmem:[#allocation6 + $0x34c] sm:$0xf]  ;;  %v3689_v20 = vor.u32 %v4239_v58, %v3686_v59  ;;  %v4235_v22 = vld [vmem:[#allocation6 + $0x124] sm:$0xf0] }
 0x4cb   :  { %2561 = vmatpush.bf16.msrb.mxu1 %v3773_v1  ;;  %2589 = vmatpush.bf16.msra.mxu3 %v3777_v3  ;;  %v3942_v19 = vld [vmem:[#allocation6 + $0x368] sm:$0xf0]  ;;  %v3908_v23 = vld [vmem:[#allocation6 + $0x308] sm:$0xf]  ;;  %v3653_v44 = vor.u32 %v4235_v22, %v3652_v21  ;;  %v4256_v21 = vld [vmem:[#allocation6 + $0x1d4] sm:$0xf] }
 0x4cc   :  { %2576 = vmatmul.bf16.vlgmr.msra.gmra.mxu2 %v4947_v37  ;;  %2548 = vmatmul.bf16.vlgmr.msrb.gmra.mxu0 %v4947_v37  ;;  %v3945_v27 = vor.u32 %v4303_v17, %v3942_v19  ;;  %v4299_v9 = vld [vmem:[#allocation6 + $0x324] sm:$0xf0]  ;;  %v4231_v11 = vld [vmem:[#allocation6 + $0x10c] sm:$0xf]  ;;  %v3756_v17 = vld [vmem:[#allocation6 + $0x1d0] sm:$0xf] }
 0x4cd   :  { %2596 = vmatpush.bf16.msra.mxu0 %v3749_v43  ;;  %2624 = vmatpush.bf16.msrb.mxu2 %v3753_v29  ;;  %v3654_v18 = vld [vmem:[#allocation6 + $0x128] sm:$0xf0]  ;;  %v3909_v47 = vor.u32 %v4299_v9, %v3908_v23  ;;  %v3620_v51 = vld [vmem:[#allocation6 + $0xc8] sm:$0xf]  ;;  %v4260_v19 = vld [vmem:[#allocation6 + $0x1ec] sm:$0xf0] }
 0x4ce   :  { %2590 = vmatmul.bf16.vlgmr.msra.gmra.mxu3 %v4949_v31  ;;  %2562 = vmatmul.bf16.vlgmr.msrb.gmra.mxu1 %v4949_v31  ;;  %v4295_v46 = vld [vmem:[#allocation6 + $0x30c] sm:$0xf]  ;;  %v3657_v48 = vor.u32 %v4231_v11, %v3654_v18  ;;  %v4227_v16 = vld [vmem:[#allocation6 + $0xe4] sm:$0xf0]  ;;  %v3758_v22 = vld [vmem:[#allocation6 + $0x1f0] sm:$0xf0] }
 0x4cf   :  { %2610 = vmatpush.bf16.msra.mxu1 %v4005_v7  ;;  %2638 = vmatpush.bf16.msrb.mxu3 %v4009_v41  ;;  %v3910_v42 = vld [vmem:[#allocation6 + $0x328] sm:$0xf0]  ;;  %v3876_v14 = vld [vmem:[#allocation6 + $0x2c8] sm:$0xf]  ;;  %v3621_v12 = vor.u32 %v4227_v16, %v3620_v51  ;;  %v4320_v9 = vld [vmem:[#allocation6 + $0x3d4] sm:$0xf] }
 0x4d0   :  { %v3913_v52 = vor.u32 %v4295_v46, %v3910_v42  ;;  %v4291_v53 = vld [vmem:[#allocation6 + $0x2e4] sm:$0xf0]  ;;  %v4223_v26 = vld [vmem:[#allocation6 + $0xcc] sm:$0xf]  ;;  %v4014_v11 = vld [vmem:[#allocation6 + $0x3f0] sm:$0xf0]  ;;  %v3757_v46 = vor.u32 %v4260_v19, %v3756_v17 }
 0x4d1   :  { %2597 = vmatpush.bf16.msra.mxu0 %v3717_v45  ;;  %2625 = vmatpush.bf16.msrb.mxu2 %v3721_v62  ;;  %v3622_v55 = vld [vmem:[#allocation6 + $0xe8] sm:$0xf0]  ;;  %v3877_v40 = vor.u32 %v4291_v53, %v3876_v14  ;;  %v3588_v30 = vld [vmem:[#allocation6 + $0x88] sm:$0xf]  ;;  %v3980_v51 = vld [vmem:[#allocation6 + $0x390] sm:$0xf]  ;;  %v4017_v16 = vor.u32 %v4320_v9, %v4014_v11 }
 0x4d2   :  { %v4287_v25 = vld [vmem:[#allocation6 + $0x2cc] sm:$0xf]  ;;  %v3625_v34 = vor.u32 %v4223_v26, %v3622_v55  ;;  %v4219_v8 = vld [vmem:[#allocation6 + $0xa4] sm:$0xf0]  ;;  %v4316_v14 = vld [vmem:[#allocation6 + $0x3ac] sm:$0xf0] }
 0x4d3   :  { %2611 = vmatpush.bf16.msra.mxu1 %v3973_v57  ;;  %2639 = vmatpush.bf16.msrb.mxu3 %v3977_v49  ;;  %v3878_v56 = vld [vmem:[#allocation6 + $0x2e8] sm:$0xf0]  ;;  %v3844_v28 = vld [vmem:[#allocation6 + $0x288] sm:$0xf]  ;;  %v3589_v39 = vor.u32 %v4219_v8, %v3588_v30  ;;  %v3726_v53 = vld [vmem:[#allocation6 + $0x1b0] sm:$0xf0] }
 0x4d4   :  { %v3881_v0 = vor.u32 %v4287_v25, %v3878_v56  ;;  %v4283_v2 = vld [vmem:[#allocation6 + $0x2a4] sm:$0xf0]  ;;  %v4215_v33 = vld [vmem:[#allocation6 + $0x8c] sm:$0xf]  ;;  %v4312_v26 = vld [vmem:[#allocation6 + $0x394] sm:$0xf]  ;;  %v3981_v56 = vor.u32 %v4316_v14, %v3980_v51 }
 0x4d5   :  { %2598 = vmatpush.bf16.msra.mxu0 %v3685_v13  ;;  %2626 = vmatpush.bf16.msrb.mxu2 %v3689_v20  ;;  %v3590_v1 = vld [vmem:[#allocation6 + $0xa8] sm:$0xf0]  ;;  %v3845_v3 = vor.u32 %v4283_v2, %v3844_v28  ;;  %v3556_v7 = vld [vmem:[#allocation6 + $0x48] sm:$0xf]  ;;  %v4012_v13 = vld [vmem:[#allocation6 + $0x3d0] sm:$0xf] }
 0x4d6   :  { %v4279_v36 = vld [vmem:[#allocation6 + $0x28c] sm:$0xf]  ;;  %v3593_v43 = vor.u32 %v4215_v33, %v3590_v1  ;;  %v4211_v29 = vld [vmem:[#allocation6 + $0x64] sm:$0xf0]  ;;  %v4324_v20 = vld [vmem:[#allocation6 + $0x3ec] sm:$0xf0] }
 0x4d7   :  { %2612 = vmatpush.bf16.msra.mxu1 %v3941_v15  ;;  %2640 = vmatpush.bf16.msrb.mxu3 %v3945_v27  ;;  %v3846_v38 = vld [vmem:[#allocation6 + $0x2a8] sm:$0xf0]  ;;  %v3812_v4 = vld [vmem:[#allocation6 + $0x248] sm:$0xf]  ;;  %v3557_v32 = vor.u32 %v4211_v29, %v3556_v7  ;;  %v4013_v42 = vor.u32 %v4324_v20, %v4012_v13  ;;  %v3982_v55 = vld [vmem:[#allocation6 + $0x3b0] sm:$0xf0] }
 0x4d8   :  { %v3849_v6 = vor.u32 %v4279_v36, %v3846_v38  ;;  %v4275_v54 = vld [vmem:[#allocation6 + $0x264] sm:$0xf0]  ;;  %v4207_v41 = vld [vmem:[#allocation6 + $0x4c] sm:$0xf]  ;;  %v3948_v30 = vld [vmem:[#allocation6 + $0x350] sm:$0xf]  ;;  %v3985_v8 = vor.u32 %v4312_v26, %v3982_v55 }
 0x4d9   :  { %2599 = vmatpush.bf16.msra.mxu0 %v3653_v44  ;;  %2627 = vmatpush.bf16.msrb.mxu2 %v3657_v48  ;;  %v3558_v5 = vld [vmem:[#allocation6 + $0x68] sm:$0xf0]  ;;  %v3524_v63 = vld [vmem:[#allocation6 + $0x8] sm:$0xf]  ;;  %v3813_v57 = vor.u32 %v4275_v54, %v3812_v4  ;;  %v3761_v44 = vor.u32 %v4256_v21, %v3758_v22  ;;  %v4252_v48 = vld [vmem:[#allocation6 + $0x1ac] sm:$0xf0] }
 0x4da   :  { %v4271_v61 = vld [vmem:[#allocation6 + $0x24c] sm:$0xf]  ;;  %v4203_v45 = vld [vmem:[#allocation6 + $0x24] sm:$0xf0]  ;;  %v3561_v62 = vor.u32 %v4207_v41, %v3558_v5  ;;  %v4308_v28 = vld [vmem:[#allocation6 + $0x36c] sm:$0xf0] }
 0x4db   :  { %2613 = vmatpush.bf16.msra.mxu1 %v3909_v47  ;;  %2641 = vmatpush.bf16.msrb.mxu3 %v3913_v52  ;;  %v3814_v35 = vld [vmem:[#allocation6 + $0x268] sm:$0xf0]  ;;  %v3780_v24 = vld [vmem:[#allocation6 + $0x208] sm:$0xf]  ;;  %v3525_v15 = vor.u32 %v4203_v45, %v3524_v63  ;;  %v3724_v47 = vld [vmem:[#allocation6 + $0x190] sm:$0xf]  ;;  %v3949_v38 = vor.u32 %v4308_v28, %v3948_v30 }
 0x4dc   :  { %v4267_v60 = vld [vmem:[#allocation6 + $0x224] sm:$0xf0]  ;;  %v4199_v10 = vld [vmem:[#allocation6 + $0xc] sm:$0xf]  ;;  %v3817_v49 = vor.u32 %v4271_v61, %v3814_v35  ;;  %v4248_v52 = vld [vmem:[#allocation6 + $0x194] sm:$0xf]  ;;  %v3725_v25 = vor.u32 %v4252_v48, %v3724_v47 }
 0x4dd   :  { %2600 = vmatpush.bf16.msra.mxu0 %v3621_v12  ;;  %2628 = vmatpush.bf16.msrb.mxu2 %v3625_v34  ;;  %v3526_v50 = vld [vmem:[#allocation6 + $0x28] sm:$0xf0]  ;;  %v3781_v23 = vor.u32 %v4267_v60, %v3780_v24  ;;  %v3729_v12 = vor.u32 %v4248_v52, %v3726_v53  ;;  %v4244_v34 = vld [vmem:[#allocation6 + $0x16c] sm:$0xf0]  ;;  %v3694_v2 = vld [vmem:[#allocation6 + $0x170] sm:$0xf0] }
 0x4de   :  { %v4263_v58 = vld [vmem:[#allocation6 + $0x20c] sm:$0xf]  ;;  %v3529_v27 = vor.u32 %v4199_v10, %v3526_v50  ;;  %v4304_v33 = vld [vmem:[#allocation6 + $0x354] sm:$0xf]  ;;  %v3916_v7 = vld [vmem:[#allocation6 + $0x310] sm:$0xf] }
 0x4df   :  { %2614 = vmatpush.bf16.msra.mxu1 %v3877_v40  ;;  %2642 = vmatpush.bf16.msrb.mxu3 %v3881_v0  ;;  %v3782_v59 = vld [vmem:[#allocation6 + $0x228] sm:$0xf0]  ;;  %v3692_v40 = vld [vmem:[#allocation6 + $0x150] sm:$0xf]  ;;  %v4240_v0 = vld [vmem:[#allocation6 + $0x154] sm:$0xf] }
 0x4e0   :  { %v3785_v18 = vor.u32 %v4263_v58, %v3782_v59  ;;  %v3950_v1 = vld [vmem:[#allocation6 + $0x370] sm:$0xf0]  ;;  %v3693_v36 = vor.u32 %v4244_v34, %v3692_v40  ;;  %v4300_v4 = vld [vmem:[#allocation6 + $0x32c] sm:$0xf0] }
 0x4e1   :  { %2601 = vmatpush.bf16.msra.mxu0 %v3589_v39  ;;  %2629 = vmatpush.bf16.msrb.mxu2 %v3593_v43  ;;  %v3697_v39 = vor.u32 %v4240_v0, %v3694_v2  ;;  %v4236_v43 = vld [vmem:[#allocation6 + $0x12c] sm:$0xf0]  ;;  %v3953_v29 = vor.u32 %v4304_v33, %v3950_v1  ;;  %v3662_v54 = vld [vmem:[#allocation6 + $0x130] sm:$0xf0]  ;;  %v3917_v35 = vor.u32 %v4300_v4, %v3916_v7  ;;  %v3764_v33 = vld [vmem:[#allocation6 + $0x1d8] sm:$0xf] }
 0x4e2   :  { %v4296_v41 = vld [vmem:[#allocation6 + $0x314] sm:$0xf]  ;;  %v3628_v63 = vld [vmem:[#allocation6 + $0xd0] sm:$0xf]  ;;  %v4261_v1 = vld [vmem:[#allocation6 + $0x1f4] sm:$0xf0] }
 0x4e3   :  { %2615 = vmatpush.bf16.msra.mxu1 %v3845_v3  ;;  %2643 = vmatpush.bf16.msrb.mxu3 %v3849_v6  ;;  %v3660_v3 = vld [vmem:[#allocation6 + $0x110] sm:$0xf]  ;;  %v4232_v6 = vld [vmem:[#allocation6 + $0x114] sm:$0xf]  ;;  %v4321_v4 = vld [vmem:[#allocation6 + $0x3dc] sm:$0xf] }
 0x4e4   :  { %v3918_v5 = vld [vmem:[#allocation6 + $0x330] sm:$0xf0]  ;;  %v3661_v61 = vor.u32 %v4236_v43, %v3660_v3  ;;  %v4228_v45 = vld [vmem:[#allocation6 + $0xec] sm:$0xf0]  ;;  %v4257_v3 = vld [vmem:[#allocation6 + $0x1dc] sm:$0xf] }
 0x4e5   :  { %2602 = vmatpush.bf16.msra.mxu0 %v3557_v32  ;;  %2630 = vmatpush.bf16.msrb.mxu2 %v3561_v62  ;;  %v3665_v32 = vor.u32 %v4232_v6, %v3662_v54  ;;  %v3921_v62 = vor.u32 %v4296_v41, %v3918_v5  ;;  %v4292_v24 = vld [vmem:[#allocation6 + $0x2ec] sm:$0xf0]  ;;  %v4224_v60 = vld [vmem:[#allocation6 + $0xd4] sm:$0xf]  ;;  %v3629_v58 = vor.u32 %v4228_v45, %v3628_v63  ;;  %v3766_v43 = vld [vmem:[#allocation6 + $0x1f8] sm:$0xf0] }
 0x4e6   :  { %v3630_v10 = vld [vmem:[#allocation6 + $0xf0] sm:$0xf0]  ;;  %v3596_v19 = vld [vmem:[#allocation6 + $0x90] sm:$0xf]  ;;  %v4022_v6 = vld [vmem:[#allocation6 + $0x3f8] sm:$0xf0]  ;;  %v3765_v41 = vor.u32 %v4261_v1, %v3764_v33 }
 0x4e7   :  { %2616 = vmatpush.bf16.msra.mxu1 %v3813_v57  ;;  %2644 = vmatpush.bf16.msrb.mxu3 %v3817_v49  ;;  %v3884_v57 = vld [vmem:[#allocation6 + $0x2d0] sm:$0xf]  ;;  %v4288_v49 = vld [vmem:[#allocation6 + $0x2d4] sm:$0xf]  ;;  %v3633_v17 = vor.u32 %v4224_v60, %v3630_v10  ;;  %v3988_v63 = vld [vmem:[#allocation6 + $0x398] sm:$0xf]  ;;  %v4025_v45 = vor.u32 %v4321_v4, %v4022_v6 }
 0x4e8   :  { %v3886_v50 = vld [vmem:[#allocation6 + $0x2f0] sm:$0xf0]  ;;  %v3885_v59 = vor.u32 %v4292_v24, %v3884_v57  ;;  %v4220_v13 = vld [vmem:[#allocation6 + $0xac] sm:$0xf0]  ;;  %v4317_v57 = vld [vmem:[#allocation6 + $0x3b4] sm:$0xf0] }
 0x4e9   :  { %2603 = vmatpush.bf16.msra.mxu0 %v3525_v15  ;;  %2631 = vmatpush.bf16.msrb.mxu2 %v3529_v27  ;;  %v3852_v15 = vld [vmem:[#allocation6 + $0x290] sm:$0xf]  ;;  %v3889_v20 = vor.u32 %v4288_v49, %v3886_v50  ;;  %v4216_v22 = vld [vmem:[#allocation6 + $0x94] sm:$0xf]  ;;  %v3597_v11 = vor.u32 %v4220_v13, %v3596_v19  ;;  %v3734_v24 = vld [vmem:[#allocation6 + $0x1b8] sm:$0xf0]  ;;  %v3989_v50 = vor.u32 %v4317_v57, %v3988_v63 }
 0x4ea   :  { %v4284_v21 = vld [vmem:[#allocation6 + $0x2ac] sm:$0xf0]  ;;  %v4280_v27 = vld [vmem:[#allocation6 + $0x294] sm:$0xf]  ;;  %v4313_v60 = vld [vmem:[#allocation6 + $0x39c] sm:$0xf] }
 0x4eb   :  { %2617 = vmatpush.bf16.msra.mxu1 %v3781_v23  ;;  %2645 = vmatpush.bf16.msrb.mxu3 %v3785_v18  ;;  %v3598_v23 = vld [vmem:[#allocation6 + $0xb0] sm:$0xf0]  ;;  %v3853_v18 = vor.u32 %v4284_v21, %v3852_v15  ;;  %v3820_v47 = vld [vmem:[#allocation6 + $0x250] sm:$0xf]  ;;  %v3990_v10 = vld [vmem:[#allocation6 + $0x3b8] sm:$0xf0] }
 0x4ec   :  { %2632 = vmatmul.bf16.vlgmr.msrb.gmra.mxu2 %v4947_v37  ;;  %2604 = vmatmul.bf16.vlgmr.msra.gmra.mxu0 %v4947_v37  ;;  %v3854_v9 = vld [vmem:[#allocation6 + $0x2b0] sm:$0xf0]  ;;  %v4276_v51 = vld [vmem:[#allocation6 + $0x26c] sm:$0xf0]  ;;  %v3956_v19 = vld [vmem:[#allocation6 + $0x358] sm:$0xf]  ;;  %v3993_v13 = vor.u32 %v4313_v60, %v3990_v10 }
 0x4ed   :  { %2652 = vmatpush.bf16.msrb.mxu0 %v3757_v46  ;;  %2680 = vmatpush.bf16.msra.mxu2 %v3761_v44  ;;  %v3601_v46 = vor.u32 %v4216_v22, %v3598_v23  ;;  %v4212_v44 = vld [vmem:[#allocation6 + $0x6c] sm:$0xf0]  ;;  %v3857_v48 = vor.u32 %v4280_v27, %v3854_v9  ;;  %v3566_v14 = vld [vmem:[#allocation6 + $0x70] sm:$0xf0]  ;;  %v4309_v15 = vld [vmem:[#allocation6 + $0x374] sm:$0xf0] }
 0x4ee   :  { %2646 = vmatmul.bf16.vlgmr.msrb.gmra.mxu3 %v4949_v31  ;;  %2618 = vmatmul.bf16.vlgmr.msra.gmra.mxu1 %v4949_v31  ;;  %v4272_v52 = vld [vmem:[#allocation6 + $0x254] sm:$0xf]  ;;  %v3532_v55 = vld [vmem:[#allocation6 + $0x10] sm:$0xf]  ;;  %v3702_v21 = vld [vmem:[#allocation6 + $0x178] sm:$0xf0]  ;;  %v3957_v9 = vor.u32 %v4309_v15, %v3956_v19 }
 0x4ef   :  { %2666 = vmatpush.bf16.msrb.mxu1 %v4013_v42  ;;  %2694 = vmatpush.bf16.msra.mxu3 %v4017_v16  ;;  %v3564_v42 = vld [vmem:[#allocation6 + $0x50] sm:$0xf]  ;;  %v4208_v16 = vld [vmem:[#allocation6 + $0x54] sm:$0xf]  ;;  %v4305_v22 = vld [vmem:[#allocation6 + $0x35c] sm:$0xf] }
 0x4f0   :  { %v3822_v53 = vld [vmem:[#allocation6 + $0x270] sm:$0xf0]  ;;  %v3565_v26 = vor.u32 %v4212_v44, %v3564_v42  ;;  %v3788_v40 = vld [vmem:[#allocation6 + $0x210] sm:$0xf]  ;;  %v3958_v23 = vld [vmem:[#allocation6 + $0x378] sm:$0xf0] }
 0x4f1   :  { %2653 = vmatpush.bf16.msrb.mxu0 %v3725_v25  ;;  %2681 = vmatpush.bf16.msra.mxu2 %v3729_v12  ;;  %v4204_v25 = vld [vmem:[#allocation6 + $0x2c] sm:$0xf0]  ;;  %v3569_v12 = vor.u32 %v4208_v16, %v3566_v14  ;;  %v4200_v30 = vld [vmem:[#allocation6 + $0x14] sm:$0xf]  ;;  %v3924_v42 = vld [vmem:[#allocation6 + $0x318] sm:$0xf]  ;;  %v3961_v44 = vor.u32 %v4305_v22, %v3958_v23 }
 0x4f2   :  { %v4268_v34 = vld [vmem:[#allocation6 + $0x22c] sm:$0xf0]  ;;  %v3534_v28 = vld [vmem:[#allocation6 + $0x30] sm:$0xf0]  ;;  %v4297_v16 = vld [vmem:[#allocation6 + $0x31c] sm:$0xf] }
 0x4f3   :  { %2667 = vmatpush.bf16.msrb.mxu1 %v3981_v56  ;;  %2695 = vmatpush.bf16.msra.mxu3 %v3985_v8  ;;  %v3821_v56 = vor.u32 %v4276_v51, %v3820_v47  ;;  %v3825_v8 = vor.u32 %v4272_v52, %v3822_v53  ;;  %v4264_v0 = vld [vmem:[#allocation6 + $0x214] sm:$0xf]  ;;  %v3789_v7 = vor.u32 %v4268_v34, %v3788_v40  ;;  %v4301_v47 = vld [vmem:[#allocation6 + $0x334] sm:$0xf0]  ;;  %v3670_v51 = vld [vmem:[#allocation6 + $0x138] sm:$0xf0] }
 0x4f4   :  { %v3790_v2 = vld [vmem:[#allocation6 + $0x230] sm:$0xf0]  ;;  %v3926_v14 = vld [vmem:[#allocation6 + $0x338] sm:$0xf0]  ;;  %v3925_v53 = vor.u32 %v4301_v47, %v3924_v42  ;;  %v4293_v40 = vld [vmem:[#allocation6 + $0x2f4] sm:$0xf0] }
 0x4f5   :  { %2654 = vmatpush.bf16.msrb.mxu0 %v3693_v36  ;;  %2682 = vmatpush.bf16.msra.mxu2 %v3697_v39  ;;  %v4020_v36 = vld [vmem:[#allocation6 + $0x3d8] sm:$0xf]  ;;  %v3793_v54 = vor.u32 %v4264_v0, %v3790_v2  ;;  %v4225_v34 = vld [vmem:[#allocation6 + $0xdc] sm:$0xf] }
 0x4f6   :  { %v4325_v39 = vld [vmem:[#allocation6 + $0x3f4] sm:$0xf0]  ;;  %v3862_v4 = vld [vmem:[#allocation6 + $0x2b8] sm:$0xf0] }
 0x4f7   :  { %2668 = vmatpush.bf16.msrb.mxu1 %v3949_v38  ;;  %2696 = vmatpush.bf16.msra.mxu3 %v3953_v29  ;;  %v3533_v38 = vor.u32 %v4204_v25, %v3532_v55  ;;  %v3537_v29 = vor.u32 %v4200_v30, %v3534_v28  ;;  %v4021_v5 = vor.u32 %v4325_v39, %v4020_v36  ;;  %v3636_v55 = vld [vmem:[#allocation6 + $0xd8] sm:$0xf]  ;;  %v3638_v30 = vld [vmem:[#allocation6 + $0xf8] sm:$0xf0] }
 0x4f8   :  { %v4229_v25 = vld [vmem:[#allocation6 + $0xf4] sm:$0xf0]  ;;  %v3894_v28 = vld [vmem:[#allocation6 + $0x2f8] sm:$0xf0]  ;;  %v3641_v33 = vor.u32 %v4225_v34, %v3638_v30 }
 0x4f9   :  { %2655 = vmatpush.bf16.msrb.mxu0 %v3661_v61  ;;  %2683 = vmatpush.bf16.msra.mxu2 %v3665_v32  ;;  %v3769_v61 = vor.u32 %v4257_v3, %v3766_v43  ;;  %v4253_v32 = vld [vmem:[#allocation6 + $0x1b4] sm:$0xf0]  ;;  %v3637_v0 = vor.u32 %v4229_v25, %v3636_v55  ;;  %v4217_v43 = vld [vmem:[#allocation6 + $0x9c] sm:$0xf] }
 0x4fa   :  { %v3604_v1 = vld [vmem:[#allocation6 + $0x98] sm:$0xf]  ;;  %v3574_v57 = vld [vmem:[#allocation6 + $0x78] sm:$0xf0] }
 0x4fb   :  { %2669 = vmatpush.bf16.msrb.mxu1 %v3917_v35  ;;  %2697 = vmatpush.bf16.msra.mxu3 %v3921_v62  ;;  %v3732_v35 = vld [vmem:[#allocation6 + $0x198] sm:$0xf]  ;;  %v4249_v62 = vld [vmem:[#allocation6 + $0x19c] sm:$0xf] }
 0x4fc   :  { %v3733_v49 = vor.u32 %v4253_v32, %v3732_v35  ;;  %v4221_v36 = vld [vmem:[#allocation6 + $0xb4] sm:$0xf0]  ;;  %v3542_v15 = vld [vmem:[#allocation6 + $0x38] sm:$0xf0] }
 0x4fd   :  { %2656 = vmatpush.bf16.msrb.mxu0 %v3629_v58  ;;  %2684 = vmatpush.bf16.msra.mxu2 %v3633_v17  ;;  %v3737_v58 = vor.u32 %v4249_v62, %v3734_v24  ;;  %v4245_v17 = vld [vmem:[#allocation6 + $0x174] sm:$0xf0]  ;;  %v3605_v6 = vor.u32 %v4221_v36, %v3604_v1  ;;  %v4273_v62 = vld [vmem:[#allocation6 + $0x25c] sm:$0xf] }
 0x4fe   :  { %v4285_v3 = vld [vmem:[#allocation6 + $0x2b4] sm:$0xf0]  ;;  %v3830_v24 = vld [vmem:[#allocation6 + $0x278] sm:$0xf0] }
 0x4ff   :  { %2670 = vmatpush.bf16.msrb.mxu1 %v3885_v59  ;;  %2698 = vmatpush.bf16.msra.mxu3 %v3889_v20  ;;  %v3700_v59 = vld [vmem:[#allocation6 + $0x158] sm:$0xf]  ;;  %v4241_v20 = vld [vmem:[#allocation6 + $0x15c] sm:$0xf] }
 0x500   :  { %v3701_v27 = vor.u32 %v4245_v17, %v3700_v59  ;;  %v3828_v35 = vld [vmem:[#allocation6 + $0x258] sm:$0xf]  ;;  %v3833_v17 = vor.u32 %v4273_v62, %v3830_v24 }
 0x501   :  { %2657 = vmatpush.bf16.msrb.mxu0 %v3597_v11  ;;  %2685 = vmatpush.bf16.msra.mxu2 %v3601_v46  ;;  %v3705_v11 = vor.u32 %v4241_v20, %v3702_v21  ;;  %v4237_v46 = vld [vmem:[#allocation6 + $0x134] sm:$0xf0]  ;;  %v4265_v20 = vld [vmem:[#allocation6 + $0x21c] sm:$0xf] }
 0x502   :  { %v4277_v63 = vld [vmem:[#allocation6 + $0x274] sm:$0xf0]  ;;  %v3798_v21 = vld [vmem:[#allocation6 + $0x238] sm:$0xf0] }
 0x503   :  { %2671 = vmatpush.bf16.msrb.mxu1 %v3853_v18  ;;  %2699 = vmatpush.bf16.msra.mxu3 %v3857_v48  ;;  %v3668_v18 = vld [vmem:[#allocation6 + $0x118] sm:$0xf]  ;;  %v4233_v48 = vld [vmem:[#allocation6 + $0x11c] sm:$0xf]  ;;  %v3829_v10 = vor.u32 %v4277_v63, %v3828_v35 }
 0x504   :  { %v3669_v52 = vor.u32 %v4237_v46, %v3668_v18  ;;  %v3796_v59 = vld [vmem:[#allocation6 + $0x218] sm:$0xf] }
 0x505   :  { %2658 = vmatpush.bf16.msrb.mxu0 %v3565_v26  ;;  %2686 = vmatpush.bf16.msra.mxu2 %v3569_v12  ;;  %v3673_v26 = vor.u32 %v4233_v48, %v3670_v51  ;;  %v3929_v12 = vor.u32 %v4297_v16, %v3926_v14  ;;  %v4269_v19 = vld [vmem:[#allocation6 + $0x234] sm:$0xf0] }
 0x506   :  { %v3797_v23 = vor.u32 %v4269_v19, %v3796_v59 }
 0x507   :  { %2672 = vmatpush.bf16.msrb.mxu1 %v3821_v56  ;;  %2700 = vmatpush.bf16.msra.mxu3 %v3825_v8  ;;  %v3892_v56 = vld [vmem:[#allocation6 + $0x2d8] sm:$0xf]  ;;  %v4289_v8 = vld [vmem:[#allocation6 + $0x2dc] sm:$0xf] }
 0x508   :  { %v3893_v2 = vor.u32 %v4293_v40, %v3892_v56  ;;  %v3897_v39 = vor.u32 %v4289_v8, %v3894_v28 }
 0x509   :  { %2659 = vmatpush.bf16.msrb.mxu0 %v3533_v38  ;;  %2687 = vmatpush.bf16.msra.mxu2 %v3537_v29  ;;  %v3860_v38 = vld [vmem:[#allocation6 + $0x298] sm:$0xf]  ;;  %v4281_v29 = vld [vmem:[#allocation6 + $0x29c] sm:$0xf] }
 0x50a   :  { %v3865_v32 = vor.u32 %v4281_v29, %v3862_v4 }
 0x50b   :  { %2673 = vmatpush.bf16.msrb.mxu1 %v3789_v7  ;;  %2701 = vmatpush.bf16.msra.mxu3 %v3793_v54  ;;  %v3606_v7 = vld [vmem:[#allocation6 + $0xb8] sm:$0xf0]  ;;  %v3861_v54 = vor.u32 %v4285_v3, %v3860_v38 }
 0x50c   :  { %2688 = vmatmul.bf16.vlgmr.msra.gmra.mxu2 %v4947_v37  ;;  %2660 = vmatmul.bf16.vlgmr.msrb.gmra.mxu0 %v4947_v37 }
 0x50d   :  { %2708 = vmatpush.bf16.msra.mxu0 %v3765_v41  ;;  %2736 = vmatpush.bf16.msrb.mxu2 %v3769_v61  ;;  %v3609_v41 = vor.u32 %v4217_v43, %v3606_v7  ;;  %v4213_v61 = vld [vmem:[#allocation6 + $0x74] sm:$0xf0] }
 0x50e   :  { %2702 = vmatmul.bf16.vlgmr.msra.gmra.mxu3 %v4949_v31  ;;  %2674 = vmatmul.bf16.vlgmr.msrb.gmra.mxu1 %v4949_v31 }
 0x50f   :  { %2722 = vmatpush.bf16.msra.mxu1 %v4021_v5  ;;  %2750 = vmatpush.bf16.msrb.mxu3 %v4025_v45  ;;  %v3572_v5 = vld [vmem:[#allocation6 + $0x58] sm:$0xf]  ;;  %v4209_v45 = vld [vmem:[#allocation6 + $0x5c] sm:$0xf] }
 0x510   :  { %v3573_v60 = vor.u32 %v4213_v61, %v3572_v5 }
 0x511   :  { %2709 = vmatpush.bf16.msra.mxu0 %v3733_v49  ;;  %2737 = vmatpush.bf16.msrb.mxu2 %v3737_v58  ;;  %v3577_v49 = vor.u32 %v4209_v45, %v3574_v57  ;;  %v4205_v58 = vld [vmem:[#allocation6 + $0x34] sm:$0xf0] }
 0x513   :  { %2723 = vmatpush.bf16.msra.mxu1 %v3989_v50  ;;  %2751 = vmatpush.bf16.msrb.mxu3 %v3993_v13  ;;  %v3540_v50 = vld [vmem:[#allocation6 + $0x18] sm:$0xf]  ;;  %v4201_v13 = vld [vmem:[#allocation6 + $0x1c] sm:$0xf] }
 0x514   :  { %v3541_v22 = vor.u32 %v4205_v58, %v3540_v50 }
 0x515   :  { %2710 = vmatpush.bf16.msra.mxu0 %v3701_v27  ;;  %2738 = vmatpush.bf16.msrb.mxu2 %v3705_v11  ;;  %v3545_v27 = vor.u32 %v4201_v13, %v3542_v15  ;;  %v4979_v11 = vld [vmem:[%s5042_s6 + $0x7] sm:$0xff] }
 0x516   :  { %v1884_v18 = vperm.slane %v4979_v11, 0  ;;  %v1885_v47 = vperm.slane %v4979_v11, 1  ;;  %v1886_v40 = vperm.slane %v4979_v11, 2  ;;  %v1887_v28 = vperm.slane %v4979_v11, 3 }
 0x517   :  { %2724 = vmatpush.bf16.msra.mxu1 %v3957_v9  ;;  %2752 = vmatpush.bf16.msrb.mxu3 %v3961_v44  ;;  %v3801_v9 = vor.u32 %v4265_v20, %v3798_v21  ;;  %v1889_v35 = vperm.slane %v4979_v11, 5  ;;  %v1890_v19 = vperm.slane %v4979_v11, 6 }
 0x519   :  { %2711 = vmatpush.bf16.msra.mxu0 %v3669_v52  ;;  %2739 = vmatpush.bf16.msrb.mxu2 %v3673_v26 }
 0x51b   :  { %2725 = vmatpush.bf16.msra.mxu1 %v3925_v53  ;;  %2753 = vmatpush.bf16.msrb.mxu3 %v3929_v12 }
 0x51d   :  { %2712 = vmatpush.bf16.msra.mxu0 %v3637_v0  ;;  %2740 = vmatpush.bf16.msrb.mxu2 %v3641_v33 }
 0x51f   :  { %2726 = vmatpush.bf16.msra.mxu1 %v3893_v2  ;;  %2754 = vmatpush.bf16.msrb.mxu3 %v3897_v39 }
 0x521   :  { %2713 = vmatpush.bf16.msra.mxu0 %v3605_v6  ;;  %2741 = vmatpush.bf16.msrb.mxu2 %v3609_v41 }
 0x523   :  { %2727 = vmatpush.bf16.msra.mxu1 %v3861_v54  ;;  %2755 = vmatpush.bf16.msrb.mxu3 %v3865_v32  ;;  %v1888_v54 = vperm.slane %v4979_v11, 4 }
 0x525   :  { %2714 = vmatpush.bf16.msra.mxu0 %v3573_v60  ;;  %2742 = vmatpush.bf16.msrb.mxu2 %v3577_v49 }
 0x527   :  { %2728 = vmatpush.bf16.msra.mxu1 %v3829_v10  ;;  %2756 = vmatpush.bf16.msrb.mxu3 %v3833_v17 }
 0x529   :  { %2715 = vmatpush.bf16.msra.mxu0 %v3541_v22  ;;  %2743 = vmatpush.bf16.msrb.mxu2 %v3545_v27  ;;  %v1891_v22 = vperm.slane %v4979_v11, 7 }
 0x52b   :  { %2729 = vmatpush.bf16.msra.mxu1 %v3797_v23  ;;  %2757 = vmatpush.bf16.msrb.mxu3 %v3801_v9 }
 0x52c   :  { %2716 = vmatmul.bf16.vlgmr.msra.gmra.mxu0 %v4947_v37  ;;  %2744 = vmatmul.bf16.vlgmr.msrb.gmra.mxu2 %v4947_v37 }
 0x52e   :  { %2730 = vmatmul.bf16.vlgmr.msra.gmra.mxu1 %v4949_v31  ;;  %2758 = vmatmul.bf16.vlgmr.msrb.gmra.mxu3 %v4949_v31 }
 0x549   :  { %v2549_v46 = vpop.f32.mrf.mxu0 }
 0x54a   :  { %v2550_v42 = vadd.f32 %v2549_v46, %v1884_v18 }
 0x54b   :  { %v2563_v44 = vpop.f32.mrf.mxu1 }
 0x54c   :  { %v2564_v48 = vadd.f32 %v2563_v44, %v2550_v42 }
 0x54e   :  { %2764 = vst [vmem:[%s5043_s7] sm:$0xff] %v2564_v48 }
 0x54f   :  { %v2577_v51 = vpop.f32.mrf.mxu2 }
 0x550   :  { %v2578_v37 = vadd.f32 %v2577_v51, %v1885_v47 }
 0x551   :  { %v2591_v31 = vpop.f32.mrf.mxu3  ;;  %v2551_v14 = vpop.f32.mrf.mxu0 }
 0x552   :  { %v2592_v16 = vadd.f32 %v2591_v31, %v2578_v37  ;;  %v2552_v52 = vadd.f32 %v2551_v14, %v1884_v18 }
 0x553   :  { %v2565_v53 = vpop.f32.mrf.mxu1 }
 0x554   :  { %2765 = vst [vmem:[%s5043_s7 + $0x8] sm:$0xff] %v2592_v16  ;;  %v2566_v26 = vadd.f32 %v2565_v53, %v2552_v52 }
 0x556   :  { %2772 = vst [vmem:[%s5043_s7 + $0x40] sm:$0xff] %v2566_v26 }
 0x557   :  { %v2579_v55 = vpop.f32.mrf.mxu2 }
 0x558   :  { %v2580_v25 = vadd.f32 %v2579_v55, %v1885_v47 }
 0x559   :  { %v2593_v56 = vpop.f32.mrf.mxu3 }
 0x55a   :  { %v2594_v12 = vadd.f32 %v2593_v56, %v2580_v25 }
 0x55c   :  { %2773 = vst [vmem:[%s5043_s7 + $0x48] sm:$0xff] %v2594_v12 }
 0x569   :  { %v2605_v34 = vpop.f32.mrf.mxu0 }
 0x56a   :  { %v2606_v30 = vadd.f32 %v2605_v34, %v1886_v40 }
 0x56b   :  { %v2619_v8 = vpop.f32.mrf.mxu1 }
 0x56c   :  { %v2620_v0 = vadd.f32 %v2619_v8, %v2606_v30 }
 0x56e   :  { %2766 = vst [vmem:[%s5043_s7 + $0x10] sm:$0xff] %v2620_v0 }
 0x56f   :  { %v2633_v2 = vpop.f32.mrf.mxu2 }
 0x570   :  { %v2634_v33 = vadd.f32 %v2633_v2, %v1887_v28 }
 0x571   :  { %v2647_v1 = vpop.f32.mrf.mxu3  ;;  %v2607_v38 = vpop.f32.mrf.mxu0 }
 0x572   :  { %v2648_v36 = vadd.f32 %v2647_v1, %v2634_v33  ;;  %v2608_v39 = vadd.f32 %v2607_v38, %v1886_v40 }
 0x573   :  { %v2621_v3 = vpop.f32.mrf.mxu1 }
 0x574   :  { %2767 = vst [vmem:[%s5043_s7 + $0x18] sm:$0xff] %v2648_v36  ;;  %v2622_v43 = vadd.f32 %v2621_v3, %v2608_v39 }
 0x576   :  { %2774 = vst [vmem:[%s5043_s7 + $0x50] sm:$0xff] %v2622_v43 }
 0x577   :  { %v2635_v7 = vpop.f32.mrf.mxu2 }
 0x578   :  { %v2636_v29 = vadd.f32 %v2635_v7, %v1887_v28 }
 0x579   :  { %v2649_v4 = vpop.f32.mrf.mxu3 }
 0x57a   :  { %v2650_v6 = vadd.f32 %v2649_v4, %v2636_v29 }
 0x57c   :  { %2775 = vst [vmem:[%s5043_s7 + $0x58] sm:$0xff] %v2650_v6 }
 0x589   :  { %v2661_v41 = vpop.f32.mrf.mxu0 }
 0x58a   :  { %v2662_v5 = vadd.f32 %v2661_v41, %v1888_v54 }
 0x58b   :  { %v2675_v61 = vpop.f32.mrf.mxu1 }
 0x58c   :  { %v2676_v32 = vadd.f32 %v2675_v61, %v2662_v5 }
 0x58e   :  { %2768 = vst [vmem:[%s5043_s7 + $0x20] sm:$0xff] %v2676_v32 }
 0x58f   :  { %v2689_v63 = vpop.f32.mrf.mxu2 }
 0x590   :  { %v2690_v45 = vadd.f32 %v2689_v63, %v1889_v35 }
 0x591   :  { %v2703_v57 = vpop.f32.mrf.mxu3  ;;  %v2663_v24 = vpop.f32.mrf.mxu0 }
 0x592   :  { %v2704_v62 = vadd.f32 %v2703_v57, %v2690_v45  ;;  %v2664_v60 = vadd.f32 %v2663_v24, %v1888_v54 }
 0x593   :  { %v2677_v10 = vpop.f32.mrf.mxu1 }
 0x594   :  { %2769 = vst [vmem:[%s5043_s7 + $0x28] sm:$0xff] %v2704_v62  ;;  %v2678_v49 = vadd.f32 %v2677_v10, %v2664_v60 }
 0x596   :  { %2776 = vst [vmem:[%s5043_s7 + $0x60] sm:$0xff] %v2678_v49 }
 0x597   :  { %v2691_v50 = vpop.f32.mrf.mxu2 }
 0x598   :  { %v2692_v58 = vadd.f32 %v2691_v50, %v1889_v35 }
 0x599   :  { %v2705_v59 = vpop.f32.mrf.mxu3 }
 0x59a   :  { %v2706_v17 = vadd.f32 %v2705_v59, %v2692_v58 }
 0x59c   :  { %2777 = vst [vmem:[%s5043_s7 + $0x68] sm:$0xff] %v2706_v17 }
 0x5a9   :  { %v2717_v13 = vpop.f32.mrf.mxu0 }
 0x5aa   :  { %v2718_v15 = vadd.f32 %v2717_v13, %v1890_v19 }
 0x5ab   :  { %v2731_v20 = vpop.f32.mrf.mxu1 }
 0x5ac   :  { %v2732_v21 = vadd.f32 %v2731_v20, %v2718_v15 }
 0x5ae   :  { %2770 = vst [vmem:[%s5043_s7 + $0x30] sm:$0xff] %v2732_v21 }
 0x5af   :  { %v2745_v23 = vpop.f32.mrf.mxu2 }
 0x5b0   :  { %v2746_v27 = vadd.f32 %v2745_v23, %v1891_v22 }
 0x5b1   :  { %v2759_v9 = vpop.f32.mrf.mxu3  ;;  %v2719_v18 = vpop.f32.mrf.mxu0 }
 0x5b2   :  { %v2720_v46 = vadd.f32 %v2719_v18, %v1890_v19  ;;  %v2760_v42 = vadd.f32 %v2759_v9, %v2746_v27 }
 0x5b3   :  { %v2733_v44 = vpop.f32.mrf.mxu1 }
 0x5b4   :  { %v2734_v47 = vadd.f32 %v2733_v44, %v2720_v46  ;;  %2771 = vst [vmem:[%s5043_s7 + $0x38] sm:$0xff] %v2760_v42 }
 0x5b6   :  { %2778 = vst [vmem:[%s5043_s7 + $0x70] sm:$0xff] %v2734_v47 }
 0x5b7   :  { %v2747_v11 = vpop.f32.mrf.mxu2 }
 0x5b8   :  { %v2748_v48 = vadd.f32 %v2747_v11, %v1891_v22 }
 0x5b9   :  { %v2761_v51 = vpop.f32.mrf.mxu3 }
 0x5ba   :  { %v2762_v37 = vadd.f32 %v2761_v51, %v2748_v48 }
 0x5bc   :  { %2779 = vst [vmem:[%s5043_s7 + $0x78] sm:$0xff] %v2762_v37 }
 0x5bd   :  { %2788 = vsyncmov [#allocation7] }
 0x5c0   :  { %s2789_s6 = vpop.sfrf %2788 }
 0x5c1   :  { %p4026_p0 = scmp.ne.s32.totalorder %s2789_s6, 0 }
 0x5c3   :  { %2793 = shalt.err (%p4026_p0)  }
 0x5c4   :  { %2795 = vsyncmov [#allocation7 + $0x1] }
 0x5c7   :  { %s2796_s26 = vpop.sfrf %2795 }
 0x5c8   :  { %p4027_p1 = scmp.ne.s32.totalorder %s2796_s26, 0 }
 0x5ca   :  { %2800 = shalt.err (%p4027_p1)  }
 0x5cb   :  { %2802 = vsyncmov [#allocation7 + $0x2] }
 0x5ce   :  { %s2803_s27 = vpop.sfrf %2802 }
 0x5cf   :  { %p4028_p2 = scmp.ne.s32.totalorder %s2803_s27, 0 }
 0x5d1   :  { %2807 = shalt.err (%p4028_p2)  }
 0x5d2   :  { %2809 = vsyncmov [#allocation7 + $0x3] }
 0x5d5   :  { %s2810_s28 = vpop.sfrf %2809 }
 0x5d6   :  { %p4029_p3 = scmp.ne.s32.totalorder %s2810_s28, 0 }
 0x5d8   :  { %2814 = shalt.err (%p4029_p3)  }
 0x5d9   :  { %2816 = vsyncmov [#allocation7 + $0x4] }
 0x5dc   :  { %s2817_s29 = vpop.sfrf %2816 }
 0x5dd   :  { %p4030_p4 = scmp.ne.s32.totalorder %s2817_s29, 0 }
 0x5df   :  { %2821 = shalt.err (%p4030_p4)  }
 0x5e0   :  { %2823 = vsyncmov [#allocation7 + $0x5] }
 0x5e3   :  { %s2824_s7 = vpop.sfrf %2823 }
 0x5e4   :  { %p4031_p5 = scmp.ne.s32.totalorder %s2824_s7, 0 }
 0x5e6   :  { %2828 = shalt.err (%p4031_p5)  }
 0x5e7   :  { %2830 = vsyncmov [#allocation7 + $0x6] }
 0x5ea   :  { %s2831_s30 = vpop.sfrf %2830 }
 0x5eb   :  { %p4032_p6 = scmp.ne.s32.totalorder %s2831_s30, 0 }
 0x5ed   :  { %2835 = shalt.err (%p4032_p6)  }
 0x5ee   :  { %2837 = vsyncmov [#allocation7 + $0x7] }
 0x5f1   :  { %s2838_s9 = vpop.sfrf %2837 }
 0x5f2   :  { %p4033_p7 = scmp.ne.s32.totalorder %s2838_s9, 0 }
 0x5f4   :  { %2842 = shalt.err (%p4033_p7)  }

</bundles_post_ra>
